<compile_context>
chip_gen: v5e
topology: v5e:2x2
jax: 0.10.0
libtpu: 0.0.40
codegen_flags: <defaults>
</compile_context>

<pallas_src>
import functools

import jax
import jax.numpy as jnp
from jax.experimental import pallas as pl
from jax.experimental.pallas import tpu as pltpu

EPS = 1e-5   # nn.InstanceNorm2d default eps
LANE = 128   # TPU lane width


def _round_up(n, m=LANE):
    return ((n + m - 1) // m) * m


def _relu6(y):
    return jnp.minimum(jnp.maximum(y, 0.0), 6.0)


def _inorm(y):
    """Single-pass InstanceNorm over rows of (N, C): biased var, no affine.

    Zero-padded channels stay exactly zero (sum = sumsq = 0 -> var = 0 ->
    0 * rsqrt(eps) = 0).
    """
    n = y.shape[0]
    s1 = jnp.sum(y, axis=0, keepdims=True)
    s2 = jnp.sum(y * y, axis=0, keepdims=True)
    mu = s1 * (1.0 / n)
    var = jnp.maximum(s2 * (1.0 / n) - mu * mu, 0.0)
    return (y - mu) * jax.lax.rsqrt(var + EPS)


def _ir_kernel(x_ref, wexp_ref, wdw_ref, wproj_ref, wse1_ref, wse2_ref,
               o_ref, *, H, W, use_res):
    HW = H * W
    hid_p = wexp_ref.shape[1]

    x = x_ref[0]                                   # (HW, Cin) f32, unpadded

    # ---- expansion 1x1 conv (MXU, bf16 operands, f32 accum) + IN + ReLU6 ----
    y = jnp.dot(x.astype(jnp.bfloat16), wexp_ref[...],
                preferred_element_type=jnp.float32)          # (HW, hid_p)
    y = _relu6(_inorm(y))

    # ---- depthwise 3x3, stride 1, pad 1 (VPU, flat (HW, C) layout) ----------
    # +/-W image-row neighbours: sublane-aligned value shifts (W % 8 == 0),
    # zero-filled at the top/bottom image rows.  No VMEM scratch round trip.
    zeros_w = jnp.zeros((W, hid_p), jnp.float32)
    g_up = jnp.concatenate([zeros_w, y[:HW - W]], axis=0)    # y[p - W]
    g_dn = jnp.concatenate([y[W:], zeros_w], axis=0)         # y[p + W]

    wdw = wdw_ref[...]                            # (9, hid_p); tap (dy,dx) at 3*dy+dx

    def col(kx):                                  # aggregate over kernel rows dy
        return (g_up * wdw[kx:kx + 1, :]
                + y * wdw[3 + kx:4 + kx, :]
                + g_dn * wdw[6 + kx:7 + kx, :])

    v_l, v_c, v_r = col(0), col(1), col(2)

    # +/-1 flat-row shifts on the XLU; wrapped elements are killed by the
    # column-boundary masks below (identical numerics to a zero-filled shift).
    v_l_sh = pltpu.roll(v_l, shift=1, axis=0)          # v_l[p - 1]
    v_r_sh = pltpu.roll(v_r, shift=HW - 1, axis=0)     # v_r[p + 1]  (= shift -1)

    wcol = jax.lax.broadcasted_iota(jnp.int32, (HW, 1), 0) % W
    not_first = (wcol != 0).astype(jnp.float32)
    not_last = (wcol != W - 1).astype(jnp.float32)

    acc = v_c + v_l_sh * not_first + v_r_sh * not_last
    y = _relu6(_inorm(acc))

    # ---- projection 1x1 conv (MXU) + IN fused with SE scale ------------------
    z = jnp.dot(y.astype(jnp.bfloat16), wproj_ref[...],
                preferred_element_type=jnp.float32)          # (HW, Cout)
    n = z.shape[0]
    s1 = jnp.sum(z, axis=0, keepdims=True)
    s2 = jnp.sum(z * z, axis=0, keepdims=True)
    mu = s1 * (1.0 / n)
    var = jnp.maximum(s2 * (1.0 / n) - mu * mu, 0.0)
    inv = jax.lax.rsqrt(var + EPS)                            # (1, Cout)

    # SE block: avg-pool of the IN output, derived from the IN stats
    # (analytically 0 for a no-affine IN; matches the reference within fp noise).
    pooled = (s1 * (1.0 / n) - mu) * inv                                           # (1, Cout)
    s = jnp.maximum(jnp.sum(pooled * wse1_ref[...], axis=1, keepdims=True), 0.0)   # (sq, 1)
    scale = jax.nn.sigmoid(jnp.sum(s * wse2_ref[...], axis=0, keepdims=True))      # (1, Cout)

    yf = (z - mu) * (inv * scale)                 # fused IN-scale * SE-scale
    if use_res:
        yf = yf + x
    o_ref[0] = yf                                 # (HW, Cout) store, real channels only


def prepare_params(params):
    """One-time weight prep (pad hidden dim to 128 lanes, cast MXU operands to bf16).

    Call once at init; keep out of the per-step hot path.
    """
    w_exp, w_dw, w_proj, w_se1, w_se2 = params
    hid = w_exp.shape[1]
    hid_p = _round_up(hid)
    wexp_p = jnp.pad(w_exp, ((0, 0), (0, hid_p - hid))).astype(jnp.bfloat16)    # (Cin, hid_p)
    wdw_p = jnp.pad(w_dw.reshape(9, hid), ((0, 0), (0, hid_p - hid)))           # (9, hid_p) f32
    wproj_p = jnp.pad(w_proj, ((0, hid_p - hid), (0, 0))).astype(jnp.bfloat16)  # (hid_p, Cout)
    wse1_p = w_se1.T                                                            # (sq, Cout) f32
    wse2_p = w_se2                                                              # (sq, Cout) f32
    return (wexp_p, wdw_p, wproj_p, wse1_p, wse2_p)


def inverted_residual(x, prepared_params, *, stride=1):
    """x: (B, H, W, Cin) float32 NHWC.  prepared_params from prepare_params()."""
    wexp_p, wdw_p, wproj_p, wse1_p, wse2_p = prepared_params
    B, H, W, Cin = x.shape
    hid_p = wexp_p.shape[1]
    Cout = wproj_p.shape[1]
    sq = wse1_p.shape[0]
    assert stride == 1, "only stride=1 supported"
    # TODO(synk): stride=2 depthwise (spatial downsampling) not implemented.
    assert W % 8 == 0 and (H * W) % 8 == 0, "fast path assumes sublane-aligned W / H*W"
    use_res = (stride == 1 and Cin == Cout)
    HW = H * W

    x_flat = x.reshape(B, HW, Cin)

    kernel = functools.partial(_ir_kernel, H=H, W=W, use_res=use_res)
    out = pl.pallas_call(
        kernel,
        out_shape=jax.ShapeDtypeStruct((B, HW, Cout), jnp.float32),
        grid_spec=pltpu.PrefetchScalarGridSpec(
            num_scalar_prefetch=0,
            grid=(B,),
            in_specs=[
                pl.BlockSpec((1, HW, Cin), lambda b: (b, 0, 0)),
                pl.BlockSpec((Cin, hid_p), lambda b: (0, 0)),
                pl.BlockSpec((9, hid_p), lambda b: (0, 0)),
                pl.BlockSpec((hid_p, Cout), lambda b: (0, 0)),
                pl.BlockSpec((sq, Cout), lambda b: (0, 0)),
                pl.BlockSpec((sq, Cout), lambda b: (0, 0)),
            ],
            out_specs=pl.BlockSpec((1, HW, Cout), lambda b: (b, 0, 0)),
        ),
        compiler_params=pltpu.CompilerParams(
            # B=2 -> one image per TensorCore on v7x; on single-TC v5e/v6e this
            # is a cheap 2-step serial loop (live VMEM ~1 MiB).
            dimension_semantics=("parallel",),
            vmem_limit_bytes=32 * 1024 * 1024,
        ),
    )(x_flat, wexp_p, wdw_p, wproj_p, wse1_p, wse2_p)

    return out.reshape(B, H, W, Cout)


def ref_forward(x, params, *, stride=1):
    """Pure-JAX f32 reference matching the PyTorch module semantics (NHWC)."""
    w_exp, w_dw, w_proj, w_se1, w_se2 = params
    B, H, W, Cin = x.shape

    def inorm(y):
        mu = jnp.mean(y, axis=(1, 2), keepdims=True)
        var = jnp.mean(jnp.square(y - mu), axis=(1, 2), keepdims=True)
        return (y - mu) * jax.lax.rsqrt(var + EPS)

    relu6 = lambda y: jnp.clip(y, 0.0, 6.0)

    y = jnp.einsum('bhwc,cd->bhwd', x, w_exp)
    y = relu6(inorm(y))
    yp = jnp.pad(y, ((0, 0), (1, 1), (1, 1), (0, 0)))
    acc = jnp.zeros_like(y)
    for dy in range(3):
        for dx in range(3):
            acc = acc + yp[:, dy:dy + H, dx:dx + W, :] * w_dw[dy, dx]
    y = relu6(inorm(acc))
    y = jnp.einsum('bhwc,cd->bhwd', y, w_proj)
    y = inorm(y)
    pooled = jnp.mean(y, axis=(1, 2))                       # (B, Cout)
    s = jax.nn.sigmoid(jnp.maximum(pooled @ w_se1, 0.0) @ w_se2)
    y = y * s[:, None, None, :]
    if stride == 1 and Cin == w_proj.shape[1]:
        y = y + x
    return y


if __name__ == "__main__":
    key = jax.random.PRNGKey(0)
    B, Cin, Cout, H, W = 2, 16, 16, 16, 16
    expand_ratio, reduction = 6, 16
    hid = Cin * expand_ratio                 # 96
    sq = max(Cout // reduction, 1)           # 1

    ks = jax.random.split(key, 6)
    x = jax.random.normal(ks[0], (B, H, W, Cin), jnp.float32)
    w_exp = jax.random.normal(ks[1], (Cin, hid), jnp.float32) * 0.1
    w_dw = jax.random.normal(ks[2], (3, 3, hid), jnp.float32) * 0.1
    w_proj = jax.random.normal(ks[3], (hid, Cout), jnp.float32) * 0.1
    w_se1 = jax.random.normal(ks[4], (Cout, sq), jnp.float32) * 0.1
    w_se2 = jax.random.normal(ks[5], (sq, Cout), jnp.float32) * 0.1
    params = (w_exp, w_dw, w_proj, w_se1, w_se2)

    prepared = prepare_params(params)        # one-time pad/cast, outside hot path
    fwd = jax.jit(functools.partial(inverted_residual, stride=1))
    out = jax.block_until_ready(fwd(x, prepared))
    ref = jax.block_until_ready(ref_forward(x, params, stride=1))

    assert out.shape == (B, H, W, Cout)
    max_err = float(jnp.max(jnp.abs(out - ref)))
    # bf16 MXU operands vs. the all-f32 reference -> ~1% relative error budget.
    assert jnp.allclose(out, ref, rtol=3e-2, atol=3e-2), f"max_err={max_err}"
    print("KERNEL_OK")
</pallas_src>

<mosaic_0001>
module attributes {stable_mosaic.version = 11 : i64} {
  func.func @_ir_kernel(%arg0: i32, %arg1: memref<1x256x16xf32, #tpu.memory_space<vmem>>, %arg2: memref<16x128xbf16, #tpu.memory_space<vmem>>, %arg3: memref<9x128xf32, #tpu.memory_space<vmem>>, %arg4: memref<128x16xbf16, #tpu.memory_space<vmem>>, %arg5: memref<1x16xf32, #tpu.memory_space<vmem>>, %arg6: memref<1x16xf32, #tpu.memory_space<vmem>>, %arg7: memref<1x256x16xf32, #tpu.memory_space<vmem>>) attributes {dimension_semantics = [#tpu.dimension_semantics<parallel>], iteration_bounds = array<i64: 2>, scalar_prefetch = 0 : i64, scratch_operands = 0 : i64, tpu.core_type = #tpu.core_type<tc>, window_params = [{transform_indices = @transform_0, window_bounds = array<i64: 1, 256, 16>}, {pipeline_mode = #tpu.pipeline_mode<synchronous>, transform_indices = @transform_1, window_bounds = array<i64: 16, 128>}, {pipeline_mode = #tpu.pipeline_mode<synchronous>, transform_indices = @transform_2, window_bounds = array<i64: 9, 128>}, {pipeline_mode = #tpu.pipeline_mode<synchronous>, transform_indices = @transform_3, window_bounds = array<i64: 128, 16>}, {pipeline_mode = #tpu.pipeline_mode<synchronous>, transform_indices = @transform_4, window_bounds = array<i64: 1, 16>}, {pipeline_mode = #tpu.pipeline_mode<synchronous>, transform_indices = @transform_5, window_bounds = array<i64: 1, 16>}, {transform_indices = @transform_6, window_bounds = array<i64: 1, 256, 16>}]} {
    %c0 = arith.constant 0 : index
    %c0_0 = arith.constant 0 : index
    %c0_1 = arith.constant 0 : index
    %0 = vector.load %arg1[%c0, %c0_0, %c0_1] : memref<1x256x16xf32, #tpu.memory_space<vmem>>, vector<1x256x16xf32>
    %1 = vector.shape_cast %0 : vector<1x256x16xf32> to vector<256x16xf32>
    %2 = arith.truncf %1 : vector<256x16xf32> to vector<256x16xbf16>
    %c0_2 = arith.constant 0 : index
    %c0_3 = arith.constant 0 : index
    %3 = vector.load %arg2[%c0_2, %c0_3] : memref<16x128xbf16, #tpu.memory_space<vmem>>, vector<16x128xbf16>
    %cst = arith.constant dense<0.000000e+00> : vector<256x128xf32>
    %4 = tpu.matmul %2, %3, %cst {dimension_numbers = #tpu.dot_dimension_numbers<[1], [0], [0], [1], [0, 0, 1, 1], [], []>} : vector<256x16xbf16>, vector<16x128xbf16>, vector<256x128xf32> -> vector<256x128xf32>
    %cst_4 = arith.constant dense<0.000000e+00> : vector<128xf32>
    %5 = vector.multi_reduction <add>, %4, %cst_4 [0] : vector<256x128xf32> to vector<128xf32>
    %6 = vector.shape_cast %5 : vector<128xf32> to vector<1x128xf32>
    %7 = arith.mulf %4, %4 : vector<256x128xf32>
    %cst_5 = arith.constant dense<0.000000e+00> : vector<128xf32>
    %8 = vector.multi_reduction <add>, %7, %cst_5 [0] : vector<256x128xf32> to vector<128xf32>
    %9 = vector.shape_cast %8 : vector<128xf32> to vector<1x128xf32>
    %cst_6 = arith.constant 3.906250e-03 : f32
    %10 = vector.broadcast %cst_6 : f32 to vector<1x128xf32>
    %11 = arith.mulf %6, %10 : vector<1x128xf32>
    %cst_7 = arith.constant 3.906250e-03 : f32
    %12 = vector.broadcast %cst_7 : f32 to vector<1x128xf32>
    %13 = arith.mulf %9, %12 : vector<1x128xf32>
    %14 = arith.mulf %11, %11 : vector<1x128xf32>
    %15 = arith.subf %13, %14 : vector<1x128xf32>
    %cst_8 = arith.constant 0.000000e+00 : f32
    %16 = vector.broadcast %cst_8 : f32 to vector<1x128xf32>
    %17 = arith.maximumf %15, %16 : vector<1x128xf32>
    %18 = vector.broadcast %11 : vector<1x128xf32> to vector<256x128xf32>
    %19 = arith.subf %4, %18 : vector<256x128xf32>
    %cst_9 = arith.constant 9.99999974E-6 : f32
    %20 = vector.broadcast %cst_9 : f32 to vector<1x128xf32>
    %21 = arith.addf %17, %20 : vector<1x128xf32>
    %22 = math.rsqrt %21 : vector<1x128xf32>
    %23 = vector.broadcast %22 : vector<1x128xf32> to vector<256x128xf32>
    %24 = arith.mulf %19, %23 : vector<256x128xf32>
    %cst_10 = arith.constant 0.000000e+00 : f32
    %25 = vector.broadcast %cst_10 : f32 to vector<256x128xf32>
    %26 = arith.maximumf %24, %25 : vector<256x128xf32>
    %cst_11 = arith.constant 6.000000e+00 : f32
    %27 = vector.broadcast %cst_11 : f32 to vector<256x128xf32>
    %28 = arith.minimumf %26, %27 : vector<256x128xf32>
    %cst_12 = arith.constant 0.000000e+00 : f32
    %29 = vector.broadcast %cst_12 : f32 to vector<16x128xf32>
    %30 = vector.extract_strided_slice %28 {offsets = [0, 0], sizes = [240, 128], strides = [1, 1]} : vector<256x128xf32> to vector<240x128xf32>
    %31 = tpu.concatenate %29, %30 in 0 : vector<16x128xf32>, vector<240x128xf32> -> vector<256x128xf32>
    %32 = vector.extract_strided_slice %28 {offsets = [16, 0], sizes = [240, 128], strides = [1, 1]} : vector<256x128xf32> to vector<240x128xf32>
    %33 = tpu.concatenate %32, %29 in 0 : vector<240x128xf32>, vector<16x128xf32> -> vector<256x128xf32>
    %c0_13 = arith.constant 0 : index
    %c0_14 = arith.constant 0 : index
    %34 = vector.load %arg3[%c0_13, %c0_14] : memref<9x128xf32, #tpu.memory_space<vmem>>, vector<9x128xf32>
    %35 = vector.extract_strided_slice %34 {offsets = [0, 0], sizes = [1, 128], strides = [1, 1]} : vector<9x128xf32> to vector<1x128xf32>
    %36 = vector.broadcast %35 : vector<1x128xf32> to vector<256x128xf32>
    %37 = arith.mulf %31, %36 : vector<256x128xf32>
    %38 = vector.extract_strided_slice %34 {offsets = [3, 0], sizes = [1, 128], strides = [1, 1]} : vector<9x128xf32> to vector<1x128xf32>
    %39 = vector.broadcast %38 : vector<1x128xf32> to vector<256x128xf32>
    %40 = arith.mulf %28, %39 : vector<256x128xf32>
    %41 = arith.addf %37, %40 : vector<256x128xf32>
    %42 = vector.extract_strided_slice %34 {offsets = [6, 0], sizes = [1, 128], strides = [1, 1]} : vector<9x128xf32> to vector<1x128xf32>
    %43 = vector.broadcast %42 : vector<1x128xf32> to vector<256x128xf32>
    %44 = arith.mulf %33, %43 : vector<256x128xf32>
    %45 = arith.addf %41, %44 : vector<256x128xf32>
    %46 = vector.extract_strided_slice %34 {offsets = [1, 0], sizes = [1, 128], strides = [1, 1]} : vector<9x128xf32> to vector<1x128xf32>
    %47 = vector.broadcast %46 : vector<1x128xf32> to vector<256x128xf32>
    %48 = arith.mulf %31, %47 : vector<256x128xf32>
    %49 = vector.extract_strided_slice %34 {offsets = [4, 0], sizes = [1, 128], strides = [1, 1]} : vector<9x128xf32> to vector<1x128xf32>
    %50 = vector.broadcast %49 : vector<1x128xf32> to vector<256x128xf32>
    %51 = arith.mulf %28, %50 : vector<256x128xf32>
    %52 = arith.addf %48, %51 : vector<256x128xf32>
    %53 = vector.extract_strided_slice %34 {offsets = [7, 0], sizes = [1, 128], strides = [1, 1]} : vector<9x128xf32> to vector<1x128xf32>
    %54 = vector.broadcast %53 : vector<1x128xf32> to vector<256x128xf32>
    %55 = arith.mulf %33, %54 : vector<256x128xf32>
    %56 = arith.addf %52, %55 : vector<256x128xf32>
    %57 = vector.extract_strided_slice %34 {offsets = [2, 0], sizes = [1, 128], strides = [1, 1]} : vector<9x128xf32> to vector<1x128xf32>
    %58 = vector.broadcast %57 : vector<1x128xf32> to vector<256x128xf32>
    %59 = arith.mulf %31, %58 : vector<256x128xf32>
    %60 = vector.extract_strided_slice %34 {offsets = [5, 0], sizes = [1, 128], strides = [1, 1]} : vector<9x128xf32> to vector<1x128xf32>
    %61 = vector.broadcast %60 : vector<1x128xf32> to vector<256x128xf32>
    %62 = arith.mulf %28, %61 : vector<256x128xf32>
    %63 = arith.addf %59, %62 : vector<256x128xf32>
    %64 = vector.extract_strided_slice %34 {offsets = [8, 0], sizes = [1, 128], strides = [1, 1]} : vector<9x128xf32> to vector<1x128xf32>
    %65 = vector.broadcast %64 : vector<1x128xf32> to vector<256x128xf32>
    %66 = arith.mulf %33, %65 : vector<256x128xf32>
    %67 = arith.addf %63, %66 : vector<256x128xf32>
    %c1_i32 = arith.constant 1 : i32
    %68 = tpu.dynamic_rotate %45 by %c1_i32 dim 0 : vector<256x128xf32>, i32 -> vector<256x128xf32>
    %c255_i32 = arith.constant 255 : i32
    %69 = tpu.dynamic_rotate %67 by %c255_i32 dim 0 : vector<256x128xf32>, i32 -> vector<256x128xf32>
    %70 = tpu.iota {dimensions = array<i32: 0>} : vector<256x1xi32>
    %c16_i32 = arith.constant 16 : i32
    %c0_i32 = arith.constant 0 : i32
    %71 = arith.cmpi eq, %c16_i32, %c0_i32 : i32
    %c1_i32_15 = arith.constant 1 : i32
    %72 = arith.select %71, %c1_i32_15, %c16_i32 : i32
    %73 = vector.broadcast %72 : i32 to vector<256x1xi32>
    %74 = arith.remsi %70, %73 : vector<256x1xi32>
    %c0_i32_16 = arith.constant 0 : i32
    %75 = vector.broadcast %c0_i32_16 : i32 to vector<256x1xi32>
    %76 = arith.cmpi ne, %74, %75 : vector<256x1xi32>
    %c0_i32_17 = arith.constant 0 : i32
    %77 = vector.broadcast %c0_i32_17 : i32 to vector<256x1xi32>
    %78 = arith.cmpi slt, %74, %77 : vector<256x1xi32>
    %c0_i32_18 = arith.constant 0 : i32
    %79 = arith.cmpi slt, %72, %c0_i32_18 : i32
    %80 = vector.broadcast %79 : i1 to vector<256x1xi1>
    %81 = vector.broadcast %80 : vector<256x1xi1> to vector<256x1xi1>
    %82 = arith.xori %78, %81 : vector<256x1xi1>
    %83 = arith.andi %82, %76 : vector<256x1xi1>
    %84 = vector.broadcast %72 : i32 to vector<256x1xi32>
    %85 = arith.addi %74, %84 : vector<256x1xi32>
    %86 = arith.select %83, %85, %74 : vector<256x1xi1>, vector<256x1xi32>
    %c0_i32_19 = arith.constant 0 : i32
    %87 = vector.broadcast %c0_i32_19 : i32 to vector<256x1xi32>
    %88 = arith.cmpi ne, %86, %87 : vector<256x1xi32>
    %89 = arith.extui %88 : vector<256x1xi1> to vector<256x1xi32>
    %90 = arith.sitofp %89 : vector<256x1xi32> to vector<256x1xf32>
    %c15_i32 = arith.constant 15 : i32
    %91 = vector.broadcast %c15_i32 : i32 to vector<256x1xi32>
    %92 = arith.cmpi ne, %86, %91 : vector<256x1xi32>
    %93 = arith.extui %92 : vector<256x1xi1> to vector<256x1xi32>
    %94 = arith.sitofp %93 : vector<256x1xi32> to vector<256x1xf32>
    %95 = vector.broadcast %90 : vector<256x1xf32> to vector<256x128xf32>
    %96 = arith.mulf %68, %95 : vector<256x128xf32>
    %97 = arith.addf %56, %96 : vector<256x128xf32>
    %98 = vector.broadcast %94 : vector<256x1xf32> to vector<256x128xf32>
    %99 = arith.mulf %69, %98 : vector<256x128xf32>
    %100 = arith.addf %97, %99 : vector<256x128xf32>
    %cst_20 = arith.constant dense<0.000000e+00> : vector<128xf32>
    %101 = vector.multi_reduction <add>, %100, %cst_20 [0] : vector<256x128xf32> to vector<128xf32>
    %102 = vector.shape_cast %101 : vector<128xf32> to vector<1x128xf32>
    %103 = arith.mulf %100, %100 : vector<256x128xf32>
    %cst_21 = arith.constant dense<0.000000e+00> : vector<128xf32>
    %104 = vector.multi_reduction <add>, %103, %cst_21 [0] : vector<256x128xf32> to vector<128xf32>
    %105 = vector.shape_cast %104 : vector<128xf32> to vector<1x128xf32>
    %cst_22 = arith.constant 3.906250e-03 : f32
    %106 = vector.broadcast %cst_22 : f32 to vector<1x128xf32>
    %107 = arith.mulf %102, %106 : vector<1x128xf32>
    %cst_23 = arith.constant 3.906250e-03 : f32
    %108 = vector.broadcast %cst_23 : f32 to vector<1x128xf32>
    %109 = arith.mulf %105, %108 : vector<1x128xf32>
    %110 = arith.mulf %107, %107 : vector<1x128xf32>
    %111 = arith.subf %109, %110 : vector<1x128xf32>
    %cst_24 = arith.constant 0.000000e+00 : f32
    %112 = vector.broadcast %cst_24 : f32 to vector<1x128xf32>
    %113 = arith.maximumf %111, %112 : vector<1x128xf32>
    %114 = vector.broadcast %107 : vector<1x128xf32> to vector<256x128xf32>
    %115 = arith.subf %100, %114 : vector<256x128xf32>
    %cst_25 = arith.constant 9.99999974E-6 : f32
    %116 = vector.broadcast %cst_25 : f32 to vector<1x128xf32>
    %117 = arith.addf %113, %116 : vector<1x128xf32>
    %118 = math.rsqrt %117 : vector<1x128xf32>
    %119 = vector.broadcast %118 : vector<1x128xf32> to vector<256x128xf32>
    %120 = arith.mulf %115, %119 : vector<256x128xf32>
    %cst_26 = arith.constant 0.000000e+00 : f32
    %121 = vector.broadcast %cst_26 : f32 to vector<256x128xf32>
    %122 = arith.maximumf %120, %121 : vector<256x128xf32>
    %cst_27 = arith.constant 6.000000e+00 : f32
    %123 = vector.broadcast %cst_27 : f32 to vector<256x128xf32>
    %124 = arith.minimumf %122, %123 : vector<256x128xf32>
    %125 = arith.truncf %124 : vector<256x128xf32> to vector<256x128xbf16>
    %c0_28 = arith.constant 0 : index
    %c0_29 = arith.constant 0 : index
    %126 = vector.load %arg4[%c0_28, %c0_29] : memref<128x16xbf16, #tpu.memory_space<vmem>>, vector<128x16xbf16>
    %cst_30 = arith.constant dense<0.000000e+00> : vector<256x16xf32>
    %127 = tpu.matmul %125, %126, %cst_30 {dimension_numbers = #tpu.dot_dimension_numbers<[1], [0], [0], [1], [0, 0, 1, 1], [], []>} : vector<256x128xbf16>, vector<128x16xbf16>, vector<256x16xf32> -> vector<256x16xf32>
    %cst_31 = arith.constant dense<0.000000e+00> : vector<16xf32>
    %128 = vector.multi_reduction <add>, %127, %cst_31 [0] : vector<256x16xf32> to vector<16xf32>
    %129 = vector.shape_cast %128 : vector<16xf32> to vector<1x16xf32>
    %130 = arith.mulf %127, %127 : vector<256x16xf32>
    %cst_32 = arith.constant dense<0.000000e+00> : vector<16xf32>
    %131 = vector.multi_reduction <add>, %130, %cst_32 [0] : vector<256x16xf32> to vector<16xf32>
    %132 = vector.shape_cast %131 : vector<16xf32> to vector<1x16xf32>
    %cst_33 = arith.constant 3.906250e-03 : f32
    %133 = vector.broadcast %cst_33 : f32 to vector<1x16xf32>
    %134 = arith.mulf %129, %133 : vector<1x16xf32>
    %cst_34 = arith.constant 3.906250e-03 : f32
    %135 = vector.broadcast %cst_34 : f32 to vector<1x16xf32>
    %136 = arith.mulf %132, %135 : vector<1x16xf32>
    %137 = arith.mulf %134, %134 : vector<1x16xf32>
    %138 = arith.subf %136, %137 : vector<1x16xf32>
    %cst_35 = arith.constant 0.000000e+00 : f32
    %139 = vector.broadcast %cst_35 : f32 to vector<1x16xf32>
    %140 = arith.maximumf %138, %139 : vector<1x16xf32>
    %cst_36 = arith.constant 9.99999974E-6 : f32
    %141 = vector.broadcast %cst_36 : f32 to vector<1x16xf32>
    %142 = arith.addf %140, %141 : vector<1x16xf32>
    %143 = math.rsqrt %142 : vector<1x16xf32>
    %cst_37 = arith.constant 3.906250e-03 : f32
    %144 = vector.broadcast %cst_37 : f32 to vector<1x16xf32>
    %145 = arith.mulf %129, %144 : vector<1x16xf32>
    %146 = arith.subf %145, %134 : vector<1x16xf32>
    %147 = arith.mulf %146, %143 : vector<1x16xf32>
    %c0_38 = arith.constant 0 : index
    %c0_39 = arith.constant 0 : index
    %148 = vector.load %arg5[%c0_38, %c0_39] : memref<1x16xf32, #tpu.memory_space<vmem>>, vector<1x16xf32>
    %149 = arith.mulf %147, %148 : vector<1x16xf32>
    %cst_40 = arith.constant dense<0.000000e+00> : vector<1xf32>
    %150 = vector.multi_reduction <add>, %149, %cst_40 [1] : vector<1x16xf32> to vector<1xf32>
    %151 = vector.shape_cast %150 : vector<1xf32> to vector<1x1xf32>
    %cst_41 = arith.constant 0.000000e+00 : f32
    %152 = vector.broadcast %cst_41 : f32 to vector<1x1xf32>
    %153 = arith.maximumf %151, %152 : vector<1x1xf32>
    %c0_42 = arith.constant 0 : index
    %c0_43 = arith.constant 0 : index
    %154 = vector.load %arg6[%c0_42, %c0_43] : memref<1x16xf32, #tpu.memory_space<vmem>>, vector<1x16xf32>
    %155 = vector.broadcast %153 : vector<1x1xf32> to vector<1x16xf32>
    %156 = arith.mulf %155, %154 : vector<1x16xf32>
    %cst_44 = arith.constant dense<0.000000e+00> : vector<16xf32>
    %157 = vector.multi_reduction <add>, %156, %cst_44 [0] : vector<1x16xf32> to vector<16xf32>
    %158 = vector.shape_cast %157 : vector<16xf32> to vector<1x16xf32>
    %159 = arith.negf %158 : vector<1x16xf32>
    %160 = math.exp %159 : vector<1x16xf32>
    %cst_45 = arith.constant 1.000000e+00 : f32
    %161 = vector.broadcast %cst_45 : f32 to vector<1x16xf32>
    %162 = arith.addf %161, %160 : vector<1x16xf32>
    %163 = arith.divf %161, %162 : vector<1x16xf32>
    %164 = vector.broadcast %134 : vector<1x16xf32> to vector<256x16xf32>
    %165 = arith.subf %127, %164 : vector<256x16xf32>
    %166 = arith.mulf %143, %163 : vector<1x16xf32>
    %167 = vector.broadcast %166 : vector<1x16xf32> to vector<256x16xf32>
    %168 = arith.mulf %165, %167 : vector<256x16xf32>
    %169 = arith.addf %168, %1 : vector<256x16xf32>
    %c0_46 = arith.constant 0 : index
    %c0_47 = arith.constant 0 : index
    %c0_48 = arith.constant 0 : index
    %170 = vector.load %arg7[%c0_46, %c0_47, %c0_48] : memref<1x256x16xf32, #tpu.memory_space<vmem>>, vector<1x256x16xf32>
    %171 = vector.shape_cast %170 : vector<1x256x16xf32> to vector<256x16xf32>
    %172 = vector.shape_cast %169 : vector<256x16xf32> to vector<1x256x16xf32>
    tpu.vector_store %arg7[%c0_46, %c0_47, %c0_48], %172 {strides = array<i32>} : memref<1x256x16xf32, #tpu.memory_space<vmem>>, vector<1x256x16xf32>,
    return
  }
  func.func @transform_0(%arg0: i32) -> (i32, i32, i32) {
    %c0_i32 = arith.constant 0 : i32
    %c0_i32_0 = arith.constant 0 : i32
    %c0_i32_1 = arith.constant 0 : i32
    return %arg0, %c0_i32, %c0_i32_0 : i32, i32, i32
  }
  func.func @transform_1(%arg0: i32) -> (i32, i32) {
    %c0_i32 = arith.constant 0 : i32
    %c0_i32_0 = arith.constant 0 : i32
    %c0_i32_1 = arith.constant 0 : i32
    return %c0_i32, %c0_i32_0 : i32, i32
  }
  func.func @transform_2(%arg0: i32) -> (i32, i32) {
    %c0_i32 = arith.constant 0 : i32
    %c0_i32_0 = arith.constant 0 : i32
    %c0_i32_1 = arith.constant 0 : i32
    return %c0_i32, %c0_i32_0 : i32, i32
  }
  func.func @transform_3(%arg0: i32) -> (i32, i32) {
    %c0_i32 = arith.constant 0 : i32
    %c0_i32_0 = arith.constant 0 : i32
    %c0_i32_1 = arith.constant 0 : i32
    return %c0_i32, %c0_i32_0 : i32, i32
  }
  func.func @transform_4(%arg0: i32) -> (i32, i32) {
    %c0_i32 = arith.constant 0 : i32
    %c0_i32_0 = arith.constant 0 : i32
    %c0_i32_1 = arith.constant 0 : i32
    return %c0_i32, %c0_i32_0 : i32, i32
  }
  func.func @transform_5(%arg0: i32) -> (i32, i32) {
    %c0_i32 = arith.constant 0 : i32
    %c0_i32_0 = arith.constant 0 : i32
    %c0_i32_1 = arith.constant 0 : i32
    return %c0_i32, %c0_i32_0 : i32, i32
  }
  func.func @transform_6(%arg0: i32) -> (i32, i32, i32) {
    %c0_i32 = arith.constant 0 : i32
    %c0_i32_0 = arith.constant 0 : i32
    %c0_i32_1 = arith.constant 0 : i32
    return %arg0, %c0_i32, %c0_i32_0 : i32, i32, i32
  }
}

</mosaic_0001>

<bundles_post_ra>
// kernel: inverted_residual.1
= control target key start
LH: loop header
LB: loop body
LE: loop exit
PB: predicated region body
PF: predicated region fallthrough
CT: control target
= control target key end

     0   :  { %11 = vsyncpa [#allocation3], 0  ;;  %s6213_s0 = inlined_call_operand.hbm [shape: f32[2,256,16], index: 0, kind: input, shape index: {}]   ;;  %s6214_s1 = inlined_call_operand.vmem [shape: bf16[16,128], index: 1, kind: input, shape index: {}]   ;;  %s6215_s2 = inlined_call_operand.vmem [shape: f32[9,128], index: 2, kind: input, shape index: {}]   ;;  %s6216_s3 = inlined_call_operand.vmem [shape: bf16[128,16], index: 3, kind: input, shape index: {}]   ;;  %s6217_s4 = inlined_call_operand.vmem [shape: f32[1,16], index: 4, kind: input, shape index: {}]   ;;  %s6218_s5 = inlined_call_operand.vmem [shape: f32[1,16], index: 5, kind: input, shape index: {}]   ;;  %s6219_s6 = inlined_call_operand.hbm [shape: f32[2,256,16], index: 6, kind: output, shape index: {}]  }
   0x1   :  { %13 = vsyncpa [#allocation3 + $0x1], 0 }
   0x2   :  { %14 = vsyncpa [#allocation4], 0 }
   0x3   :  { %16 = vsyncpa [#allocation4 + $0x1], 0  ;;  %s3276_s21 = smov 0   ;;  %s3278_s22 = smov 0  }
   0x4   :  { %s3280_s23 = smov 0   ;;  %s3282_s24 = smov 0  }
   0x5 LB: > { %s3297_s25 = sadd.s32 4294967295, %s3234_s24   ;;  %s2924_s26 = sadd.s32 4294967294, %s3234_s24   ;;  %s3234_s24 = sphi %s3282_s24, %s6746_s24   ;;  %s3230_s23 = sphi %s3280_s23, %s6745_s23   ;;  %s3226_s22 = sphi %s3278_s22, %s6744_s22   ;;  %s3222_s21 = sphi %s3276_s21, %s6743_s21  }
   0x6   : > { %s3301_s27 = sadd.s32 1, %s3234_s24   ;;  %s29_s28 = sadd.s32 1, %s3230_s23 }
   0x7   : > { %s26_s29 = ssub.s32 %s3234_s24, %s3301_s27  ;;  %p36_p0 = scmp.ne.s32.totalorder %s3230_s23, %s3226_s22 }
   0x8   : > { %p27_p1 = scmp.eq.s32.totalorder %s26_s29, 0  ;;  %p37_p2 = scmp.eq.s32.totalorder %s3234_s24, 0 }
   0x9   : > { %p42_p3 = scmp.ne.s32.totalorder %s3226_s22, %s3222_s21  ;;  %p43_p4 = scmp.eq.s32.totalorder %s3297_s25, 0 }
   0xa   : > { %s3313_s30 = scalar_select %p27_p1, %s3230_s23, %s29_s28  }
   0xb   : > { %p3315_p5 = por %p37_p2, %p36_p0  ;;  %p3319_p6 = por %p43_p4, %p42_p3 }
   0xc   : > { %p171_p7 = scmp.eq.s32.totalorder %s3297_s25, 1  ;;  %p177_p8 = scmp.eq.s32.totalorder %s2924_s26, 1 }
   0xd   : > { %p3055_p10 = scmp.lt.s32.totalorder %s3234_s24, 2  ;;  %s212_s11 = sand.u32 1, %s3230_s23  }
   0xe   : > { %p3326_p11 = por %p171_p7, %p36_p0  ;;  %p3330_p12 = por %p177_p8, %p42_p3 }
   0xf   : > { %s3023_s12 = sshll.u32 %s3234_s24, 8  ;;  %s2927_s13 = sshll.u32 %s212_s11, 8 }
  0x10   : > { %s221_s16 = scalar_lea.hbm %s6213_s0, %s3023_s12  ;;  %s216_s18 = scalar_lea.vmem [#allocation2], %s2927_s13 }
  0x11   : > { %s222_s17 = sshll.u32 %s221_s16, 4  ;;  %s224_s19 = sshll.u32 %s216_s18, 4  ;;  %s223_s17 = int_to_ptr.hbm [resolvable:$true] %s222_s17  ;;  %s225_s19 = int_to_ptr.vmem [resolvable:$true] %s224_s19 }
  0x12   : > { %p3341_p13 = pnand %p3055_p10, %p3315_p5  ;;  %p2930_p0 = scmp.ge.s32.totalorder %s3234_s24, 1 }
  0x13   : > { %p232_p1 = scmp.lt.s32.totalorder %s3234_s24, 3  ;;  %s213_s26 = scalar_lea.sflag [#allocation3], %s212_s11 }
  0x14   : > { %s3138_s28 = sshra.s32 %s223_s17, 4  ;;  %p3142_p3 = pneg %p3341_p13  ;;  %s3139_s28 = int_to_ptr.hbm [resolvable:$true] %s3138_s28 }
  0x15   : > { %s3140_s29 = scalar_lea.hbm %s3139_s28, 256  ;;  %s3145_s7 = scalar_lea.hbm %s6213_s0, 512 }
  0x16   : > { %p3141_p2 = scmp.ne.s32.totalorder %s3139_s28, %s3140_s29  ;;  %p3146_p5 = scmp.lt.s32.totalorder %s3139_s28, %s6213_s0 }
  0x17   : > { %p3147_p8 = scmp.lt.s32.totalorder %s3145_s7, %s3140_s29 }
  0x18   : > { %p3143_p4 = pnand %p3142_p3, %p3141_p2 }
  0x19   : > { %p3148_p10 = por %p3147_p8, %p3146_p5 }
  0x1a   : > { %p3144_p7 = pneg %p3143_p4 }
  0x1c   : > { %p3149_p9 = pnand %p3148_p10, %p3144_p7 }
  0x1e   : > { %3152 = shalt.err (!%p3149_p9)
}
  0x1f   : > { %s3236_s11 = smov 128   ;;  %s3237_s16 = smov 8  }
  0x20   : > { %3050 = dma.hbm_to_vmem [thread:$0]  (!%p3341_p13), %s223_s17, 4096, %s225_s19, %s213_s26, %s3236_s11, %s3236_s11, %s3237_s16  }
  0x21   : > { %p233_p2 = pnand %p2930_p0, %p232_p1 }
  0x23   : > { %236 = sbr.rel (%p233_p2) target bundleno = 1239 (0x4d7), region = 44 }
  0x28   : > { %s3362_s18 = sand.u32 1, %s3226_s22  }
  0x29   : > { %s2931_s28 = sshll.u32 %s3362_s18, 8  ;;  %s239_s29 = scalar_lea.sflag [#allocation3], %s3362_s18 }
  0x2a   : > { %s3368_s12 = scalar_lea.vmem [#allocation2], %s2931_s28 }
  0x2b   : > { %3213 = dma.done.wait (%p3319_p6), %s239_s29, 4096  }
  0x2c   : > { %3215 = vsyncadd (%p3319_p6), %s239_s29, 4294963200  ;;  %v3024_v0 = vld [vmem:[%s6214_s1] sm:$0xff]  ;;  %v274_v2 = vld [vmem:[%s3368_s12 + $0x8] sm:$0xff]  ;;  %vm329_vm0 = vcmask 130048   ;;  %s6017_s26 = scalar_lea.vmem [#allocation5], %s2931_s28  ;;  %s3033_s28 = sshll.u32 %s3297_s25, 8 }
  0x2d   : > { %v273_v1 = vld [vmem:[%s3368_s12] sm:$0xff]  ;;  %385 = vmatpush.bf16.msra.mxu0 %v3024_v0  ;;  %3034 = vmatpush.bf16.msra.mxu3 %v3024_v0  ;;  %v291_v4 = vld [vmem:[%s3368_s12 + $0x90] sm:$0xff]  ;;  %v292_v5 = vld [vmem:[%s3368_s12 + $0x98] sm:$0xff]  ;;  %s2847_s7 = scalar_lea.hbm %s6219_s6, %s3033_s28  ;;  %s2848_s14 = sshll.u32 %s6017_s26, 4  ;;  %s2849_s14 = int_to_ptr.vmem [resolvable:$true] %s2848_s14 }
  0x2e   : > { %v305_v3 = vpack.c.bf16 %v274_v2, %v273_v1  ;;  %v314_v6 = vpack.c.bf16 %v292_v5, %v291_v4  ;;  %v275_v7 = vld [vmem:[%s3368_s12 + $0x10] sm:$0xff]  ;;  %v276_v8 = vld [vmem:[%s3368_s12 + $0x18] sm:$0xff]  ;;  %v293_v10 = vld [vmem:[%s3368_s12 + $0xa0] sm:$0xff]  ;;  %s2850_s15 = sshll.u32 %s2847_s7, 4  ;;  %s2836_s11 = scalar_lea.sflag [#allocation4], %s3362_s18  ;;  %s2851_s15 = int_to_ptr.hbm [resolvable:$true] %s2850_s15 }
  0x2f   : > { %v306_v9 = vpack.c.bf16 %v276_v8, %v275_v7  ;;  %v294_v11 = vld [vmem:[%s3368_s12 + $0xa8] sm:$0xff]  ;;  %v277_v13 = vld [vmem:[%s3368_s12 + $0x20] sm:$0xff]  ;;  %v295_v16 = vld [vmem:[%s3368_s12 + $0xb0] sm:$0xff]  ;;  %s3182_s16 = sshra.s32 %s2851_s15, 4  ;;  %s3188_s19 = scalar_lea.hbm %s6219_s6, 512  ;;  %s3183_s16 = int_to_ptr.hbm [resolvable:$true] %s3182_s16 }
  0x30   : > { %2937 = vmatmul.msk.bf16.vlgmr.msra.gmra.mxu0 %vm329_vm0, %v305_v3  ;;  %2946 = vmatmul.msk.bf16.vlgmr.msra.gmra.mxu3 %vm329_vm0, %v314_v6  ;;  %v315_v12 = vpack.c.bf16 %v294_v11, %v293_v10  ;;  %v278_v14 = vld [vmem:[%s3368_s12 + $0x28] sm:$0xff]  ;;  %v296_v17 = vld [vmem:[%s3368_s12 + $0xb8] sm:$0xff]  ;;  %v279_v19 = vld [vmem:[%s3368_s12 + $0x30] sm:$0xff]  ;;  %s3184_s29 = scalar_lea.hbm %s3183_s16, 256  ;;  %p3189_p0 = scmp.lt.s32.totalorder %s3183_s16, %s6219_s6 }
  0x31   : > { %v307_v15 = vpack.c.bf16 %v278_v14, %v277_v13  ;;  %v316_v18 = vpack.c.bf16 %v296_v17, %v295_v16  ;;  %v280_v20 = vld [vmem:[%s3368_s12 + $0x38] sm:$0xff]  ;;  %v297_v22 = vld [vmem:[%s3368_s12 + $0xc0] sm:$0xff]  ;;  %v298_v23 = vld [vmem:[%s3368_s12 + $0xc8] sm:$0xff]  ;;  %p3185_p6 = scmp.ne.s32.totalorder %s3183_s16, %s3184_s29  ;;  %p3190_p1 = scmp.lt.s32.totalorder %s3188_s19, %s3184_s29 }
  0x32   : > { %v308_v21 = vpack.c.bf16 %v280_v20, %v279_v19  ;;  %v317_v24 = vpack.c.bf16 %v298_v23, %v297_v22  ;;  %v281_v25 = vld [vmem:[%s3368_s12 + $0x40] sm:$0xff]  ;;  %v282_v26 = vld [vmem:[%s3368_s12 + $0x48] sm:$0xff]  ;;  %v299_v28 = vld [vmem:[%s3368_s12 + $0xd0] sm:$0xff] }
  0x33   : > { %v309_v27 = vpack.c.bf16 %v282_v26, %v281_v25  ;;  %v300_v29 = vld [vmem:[%s3368_s12 + $0xd8] sm:$0xff]  ;;  %v283_v31 = vld [vmem:[%s3368_s12 + $0x50] sm:$0xff]  ;;  %v285_v34 = vld [vmem:[%s3368_s12 + $0x60] sm:$0xff]  ;;  %p3186_p9 = pnand %p3185_p6, %p3326_p11  ;;  %p3191_p3 = por %p3190_p1, %p3189_p0 }
  0x34   : > { %v318_v30 = vpack.c.bf16 %v300_v29, %v299_v28  ;;  %v284_v32 = vld [vmem:[%s3368_s12 + $0x58] sm:$0xff]  ;;  %v286_v35 = vld [vmem:[%s3368_s12 + $0x68] sm:$0xff]  ;;  %v301_v36 = vld [vmem:[%s3368_s12 + $0xe0] sm:$0xff] }
  0x35   : > { %v310_v33 = vpack.c.bf16 %v284_v32, %v283_v31  ;;  %v302_v37 = vld [vmem:[%s3368_s12 + $0xe8] sm:$0xff]  ;;  %v311_v38 = vpack.c.bf16 %v286_v35, %v285_v34  ;;  %v287_v40 = vld [vmem:[%s3368_s12 + $0x70] sm:$0xff]  ;;  %v288_v41 = vld [vmem:[%s3368_s12 + $0x78] sm:$0xff]  ;;  %p3187_p13 = pneg %p3186_p9 }
  0x36   : > { %v319_v39 = vpack.c.bf16 %v302_v37, %v301_v36  ;;  %v303_v42 = vld [vmem:[%s3368_s12 + $0xf0] sm:$0xff]  ;;  %v304_v43 = vld [vmem:[%s3368_s12 + $0xf8] sm:$0xff]  ;;  %v312_v44 = vpack.c.bf16 %v288_v41, %v287_v40  ;;  %v289_v46 = vld [vmem:[%s3368_s12 + $0x80] sm:$0xff] }
  0x37   : > { %v320_v45 = vpack.c.bf16 %v304_v43, %v303_v42  ;;  %v290_v47 = vld [vmem:[%s3368_s12 + $0x88] sm:$0xff]  ;;  %p3192_p4 = pnand %p3191_p3, %p3187_p13 }
  0x38   : > { %v313_v48 = vpack.c.bf16 %v290_v47, %v289_v46 }
  0x40   : > { %2938 = vmatmul.msk.bf16.gmra.mxu0 %vm329_vm0, %v306_v9  ;;  %2947 = vmatmul.msk.bf16.gmra.mxu3 %vm329_vm0, %v315_v12 }
  0x50   : > { %2939 = vmatmul.msk.bf16.gmra.mxu0 %vm329_vm0, %v307_v15  ;;  %2948 = vmatmul.msk.bf16.gmra.mxu3 %vm329_vm0, %v316_v18 }
  0x60   : > { %2940 = vmatmul.msk.bf16.gmra.mxu0 %vm329_vm0, %v308_v21  ;;  %2949 = vmatmul.msk.bf16.gmra.mxu3 %vm329_vm0, %v317_v24 }
  0x70   : > { %2941 = vmatmul.msk.bf16.gmra.mxu0 %vm329_vm0, %v309_v27  ;;  %2950 = vmatmul.msk.bf16.gmra.mxu3 %vm329_vm0, %v318_v30 }
  0x80   : > { %2942 = vmatmul.msk.bf16.gmra.mxu0 %vm329_vm0, %v310_v33  ;;  %2951 = vmatmul.msk.bf16.gmra.mxu3 %vm329_vm0, %v319_v39 }
  0x90   : > { %2943 = vmatmul.msk.bf16.gmra.mxu0 %vm329_vm0, %v311_v38  ;;  %2952 = vmatmul.msk.bf16.gmra.mxu3 %vm329_vm0, %v320_v45 }
  0xa0   : > { %2944 = vmatmul.msk.bf16.gmra.mxu0 %vm329_vm0, %v312_v44 }
  0xad   : > { %v3424_v49 = vpop.f32.mrf.mxu0 }
  0xae   : > { %v504_v8 = vmul.f32 %v3424_v49, %v3424_v49 }
  0xb0   : > { %2945 = vmatmul.msk.bf16.gmra.mxu0 %vm329_vm0, %v313_v48 }
  0xb3   : > { %v3435_v54 = vpop.f32.mrf.mxu3 }
  0xb5   : > { %v3427_v50 = vpop.f32.mrf.mxu0 }
  0xb6   : > { %v505_v6 = vmul.f32 %v3427_v50, %v3427_v50  ;;  %v467_v9 = vadd.f32 %v3427_v50, %v3424_v49 }
  0xb8   : > { %v536_v11 = vadd.f32 %v505_v6, %v504_v8 }
  0xbb   : > { %v3439_v56 = vpop.f32.mrf.mxu3 }
  0xbd   : > { %v3429_v51 = vpop.f32.mrf.mxu0 }
  0xbe   : > { %v506_v10 = vmul.f32 %v3429_v51, %v3429_v51  ;;  %v468_v12 = vadd.f32 %v467_v9, %v3429_v51 }
  0xc0   : > { %v537_v14 = vadd.f32 %v536_v11, %v506_v10 }
  0xc3   : > { %v3443_v58 = vpop.f32.mrf.mxu3 }
  0xc5   : > { %v3431_v52 = vpop.f32.mrf.mxu0 }
  0xc6   : > { %v507_v13 = vmul.f32 %v3431_v52, %v3431_v52  ;;  %v469_v15 = vadd.f32 %v468_v12, %v3431_v52 }
  0xc8   : > { %v538_v17 = vadd.f32 %v537_v14, %v507_v13 }
  0xcb   : > { %v3447_v60 = vpop.f32.mrf.mxu3 }
  0xcd   : > { %v3433_v53 = vpop.f32.mrf.mxu0 }
  0xce   : > { %v508_v16 = vmul.f32 %v3433_v53, %v3433_v53  ;;  %v470_v18 = vadd.f32 %v469_v15, %v3433_v53 }
  0xd0   : > { %v539_v22 = vadd.f32 %v538_v17, %v508_v16 }
  0xd3   : > { %v3453_v63 = vpop.f32.mrf.mxu3 }
  0xd5   : > { %v3437_v55 = vpop.f32.mrf.mxu0 }
  0xd6   : > { %v509_v19 = vmul.f32 %v3437_v55, %v3437_v55  ;;  %v471_v23 = vadd.f32 %v470_v18, %v3437_v55 }
  0xd8   : > { %v540_v25 = vadd.f32 %v539_v22, %v509_v19 }
  0xdb   : > { %v3457_v1 = vpop.f32.mrf.mxu3 }
  0xdd   : > { %v3441_v57 = vpop.f32.mrf.mxu0 }
  0xde   : > { %v510_v24 = vmul.f32 %v3441_v57, %v3441_v57  ;;  %v472_v26 = vadd.f32 %v471_v23, %v3441_v57 }
  0xe0   : > { %v541_v28 = vadd.f32 %v540_v25, %v510_v24  ;;  %v522_v25 = vmul.f32 %v3435_v54, %v3435_v54 }
  0xe3   : > { %v3461_v3 = vpop.f32.mrf.mxu3 }
  0xe5   : > { %v3445_v59 = vpop.f32.mrf.mxu0 }
  0xe6   : > { %v511_v27 = vmul.f32 %v3445_v59, %v3445_v59  ;;  %v473_v29 = vadd.f32 %v472_v26, %v3445_v59 }
  0xe8   : > { %v542_v31 = vadd.f32 %v541_v28, %v511_v27  ;;  %v523_v28 = vmul.f32 %v3439_v56, %v3439_v56 }
  0xeb   : > { %v3465_v5 = vpop.f32.mrf.mxu3 }
  0xed   : > { %v3449_v61 = vpop.f32.mrf.mxu0 }
  0xee   : > { %v512_v30 = vmul.f32 %v3449_v61, %v3449_v61  ;;  %v474_v32 = vadd.f32 %v473_v29, %v3449_v61 }
  0xf0   : > { %v543_v35 = vadd.f32 %v542_v31, %v512_v30 }
  0xf3   : > { %v3488_v21 = vpop.f32.mrf.mxu3 }
  0xf5   : > { %v3451_v62 = vpop.f32.mrf.mxu0 }
  0xf6   : > { %v513_v33 = vmul.f32 %v3451_v62, %v3451_v62  ;;  %v475_v36 = vadd.f32 %v474_v32, %v3451_v62  ;;  %v524_v32 = vmul.f32 %v3443_v58, %v3443_v58 }
  0xf8   : > { %v544_v39 = vadd.f32 %v543_v35, %v513_v33 }
  0xfb   : > { %v3507_v38 = vpop.f32.mrf.mxu3 }
  0xfd   : > { %v3455_v0 = vpop.f32.mrf.mxu0 }
  0xfe   : > { %v514_v37 = vmul.f32 %v3455_v0, %v3455_v0  ;;  %v476_v40 = vadd.f32 %v475_v36, %v3455_v0  ;;  %v525_v36 = vmul.f32 %v3447_v60, %v3447_v60 }
 0x100   : > { %v545_v42 = vadd.f32 %v544_v39, %v514_v37 }
 0x103   : > { %v3526_v13 = vpop.f32.mrf.mxu3 }
 0x105   : > { %v3459_v2 = vpop.f32.mrf.mxu0 }
 0x106   : > { %v515_v41 = vmul.f32 %v3459_v2, %v3459_v2  ;;  %v477_v43 = vadd.f32 %v476_v40, %v3459_v2  ;;  %v526_v40 = vmul.f32 %v3453_v63, %v3453_v63 }
 0x108   : > { %v546_v45 = vadd.f32 %v545_v42, %v515_v41 }
 0x10b   : > { %v3543_v31 = vpop.f32.mrf.mxu3 }
 0x10d   : > { %v3463_v4 = vpop.f32.mrf.mxu0 }
 0x10e   : > { %v516_v44 = vmul.f32 %v3463_v4, %v3463_v4  ;;  %v478_v46 = vadd.f32 %v477_v43, %v3463_v4  ;;  %v527_v43 = vmul.f32 %v3457_v1, %v3457_v1 }
 0x110   : > { %v547_v6 = vadd.f32 %v546_v45, %v516_v44 }
 0x115   : > { %v3469_v7 = vpop.f32.mrf.mxu0 }
 0x116   : > { %v517_v47 = vmul.f32 %v3469_v7, %v3469_v7  ;;  %v479_v8 = vadd.f32 %v478_v46, %v3469_v7  ;;  %v528_v46 = vmul.f32 %v3461_v3, %v3461_v3 }
 0x118   : > { %v548_v10 = vadd.f32 %v547_v6, %v517_v47 }
 0x11d   : > { %v3486_v20 = vpop.f32.mrf.mxu0 }
 0x11e   : > { %v518_v9 = vmul.f32 %v3486_v20, %v3486_v20  ;;  %v480_v11 = vadd.f32 %v479_v8, %v3486_v20  ;;  %v3560_v8 = vpop.f32.mrf.mxu3 }
 0x120   : > { %v549_v14 = vadd.f32 %v548_v10, %v518_v9  ;;  %v529_v9 = vmul.f32 %v3465_v5, %v3465_v5 }
 0x125   : > { %v3502_v34 = vpop.f32.mrf.mxu0 }
 0x126   : > { %v519_v12 = vmul.f32 %v3502_v34, %v3502_v34  ;;  %v481_v15 = vadd.f32 %v480_v11, %v3502_v34 }
 0x128   : > { %v550_v17 = vadd.f32 %v549_v14, %v519_v12  ;;  %v530_v12 = vmul.f32 %v3488_v21, %v3488_v21 }
 0x12d   : > { %v3518_v48 = vpop.f32.mrf.mxu0 }
 0x12e   : > { %v520_v16 = vmul.f32 %v3518_v48, %v3518_v48  ;;  %v482_v18 = vadd.f32 %v481_v15, %v3518_v48 }
 0x130   : > { %v551_v22 = vadd.f32 %v550_v17, %v520_v16  ;;  %v531_v16 = vmul.f32 %v3507_v38, %v3507_v38 }
 0x135   : > { %v3532_v19 = vpop.f32.mrf.mxu0 }
 0x136   : > { %v483_v23 = vadd.f32 %v482_v18, %v3532_v19  ;;  %v521_v24 = vmul.f32 %v3532_v19, %v3532_v19 }
 0x138   : > { %v484_v26 = vadd.f32 %v483_v23, %v3435_v54  ;;  %v552_v27 = vadd.f32 %v551_v22, %v521_v24  ;;  %v532_v22 = vmul.f32 %v3526_v13, %v3526_v13 }
 0x13a   : > { %v485_v29 = vadd.f32 %v484_v26, %v3439_v56  ;;  %v553_v30 = vadd.f32 %v552_v27, %v522_v25  ;;  %v533_v26 = vmul.f32 %v3543_v31, %v3543_v31 }
 0x13c   : > { %v486_v33 = vadd.f32 %v485_v29, %v3443_v58  ;;  %v554_v35 = vadd.f32 %v553_v30, %v523_v28  ;;  %v464_v28 = vpop.f32.mrf.mxu3 }
 0x13e   : > { %v487_v37 = vadd.f32 %v486_v33, %v3447_v60  ;;  %v555_v39 = vadd.f32 %v554_v35, %v524_v32  ;;  %v534_v32 = vmul.f32 %v3560_v8, %v3560_v8 }
 0x140   : > { %v488_v41 = vadd.f32 %v487_v37, %v3453_v63  ;;  %v556_v42 = vadd.f32 %v555_v39, %v525_v36  ;;  %v535_v36 = vmul.f32 %v464_v28, %v464_v28 }
 0x142   : > { %v489_v44 = vadd.f32 %v488_v41, %v3457_v1  ;;  %v557_v45 = vadd.f32 %v556_v42, %v526_v40 }
 0x144   : > { %v558_v47 = vadd.f32 %v557_v45, %v527_v43  ;;  %v490_v6 = vadd.f32 %v489_v44, %v3461_v3 }
 0x146   : > { %v491_v10 = vadd.f32 %v490_v6, %v3465_v5  ;;  %v559_v11 = vadd.f32 %v558_v47, %v528_v46 }
 0x148   : > { %v492_v14 = vadd.f32 %v491_v10, %v3488_v21  ;;  %v560_v15 = vadd.f32 %v559_v11, %v529_v9 }
 0x14a   : > { %v493_v17 = vadd.f32 %v492_v14, %v3507_v38  ;;  %v561_v18 = vadd.f32 %v560_v15, %v530_v12 }
 0x14c   : > { %v494_v23 = vadd.f32 %v493_v17, %v3526_v13  ;;  %v562_v24 = vadd.f32 %v561_v18, %v531_v16 }
 0x14e   : > { %v495_v25 = vadd.f32 %v494_v23, %v3543_v31  ;;  %v563_v27 = vadd.f32 %v562_v24, %v532_v22 }
 0x150   : > { %v564_v29 = vadd.f32 %v563_v27, %v533_v26  ;;  %v496_v30 = vadd.f32 %v495_v25, %v3560_v8  ;;  %v717_v25 = vld [vmem:[%s6215_s2] sm:$0xff]  ;;  %v1234_v27 = vlaneseq }
 0x152   : > { %v565_v33 = vadd.f32 %v564_v29, %v534_v32  ;;  %v497_v35 = vadd.f32 %v496_v30, %v464_v28  ;;  %v3589_v30 = vperm.slane %v717_v25, 0  ;;  %v3591_v32 = vperm.slane %v717_v25, 1 }
 0x154   : > { %v498_v37 = vrot.slane %v497_v35, 4  ;;  %v566_v39 = vadd.f32 %v565_v33, %v535_v36  ;;  %6319 = vst [vmem:[#allocation8_spill] sm:$0xff] %v3589_v30  ;;  %v3595_v33 = vperm.slane %v717_v25, 6 }
 0x155   : > { %6320 = vst [vmem:[#allocation9_spill] sm:$0xff] %v3591_v32 }
 0x156   : > { %v499_v40 = vadd.f32 %v498_v37, %v497_v35  ;;  %v567_v41 = vrot.slane %v566_v39, 4  ;;  %6321 = vst [vmem:[#allocation10_spill] sm:$0xff] %v3595_v33  ;;  %v3597_v35 = vperm.slane %v717_v25, 7 }
 0x158   : > { %v500_v42 = vrot.slane %v499_v40, 2  ;;  %v568_v43 = vadd.f32 %v567_v41, %v566_v39  ;;  %6322 = vst [vmem:[#allocation11_spill] sm:$0xff] %v3597_v35 }
 0x15a   : > { %v501_v44 = vadd.f32 %v500_v42, %v499_v40  ;;  %v569_v45 = vrot.slane %v568_v43, 2  ;;  %v3607_v42 = vshrl.u32 %v1234_v27, 7 }
 0x15c   : > { %v502_v46 = vrot.slane %v501_v44, 1  ;;  %v570_v47 = vadd.f32 %v569_v45, %v568_v43  ;;  %6323 = vst [vmem:[#allocation12_spill] sm:$0xff] %v3607_v42  ;;  %vm1236_vm5 = vcmp.lt.s32.totalorder %v3607_v42, 1  ;;  %vm1301_vm6 = vcmp.lt.s32.totalorder %v3607_v42, 7 }
 0x15e   : > { %v503_v6 = vadd.f32 %v502_v46, %v501_v44  ;;  %v571_v9 = vrot.slane %v570_v47, 1 }
 0x160   : > { %v572_v10 = vadd.f32 %v571_v9, %v570_v47  ;;  %v3580_v11 = vmul.f32 0.00390625, %v503_v6  ;;  %v3621_v9 = vperm.slane %v717_v25, 3 }
 0x162   : > { %v574_v12 = vmul.f32 0.00390625, %v572_v10  ;;  %v575_v14 = vmul.f32 %v3580_v11, %v3580_v11  ;;  %v608_v15 = vsub.f32 %v3560_v8, %v3580_v11  ;;  %v3593_v8 = vperm.slane %v717_v25, 2  ;;  %6324 = vst [vmem:[#allocation13_spill] sm:$0xff] %v3621_v9 }
 0x163   : > { %v603_v37 = vsub.f32 %v3465_v5, %v3580_v11  ;;  %v604_v39 = vsub.f32 %v3488_v21, %v3580_v11  ;;  %v605_v40 = vsub.f32 %v3507_v38, %v3580_v11  ;;  %v606_v41 = vsub.f32 %v3526_v13, %v3580_v11 }
 0x164   : > { %v576_v16 = vsub.f32 %v574_v12, %v575_v14  ;;  %v607_v43 = vsub.f32 %v3543_v31, %v3580_v11  ;;  %v609_v44 = vsub.f32 %v464_v28, %v3580_v11  ;;  %v1361_v14 = vadd.s32 224, %v3607_v42 }
 0x166   : > { %v577_v17 = vmax.f32 %v576_v16, 0.0 }
 0x168   : > { %v610_v18 = vadd.f32 1e-05, %v577_v17 }
 0x16a   : > { %3095 = vrsqrt.f32 %v610_v18  ;;  %vm617_vm2 = vweird.f32 %v610_v18 }
 0x170   : > { %v3096_v22 = vpop.eup %3095 }
 0x171   : > { %v612_v23 = vmul.f32 %v3096_v22, %v610_v18  ;;  %vm618_vm1 = vweird.f32 %v3096_v22 }
 0x172   : > { %vm619_vm3 = vmor %vm617_vm2, %vm618_vm1 }
 0x173   : > { %v613_v24 = vmul.f32 %v3096_v22, %v612_v23 }
 0x175   : > { %v614_v26 = vmul.f32 0.5, %v613_v24 }
 0x177   : > { %v615_v29 = vsub.f32 1.5, %v614_v26 }
 0x179   : > { %v616_v36 = vmul.f32 %v3096_v22, %v615_v29 }
 0x17b   : > { %v3612_v45 = vsel %vm619_vm3, %v3096_v22, %v616_v36  ;;  %v3638_v36 = vperm.slane %v717_v25, 4 }
 0x17c   : > { %v646_v5 = vmul.f32 %v3612_v45, %v603_v37  ;;  %v647_v21 = vmul.f32 %v3612_v45, %v604_v39  ;;  %v648_v46 = vmul.f32 %v3612_v45, %v605_v40  ;;  %v649_v38 = vmul.f32 %v3612_v45, %v606_v41 }
 0x17d   : > { %v650_v13 = vmul.f32 %v3612_v45, %v607_v43  ;;  %v651_v47 = vmul.f32 %v3612_v45, %v608_v15  ;;  %v652_v6 = vmul.f32 %v3612_v45, %v609_v44  ;;  %6328 = vst [vmem:[#allocation17_spill] sm:$0xff] %v3638_v36  ;;  %v1565_v43 = vand.u32 15, %v1361_v14  ;;  %v3671_v14 = vld [vmem:[%s6215_s2 + $0x8] ss:$0 sm:$0xff] }
 0x17e   : > { %v678_v31 = vmax.f32 %v646_v5, 0.0  ;;  %v679_v28 = vmax.f32 %v647_v21, 0.0  ;;  %v680_v10 = vmax.f32 %v648_v46, 0.0  ;;  %v681_v12 = vmax.f32 %v649_v38, 0.0  ;;  %6329 = vst [vmem:[#allocation18_spill] sm:$0xff] %v3671_v14 }
 0x17f   : > { %v682_v16 = vmax.f32 %v650_v13, 0.0  ;;  %v683_v17 = vmax.f32 %v651_v47, 0.0  ;;  %v684_v18 = vmax.f32 %v652_v6, 0.0  ;;  %v3652_v21 = vperm.slane %v717_v25, 5 }
 0x180   : > { %v3624_v22 = vmin.f32 %v678_v31, 6.0  ;;  %v3626_v23 = vmin.f32 %v679_v28, 6.0  ;;  %v3628_v24 = vmin.f32 %v680_v10, 6.0  ;;  %v3630_v15 = vmin.f32 %v681_v12, 6.0 }
 0x181   : > { %v3632_v26 = vmin.f32 %v682_v16, 6.0  ;;  %v3634_v27 = vmin.f32 %v683_v17, 6.0  ;;  %v3636_v29 = vmin.f32 %v684_v18, 6.0  ;;  %vm1777_vm4 = vcmp.ne.s32.totalorder %v1565_v43, 0 }
 0x182   : > { %6325 = vst [vmem:[#allocation14_spill] sm:$0xff] %v3626_v23  ;;  %v746_v37 = vmul.f32 %v3589_v30, %v3624_v22  ;;  %v747_v39 = vmul.f32 %v3589_v30, %v3626_v23  ;;  %v748_v40 = vmul.f32 %v3589_v30, %v3628_v24  ;;  %v779_v41 = vmul.f32 %v3621_v9, %v3628_v24 }
 0x183   : > { %6326 = vst [vmem:[#allocation15_spill] sm:$0xff] %v3628_v24  ;;  %v780_v44 = vmul.f32 %v3621_v9, %v3630_v15  ;;  %v781_v5 = vmul.f32 %v3621_v9, %v3632_v26  ;;  %v844_v38 = vmul.f32 %v3595_v33, %v3632_v26  ;;  %v845_v13 = vmul.f32 %v3595_v33, %v3634_v27 }
 0x184   : > { %6327 = vst [vmem:[#allocation16_spill] sm:$0xff] %v3632_v26  ;;  %v811_v46 = vadd.f32 %v779_v41, %v746_v37  ;;  %v908_v47 = vmul.f32 %v3591_v32, %v3626_v23  ;;  %v846_v28 = vmul.f32 %v3595_v33, %v3636_v29  ;;  %v909_v10 = vmul.f32 %v3591_v32, %v3628_v24 }
 0x185   : > { %v812_v6 = vadd.f32 %v780_v44, %v747_v39  ;;  %v813_v31 = vadd.f32 %v781_v5, %v748_v40  ;;  %v941_v25 = vmul.f32 %v3638_v36, %v3630_v15  ;;  %v942_v12 = vmul.f32 %v3638_v36, %v3632_v26 }
 0x186   : > { %v3673_v16 = vadd.f32 %v844_v38, %v811_v46  ;;  %v1006_v37 = vmul.f32 %v3597_v35, %v3634_v27  ;;  %v1007_v41 = vmul.f32 %v3597_v35, %v3636_v29  ;;  %v1069_v44 = vmul.f32 %v3593_v8, %v3626_v23 }
 0x187   : > { %v876_v17 = vadd.f32 %v845_v13, %v812_v6  ;;  %v3675_v18 = vadd.f32 %v846_v28, %v813_v31  ;;  %v973_v39 = vadd.f32 %v941_v25, %v908_v47  ;;  %v974_v40 = vadd.f32 %v942_v12, %v909_v10 }
 0x188   : > { %6330 = vst [vmem:[#allocation19_spill] sm:$0xff] %v3673_v16  ;;  %v1070_v5 = vmul.f32 %v3593_v8, %v3628_v24  ;;  %v1102_v46 = vmul.f32 %v3652_v21, %v3630_v15  ;;  %v1103_v38 = vmul.f32 %v3652_v21, %v3632_v26  ;;  %v1167_v28 = vmul.f32 %v3671_v14, %v3634_v27 }
 0x189   : > { %6331 = vst [vmem:[#allocation20_spill] sm:$0xff] %v3675_v18  ;;  %v1037_v13 = vadd.f32 %v1006_v37, %v973_v39  ;;  %v1038_v47 = vadd.f32 %v1007_v41, %v974_v40  ;;  %v1168_v43 = vmul.f32 %v3671_v14, %v3636_v29  ;;  %v6230_v10 = vmov 0.0  }
 0x18a   : > { %v1134_v6 = vadd.f32 %v1102_v46, %v1069_v44  ;;  %v1135_v31 = vadd.f32 %v1103_v38, %v1070_v5  ;;  %v2967_v25 = vsel %vm1777_vm4, 1.0, %v6230_v10  ;;  %v6229_v12 = vrot.slane %v3673_v16, 7 }
 0x18b   : > { %v1230_v24 = vrot.slane %v876_v17, 7  ;;  %v6226_v33 = vrot.slane %v3675_v18, 7  ;;  %v3874_v18 = vmul.f32 %v3638_v36, %v3624_v22 }
 0x18c   : > { %v3697_v23 = vadd.f32 %v1167_v28, %v1134_v6  ;;  %v3699_v37 = vadd.f32 %v1168_v43, %v1135_v31  ;;  %v1355_v31 = vadd.s32 176, %v3607_v42  ;;  %v1351_v28 = vadd.s32 144, %v3607_v42 }
 0x18d   : > { %v1239_v39 = vsel %vm1236_vm5, %v1230_v24, %v6226_v33  ;;  %v1240_v40 = vsel %vm1236_vm5, %v6229_v12, %v1230_v24  ;;  %v1349_v24 = vadd.s32 128, %v3607_v42  ;;  %v1353_v43 = vadd.s32 160, %v3607_v42  ;;  %6355 = vst [vmem:[#allocation39_spill] sm:$0xff] %v3874_v18 }
 0x18e   : > { %6332 = vst [vmem:[#allocation21_spill] sm:$0xff] %v3697_v23  ;;  %v6228_v17 = vrot.slane %v3697_v23, 1  ;;  %v6227_v41 = vrot.slane %v3699_v37, 1  ;;  %v1969_v44 = vmul.f32 %v2967_v25, %v1240_v40  ;;  %v3712_v5 = vadd.f32 %v1239_v39, %v1038_v47 }
 0x18f   : > { %6333 = vst [vmem:[#allocation22_spill] sm:$0xff] %v3699_v37  ;;  %v1352_v47 = vadd.s32 152, %v3607_v42  ;;  %v1359_v25 = vadd.s32 208, %v3607_v42  ;;  %v1360_v39 = vadd.s32 216, %v3607_v42  ;;  %v1523_v40 = vand.u32 15, %v1355_v31 }
 0x190   : > { %6334 = vst [vmem:[#allocation23_spill] sm:$0xff] %v3712_v5  ;;  %v1304_v46 = vsel %vm1301_vm6, %v6228_v17, %v6227_v41  ;;  %v2001_v38 = vadd.f32 %v1969_v44, %v1037_v13  ;;  %v1481_v33 = vand.u32 15, %v1349_v24  ;;  %v1495_v41 = vand.u32 15, %v1351_v28 }
 0x191   : > { %v1509_v13 = vand.u32 15, %v1353_v43  ;;  %v1502_v44 = vand.u32 15, %v1352_v47  ;;  %vm1771_vm7 = vcmp.ne.s32.totalorder %v1523_v40, 0  ;;  %v578_v47 = vsub.f32 %v3424_v49, %v3580_v11 }
 0x192   : > { %v3720_v6 = vadd.f32 %v2001_v38, %v1304_v46  ;;  %v1551_v46 = vand.u32 15, %v1359_v25  ;;  %v1558_v38 = vand.u32 15, %v1360_v39  ;;  %vm1765_vm8 = vcmp.ne.s32.totalorder %v1481_v33, 0 }
 0x193   : > { %vm1767_vm9 = vcmp.ne.s32.totalorder %v1495_v41, 0  ;;  %vm1769_vm10 = vcmp.ne.s32.totalorder %v1509_v13, 0  ;;  %vm1864_vm11 = vcmp.ne.s32.totalorder %v1502_v44, 15  ;;  %v3730_v17 = vsel %vm1771_vm7, 1.0, %v6230_v10 }
 0x194   : > { %6335 = vst [vmem:[#allocation24_spill] sm:$0xff] %v3720_v6  ;;  %vm1775_vm12 = vcmp.ne.s32.totalorder %v1551_v46, 0  ;;  %vm1872_vm13 = vcmp.ne.s32.totalorder %v1558_v38, 15  ;;  %v3733_v12 = vsel %vm1765_vm8, 1.0, %v6230_v10  ;;  %v3736_v31 = vsel %vm1767_vm9, 1.0, %v6230_v10 }
 0x195   : > { %6336 = vst [vmem:[#allocation25_spill] sm:$0xff] %v3730_v17  ;;  %v3739_v24 = vsel %vm1769_vm10, 1.0, %v6230_v10  ;;  %v3742_v28 = vsel %vm1864_vm11, 1.0, %v6230_v10  ;;  %v3745_v33 = vmul.f32 0.0, %v3597_v35  ;;  %v3748_v41 = vsel %vm1775_vm12, 1.0, %v6230_v10 }
 0x196   : > { %6337 = vst [vmem:[#allocation26_spill] sm:$0xff] %v3733_v12  ;;  %v3751_v43 = vsel %vm1872_vm13, 1.0, %v6230_v10  ;;  %v579_v25 = vsub.f32 %v3427_v50, %v3580_v11  ;;  %v595_v39 = vsub.f32 %v3532_v19, %v3580_v11  ;;  %v597_v40 = vsub.f32 %v3439_v56, %v3580_v11 }
 0x197   : > { %6338 = vst [vmem:[#allocation27_spill] sm:$0xff] %v3736_v31  ;;  %v911_v13 = vmul.f32 %v3591_v32, %v3632_v26  ;;  %v944_v44 = vmul.f32 %v3638_v36, %v3636_v29  ;;  %v580_v46 = vsub.f32 %v3429_v51, %v3580_v11  ;;  %v599_v49 = vsub.f32 %v3447_v60, %v3580_v11 }
 0x198   : > { %6339 = vst [vmem:[#allocation28_spill] sm:$0xff] %v3739_v24  ;;  %v638_v56 = vmul.f32 %v3612_v45, %v595_v39  ;;  %v640_v38 = vmul.f32 %v3612_v45, %v597_v40  ;;  %v1072_v50 = vmul.f32 %v3593_v8, %v3632_v26  ;;  %v1105_v39 = vmul.f32 %v3652_v21, %v3636_v29 }
 0x199   : > { %6340 = vst [vmem:[#allocation29_spill] sm:$0xff] %v3742_v28  ;;  %v976_v19 = vadd.f32 %v944_v44, %v911_v13  ;;  %v3819_v44 = vmul.f32 %v3621_v9, %v3636_v29  ;;  %v3825_v60 = vmul.f32 %v3612_v45, %v579_v25  ;;  %v3828_v6 = vmul.f32 %v3612_v45, %v580_v46 }
 0x19a   : > { %6341 = vst [vmem:[#allocation30_spill] sm:$0xff] %v3745_v33  ;;  %v670_v40 = vmax.f32 %v638_v56, 0.0  ;;  %v3814_v56 = vmul.f32 %v3612_v45, %v578_v47  ;;  %v3830_v13 = vadd.f32 %v1105_v39, %v1072_v50  ;;  %v749_v47 = vmul.f32 %v3589_v30, %v3630_v15  ;;  %v6348_v50 = vld [vmem:[#allocation10_spill] sm:$0xff] }
 0x19b   : > { %6342 = vst [vmem:[#allocation31_spill] sm:$0xff] %v3748_v41  ;;  %v672_v41 = vmax.f32 %v640_v38, 0.0  ;;  %v642_v38 = vmul.f32 %v3612_v45, %v599_v49  ;;  %v3822_v51 = vadd.f32 %v3745_v33, %v976_v19  ;;  %v3840_v29 = vmul.f32 %v3621_v9, %v3624_v22  ;;  %v6347_v19 = vld [vmem:[#allocation14_spill] sm:$0xff] }
 0x19c   : > { %6343 = vst [vmem:[#allocation32_spill] sm:$0xff] %v3751_v43  ;;  %v3834_v10 = vmin.f32 %v670_v40, 6.0  ;;  %v3844_v25 = vmul.f32 %v3621_v9, %v6347_v19  ;;  %v782_v46 = vmul.f32 %v3621_v9, %v3634_v27  ;;  %v3850_v39 = vmul.f32 %v6348_v50, %v3624_v22 }
 0x19d   : > { %6344 = vst [vmem:[#allocation33_spill] sm:$0xff] %v3819_v44  ;;  %v3836_v49 = vmin.f32 %v672_v41, 6.0  ;;  %v3854_v40 = vmul.f32 %v6348_v50, %v6347_v19  ;;  %v6351_v41 = vld [vmem:[#allocation15_spill] sm:$0xff]  ;;  %v3862_v5 = vmul.f32 %v6348_v50, %v3630_v15  ;;  %v3870_v37 = vmul.f32 %v3591_v32, %v3630_v15 }
 0x19e   : > { %6345 = vst [vmem:[#allocation34_spill] sm:$0xff] %v3822_v51  ;;  %v3858_v17 = vmul.f32 %v6348_v50, %v6351_v41  ;;  %v674_v51 = vmax.f32 %v642_v38, 0.0  ;;  %v3878_v44 = vmul.f32 %v3638_v36, %v6347_v19  ;;  %v3882_v24 = vmul.f32 %v3638_v36, %v6351_v41 }
 0x19f   : > { %6346 = vst [vmem:[#allocation35_spill] sm:$0xff] %v3830_v13  ;;  %v3866_v13 = vmul.f32 %v3591_v32, %v3624_v22  ;;  %v3886_v38 = vmul.f32 %v3638_v36, %v3634_v27  ;;  %v738_v31 = vmul.f32 %v3589_v30, %v3834_v10  ;;  %v771_v12 = vmul.f32 %v3621_v9, %v3836_v49 }
 0x1a0   : > { %6349 = vst [vmem:[#allocation14_spill] sm:$0xff] %v3850_v39  ;;  %v3894_v33 = vmul.f32 %v3597_v35, %v3624_v22  ;;  %v3902_v18 = vmul.f32 %v3597_v35, %v6351_v41  ;;  %v3906_v43 = vmul.f32 %v3597_v35, %v3630_v15  ;;  %v3910_v28 = vmul.f32 %v3597_v35, %v3632_v26 }
 0x1a1   : > { %6350 = vst [vmem:[#allocation36_spill] sm:$0xff] %v3854_v40  ;;  %v3914_v23 = vmul.f32 %v3593_v8, %v3624_v22  ;;  %v3934_v16 = vadd.f32 %v782_v46, %v749_v47  ;;  %v3954_v47 = vmul.f32 %v3671_v14, %v3630_v15 }
 0x1a2   : > { %6352 = vst [vmem:[#allocation15_spill] sm:$0xff] %v3858_v17 }
 0x1a3   : > { %6353 = vst [vmem:[#allocation37_spill] sm:$0xff] %v3862_v5 }
 0x1a4   : > { %6354 = vst [vmem:[#allocation38_spill] sm:$0xff] %v3866_v13  ;;  %v803_v13 = vadd.f32 %v771_v12, %v738_v31  ;;  %v6376_v12 = vsub.f32 %v3433_v53, %v3580_v11 }
 0x1a5   : > { %6356 = vst [vmem:[#allocation40_spill] sm:$0xff] %v3878_v44  ;;  %v3898_v44 = vmul.f32 %v3597_v35, %v6347_v19 }
 0x1a6   : > { %6357 = vst [vmem:[#allocation41_spill] sm:$0xff] %v3882_v24  ;;  %v3938_v24 = vmul.f32 %v3652_v21, %v3634_v27  ;;  %v3958_v27 = vmul.f32 %v3671_v14, %v3632_v26  ;;  %v625_v31 = vmul.f32 %v3612_v45, %v6376_v12  ;;  %v6380_v12 = vsub.f32 %v3449_v61, %v3580_v11 }
 0x1a7   : > { %6358 = vst [vmem:[#allocation42_spill] sm:$0xff] %v3894_v33  ;;  %v3918_v33 = vmul.f32 %v3593_v8, %v3630_v15  ;;  %v6384_v61 = vsub.f32 %v3463_v4, %v3580_v11  ;;  %v6389_v4 = vsub.f32 %v3518_v48, %v3580_v11  ;;  %v6393_v48 = vsub.f32 %v3457_v1, %v3580_v11 }
 0x1a8   : > { %6359 = vst [vmem:[#allocation43_spill] sm:$0xff] %v3898_v44  ;;  %v3920_v44 = vmin.f32 %v674_v51, 6.0  ;;  %v3942_v51 = vmul.f32 %v3671_v14, %v3624_v22 }
 0x1a9   : > { %6360 = vst [vmem:[#allocation44_spill] sm:$0xff] %v3902_v18  ;;  %v3924_v18 = vmul.f32 %v3652_v21, %v3624_v22  ;;  %v6375_v22 = vsub.f32 %v3431_v52, %v3580_v11 }
 0x1aa   : > { %6361 = vst [vmem:[#allocation45_spill] sm:$0xff] %v3906_v43  ;;  %v3928_v43 = vmul.f32 %v3652_v21, %v6347_v19  ;;  %v836_v52 = vmul.f32 %v6348_v50, %v3920_v44 }
 0x1ab   : > { %6362 = vst [vmem:[#allocation46_spill] sm:$0xff] %v3910_v28  ;;  %v3932_v28 = vmul.f32 %v3652_v21, %v6351_v41  ;;  %v624_v46 = vmul.f32 %v3612_v45, %v6375_v22  ;;  %v6379_v22 = vsub.f32 %v3445_v59, %v3580_v11  ;;  %v6383_v59 = vsub.f32 %v3459_v2, %v3580_v11 }
 0x1ac   : > { %6363 = vst [vmem:[#allocation47_spill] sm:$0xff] %v3914_v23  ;;  %v6388_v2 = vsub.f32 %v3502_v34, %v3580_v11  ;;  %v6392_v34 = vsub.f32 %v3453_v63, %v3580_v11  ;;  %v657_v63 = vmax.f32 %v625_v31, 0.0 }
 0x1ad   : > { %6364 = vst [vmem:[#allocation48_spill] sm:$0xff] %v3920_v44  ;;  %v628_v53 = vmul.f32 %v3612_v45, %v6379_v22  ;;  %v632_v22 = vmul.f32 %v3612_v45, %v6383_v59 }
 0x1ae   : > { %6365 = vst [vmem:[#allocation49_spill] sm:$0xff] %v3924_v18  ;;  %v3946_v18 = vmul.f32 %v3671_v14, %v6347_v19  ;;  %v6377_v19 = vsub.f32 %v3437_v55, %v3580_v11  ;;  %v629_v55 = vmul.f32 %v3612_v45, %v6380_v12  ;;  %v633_v12 = vmul.f32 %v3612_v45, %v6384_v61 }
 0x1af   : > { %6366 = vst [vmem:[#allocation50_spill] sm:$0xff] %v3928_v43  ;;  %v3950_v43 = vmul.f32 %v3671_v14, %v6351_v41  ;;  %v6378_v41 = vsub.f32 %v3441_v57, %v3580_v11  ;;  %v636_v59 = vmul.f32 %v3612_v45, %v6388_v2  ;;  %v637_v61 = vmul.f32 %v3612_v45, %v6389_v4 }
 0x1b0   : > { %6367 = vst [vmem:[#allocation51_spill] sm:$0xff] %v3932_v28  ;;  %v626_v15 = vmul.f32 %v3612_v45, %v6377_v19  ;;  %v6381_v19 = vsub.f32 %v3451_v62, %v3580_v11  ;;  %v6385_v62 = vsub.f32 %v3469_v7, %v3580_v11  ;;  %v6390_v7 = vsub.f32 %v3435_v54, %v3580_v11 }
 0x1b1   : > { %6368 = vst [vmem:[#allocation52_spill] sm:$0xff] %v3934_v16  ;;  %v6394_v54 = vsub.f32 %v3461_v3, %v3580_v11  ;;  %v653_v4 = vmax.f32 %v3814_v56, 0.0  ;;  %v660_v16 = vmax.f32 %v628_v53, 0.0  ;;  %v661_v26 = vmax.f32 %v629_v55, 0.0 }
 0x1b2   : > { %6369 = vst [vmem:[#allocation53_spill] sm:$0xff] %v3938_v24  ;;  %v630_v57 = vmul.f32 %v3612_v45, %v6381_v19  ;;  %v634_v19 = vmul.f32 %v3612_v45, %v6385_v62  ;;  %v643_v62 = vmul.f32 %v3612_v45, %v6392_v34  ;;  %v665_v42 = vmax.f32 %v633_v12, 0.0 }
 0x1b3   : > { %6370 = vst [vmem:[#allocation54_spill] sm:$0xff] %v3942_v51  ;;  %v645_v2 = vmul.f32 %v3612_v45, %v6394_v54  ;;  %v658_v51 = vmax.f32 %v626_v15, 0.0  ;;  %v4057_v55 = vmin.f32 %v660_v16, 6.0  ;;  %v4063_v12 = vmin.f32 %v661_v26, 6.0 }
 0x1b4   : > { %6371 = vst [vmem:[#allocation55_spill] sm:$0xff] %v3946_v18  ;;  %v4006_v18 = vadd.f32 %v836_v52, %v803_v13  ;;  %v639_v13 = vmul.f32 %v3612_v45, %v6390_v7  ;;  %v655_v7 = vmax.f32 %v3828_v6, 0.0  ;;  %v662_v1 = vmax.f32 %v630_v57, 0.0 }
 0x1b5   : > { %6372 = vst [vmem:[#allocation56_spill] sm:$0xff] %v3950_v43  ;;  %v675_v28 = vmax.f32 %v643_v62, 0.0  ;;  %v677_v23 = vmax.f32 %v645_v2, 0.0  ;;  %v4043_v6 = vmin.f32 %v653_v4, 6.0  ;;  %v4053_v15 = vmin.f32 %v658_v51, 6.0 }
 0x1b6   : > { %6373 = vst [vmem:[#allocation57_spill] sm:$0xff] %v3954_v47  ;;  %v627_v47 = vmul.f32 %v3612_v45, %v6378_v41  ;;  %v6382_v41 = vsub.f32 %v3455_v0, %v3580_v11  ;;  %v6387_v0 = vsub.f32 %v3486_v20, %v3580_v11  ;;  %v6391_v20 = vsub.f32 %v3443_v58, %v3580_v11 }
 0x1b7   : > { %6374 = vst [vmem:[#allocation58_spill] sm:$0xff] %v3958_v27  ;;  %v654_v58 = vmax.f32 %v3825_v60, 0.0  ;;  %v668_v11 = vmax.f32 %v636_v59, 0.0  ;;  %v671_v54 = vmax.f32 %v639_v13, 0.0  ;;  %v899_v57 = vmul.f32 %v3591_v32, %v3834_v10 }
 0x1b8   : > { %v631_v43 = vmul.f32 %v3612_v45, %v6382_v41  ;;  %6386 = vst [vmem:[#allocation59_spill] sm:$0xff] %v4006_v18  ;;  %v635_v41 = vmul.f32 %v3612_v45, %v6387_v0  ;;  %v641_v52 = vmul.f32 %v3612_v45, %v6391_v20  ;;  %v644_v0 = vmul.f32 %v3612_v45, %v6393_v48 }
 0x1b9   : > { %v656_v20 = vmax.f32 %v624_v46, 0.0  ;;  %v659_v34 = vmax.f32 %v627_v47, 0.0  ;;  %v664_v48 = vmax.f32 %v632_v22, 0.0  ;;  %v666_v18 = vmax.f32 %v634_v19, 0.0  ;;  %6395 = vst [vmem:[#allocation60_spill] sm:$0xff] %v4043_v6 }
 0x1ba   : > { %v663_v27 = vmax.f32 %v631_v43, 0.0  ;;  %v667_v3 = vmax.f32 %v635_v41, 0.0  ;;  %v669_v45 = vmax.f32 %v637_v61, 0.0  ;;  %v673_v56 = vmax.f32 %v641_v52, 0.0  ;;  %6400 = vst [vmem:[#allocation65_spill] sm:$0xff] %v4053_v15 }
 0x1bb   : > { %v676_v60 = vmax.f32 %v644_v0, 0.0  ;;  %v4045_v46 = vmin.f32 %v654_v58, 6.0  ;;  %v4047_v47 = vmin.f32 %v655_v7, 6.0  ;;  %v4049_v31 = vmin.f32 %v656_v20, 6.0  ;;  %6402 = vst [vmem:[#allocation67_spill] sm:$0xff] %v4057_v55 }
 0x1bc   : > { %v4051_v43 = vmin.f32 %v657_v63, 6.0  ;;  %v4055_v53 = vmin.f32 %v659_v34, 6.0  ;;  %v932_v22 = vmul.f32 %v3638_v36, %v3836_v49  ;;  %6403 = vst [vmem:[#allocation68_spill] sm:$0xff] %v4063_v12  ;;  %v4065_v19 = vmin.f32 %v662_v1, 6.0 }
 0x1bd   : > { %6396 = vst [vmem:[#allocation61_spill] sm:$0xff] %v4045_v46  ;;  %v4067_v41 = vmin.f32 %v663_v27, 6.0  ;;  %v4069_v59 = vmin.f32 %v664_v48, 6.0  ;;  %v4071_v51 = vmin.f32 %v665_v42, 6.0  ;;  %v4073_v61 = vmin.f32 %v666_v18, 6.0 }
 0x1be   : > { %6397 = vst [vmem:[#allocation62_spill] sm:$0xff] %v4047_v47  ;;  %v4075_v16 = vmin.f32 %v667_v3, 6.0  ;;  %v4077_v13 = vmin.f32 %v668_v11, 6.0  ;;  %v4079_v52 = vmin.f32 %v669_v45, 6.0  ;;  %v4081_v62 = vmin.f32 %v671_v54, 6.0 }
 0x1bf   : > { %6398 = vst [vmem:[#allocation63_spill] sm:$0xff] %v4049_v31  ;;  %v4083_v26 = vmin.f32 %v673_v56, 6.0  ;;  %v4085_v0 = vmin.f32 %v675_v28, 6.0  ;;  %v4087_v27 = vmin.f32 %v676_v60, 6.0  ;;  %v4089_v2 = vmin.f32 %v677_v23, 6.0 }
 0x1c0   : > { %6399 = vst [vmem:[#allocation64_spill] sm:$0xff] %v4051_v43  ;;  %v964_v42 = vadd.f32 %v932_v22, %v899_v57  ;;  %v4093_v18 = vadd.f32 %v3886_v38, %v3870_v37  ;;  %v4097_v4 = vmul.f32 %v3589_v30, %v4043_v6  ;;  %v4101_v58 = vmul.f32 %v3589_v30, %v4045_v46 }
 0x1c1   : > { %6401 = vst [vmem:[#allocation66_spill] sm:$0xff] %v4055_v53  ;;  %v4105_v28 = vmul.f32 %v3589_v30, %v4055_v53  ;;  %v4109_v23 = vmul.f32 %v3589_v30, %v4057_v55  ;;  %v729_v37 = vmul.f32 %v3589_v30, %v4063_v12  ;;  %v730_v38 = vmul.f32 %v3589_v30, %v4065_v19 }
 0x1c2   : > { %6404 = vst [vmem:[#allocation69_spill] sm:$0xff] %v4067_v41  ;;  %v731_v7 = vmul.f32 %v3589_v30, %v4067_v41  ;;  %v997_v20 = vmul.f32 %v3597_v35, %v3920_v44  ;;  %v732_v63 = vmul.f32 %v3589_v30, %v4069_v59  ;;  %v733_v34 = vmul.f32 %v3589_v30, %v4071_v51 }
 0x1c3   : > { %6405 = vst [vmem:[#allocation70_spill] sm:$0xff] %v4069_v59  ;;  %v734_v1 = vmul.f32 %v3589_v30, %v4073_v61  ;;  %v735_v48 = vmul.f32 %v3589_v30, %v4075_v16  ;;  %v736_v3 = vmul.f32 %v3589_v30, %v4077_v13  ;;  %v737_v11 = vmul.f32 %v3589_v30, %v4079_v52 }
 0x1c4   : > { %6406 = vst [vmem:[#allocation71_spill] sm:$0xff] %v4093_v18  ;;  %v739_v45 = vmul.f32 %v3589_v30, %v4081_v62  ;;  %v4133_v54 = vadd.f32 %v997_v20, %v964_v42  ;;  %v740_v56 = vmul.f32 %v3589_v30, %v3836_v49  ;;  %v741_v60 = vmul.f32 %v3589_v30, %v4083_v26 }
 0x1c5   : > { %6407 = vst [vmem:[#allocation72_spill] sm:$0xff] %v4097_v4  ;;  %v742_v57 = vmul.f32 %v3589_v30, %v3920_v44  ;;  %v743_v22 = vmul.f32 %v3589_v30, %v4085_v0  ;;  %v762_v42 = vmul.f32 %v3621_v9, %v4067_v41  ;;  %v763_v20 = vmul.f32 %v3621_v9, %v4069_v59 }
 0x1c6   : > { %6408 = vst [vmem:[#allocation73_spill] sm:$0xff] %v4101_v58  ;;  %v764_v58 = vmul.f32 %v3621_v9, %v4071_v51  ;;  %v765_v4 = vmul.f32 %v3621_v9, %v4073_v61  ;;  %v766_v55 = vmul.f32 %v3621_v9, %v4075_v16  ;;  %v767_v53 = vmul.f32 %v3621_v9, %v4077_v13 }
 0x1c7   : > { %6409 = vst [vmem:[#allocation74_spill] sm:$0xff] %v4105_v28  ;;  %v745_v28 = vmul.f32 %v3589_v30, %v4089_v2  ;;  %v768_v15 = vmul.f32 %v3621_v9, %v4079_v52  ;;  %v769_v43 = vmul.f32 %v3621_v9, %v3834_v10  ;;  %v770_v31 = vmul.f32 %v3621_v9, %v4081_v62 }
 0x1c8   : > { %6410 = vst [vmem:[#allocation75_spill] sm:$0xff] %v4109_v23  ;;  %v744_v23 = vmul.f32 %v3589_v30, %v4087_v27  ;;  %v772_v47 = vmul.f32 %v3621_v9, %v4083_v26  ;;  %v773_v30 = vmul.f32 %v3621_v9, %v3920_v44  ;;  %v774_v18 = vmul.f32 %v3621_v9, %v4085_v0 }
 0x1c9   : > { %6411 = vst [vmem:[#allocation76_spill] sm:$0xff] %v4133_v54  ;;  %v775_v41 = vmul.f32 %v3621_v9, %v4087_v27  ;;  %v776_v46 = vmul.f32 %v3621_v9, %v4089_v2  ;;  %v4177_v54 = vmul.f32 %v3621_v9, %v4063_v12  ;;  %v4181_v35 = vmul.f32 %v3621_v9, %v4065_v19 }
 0x1ca   : > { %v4183_v59 = vadd.f32 %v762_v42, %v729_v37  ;;  %v4185_v6 = vadd.f32 %v763_v20, %v730_v38  ;;  %v796_v36 = vadd.f32 %v764_v58, %v731_v7  ;;  %v797_v32 = vadd.f32 %v765_v4, %v732_v63 }
 0x1cb   : > { %6412 = vst [vmem:[#allocation77_spill] sm:$0xff] %v4177_v54  ;;  %v798_v5 = vadd.f32 %v766_v55, %v733_v34  ;;  %v799_v17 = vadd.f32 %v767_v53, %v734_v1  ;;  %v800_v40 = vadd.f32 %v768_v15, %v735_v48  ;;  %v801_v39 = vadd.f32 %v769_v43, %v736_v3  ;;  %v3032_v54 = vld [vmem:[%s6216_s3 + $0x38] sm:$0xff]  ;;  %v3030_v1 = vld [vmem:[%s6216_s3 + $0x28] sm:$0xff] }
 0x1cc   : > { %6413 = vst [vmem:[#allocation78_spill] sm:$0xff] %v4181_v35  ;;  %v802_v14 = vadd.f32 %v770_v31, %v737_v11  ;;  %v804_v44 = vadd.f32 %v772_v47, %v739_v45  ;;  %v805_v12 = vadd.f32 %v773_v30, %v740_v56  ;;  %v806_v24 = vadd.f32 %v774_v18, %v741_v60  ;;  %v3031_v30 = vld [vmem:[%s6216_s3 + $0x30] sm:$0xff]  ;;  %v6421_v45 = vld [vmem:[#allocation53_spill] sm:$0xff]  ;;  %v6423_v56 = vld [vmem:[#allocation48_spill] sm:$0xff] }
 0x1cd   : > { %6414 = vst [vmem:[#allocation79_spill] sm:$0xff] %v4183_v59  ;;  %v807_v9 = vadd.f32 %v775_v41, %v742_v57  ;;  %v808_v35 = vadd.f32 %v776_v46, %v743_v22  ;;  %v809_v37 = vadd.f32 %v3840_v29, %v744_v23  ;;  %v810_v38 = vadd.f32 %v3844_v25, %v745_v28  ;;  %v6424_v60 = vld [vmem:[#allocation18_spill] sm:$0xff]  ;;  %v6475_v59 = vld [vmem:[#allocation39_spill] sm:$0xff] }
 0x1ce   : > { %6415 = vst [vmem:[#allocation80_spill] sm:$0xff] %v4185_v6  ;;  %v4194_v55 = vmul.f32 %v6348_v50, %v4071_v51  ;;  %v4198_v31 = vmul.f32 %v6348_v50, %v4073_v61  ;;  %2399 = vmatpush.bf16.msra.mxu1 %v3032_v54  ;;  %v829_v46 = vmul.f32 %v6348_v50, %v4075_v16 }
 0x1cf   : > { %v830_v29 = vmul.f32 %v6348_v50, %v4077_v13  ;;  %v1060_v25 = vmul.f32 %v3593_v8, %v3834_v10  ;;  %v1093_v47 = vmul.f32 %v3652_v21, %v3836_v49  ;;  %3035 = vmatpush.bf16.msra.mxu2 %v3032_v54  ;;  %v831_v43 = vmul.f32 %v6348_v50, %v4079_v52 }
 0x1d0   : > { %6416 = vst [vmem:[#allocation81_spill] sm:$0xff] %v4194_v55  ;;  %v832_v15 = vmul.f32 %v6348_v50, %v3834_v10  ;;  %v833_v53 = vmul.f32 %v6348_v50, %v4081_v62  ;;  %v834_v41 = vmul.f32 %v6348_v50, %v3836_v49  ;;  %v835_v18 = vmul.f32 %v6348_v50, %v4083_v26 }
 0x1d1   : > { %6417 = vst [vmem:[#allocation82_spill] sm:$0xff] %v4198_v31  ;;  %v837_v4 = vmul.f32 %v6348_v50, %v4085_v0  ;;  %v838_v58 = vmul.f32 %v6348_v50, %v4087_v27  ;;  %v839_v28 = vmul.f32 %v6348_v50, %v4089_v2  ;;  %v4227_v23 = vadd.f32 %v829_v46, %v796_v36 }
 0x1d2   : > { %v4229_v7 = vadd.f32 %v830_v29, %v797_v32  ;;  %v4231_v63 = vadd.f32 %v831_v43, %v798_v5  ;;  %v4233_v34 = vadd.f32 %v832_v15, %v799_v17  ;;  %2400 = vmatpush.bf16.msra.mxu1 %v3031_v30  ;;  %v864_v48 = vadd.f32 %v833_v53, %v800_v40  ;;  %v6430_v29 = vld [vmem:[#allocation36_spill] sm:$0xff]  ;;  %v6437_v53 = vld [vmem:[#allocation17_spill] sm:$0xff] }
 0x1d3   : > { %6418 = vst [vmem:[#allocation83_spill] sm:$0xff] %v4227_v23  ;;  %v865_v3 = vadd.f32 %v834_v41, %v801_v39  ;;  %v1125_v11 = vadd.f32 %v1093_v47, %v1060_v25  ;;  %v4240_v54 = vadd.f32 %v6421_v45, %v3918_v33  ;;  %3036 = vmatpush.bf16.msra.mxu2 %v3031_v30  ;;  %v6428_v30 = vld [vmem:[#allocation14_spill] sm:$0xff]  ;;  %v6432_v47 = vld [vmem:[#allocation15_spill] sm:$0xff]  ;;  %v6531_v23 = vld [vmem:[#allocation73_spill] sm:$0xff] }
 0x1d4   : > { %6419 = vst [vmem:[#allocation84_spill] sm:$0xff] %v4229_v7  ;;  %v1058_v32 = vmul.f32 %v3593_v8, %v4077_v13  ;;  %v1059_v36 = vmul.f32 %v3593_v8, %v4079_v52  ;;  %v1091_v17 = vmul.f32 %v3652_v21, %v3834_v10  ;;  %v1092_v5 = vmul.f32 %v3652_v21, %v4081_v62 }
 0x1d5   : > { %6420 = vst [vmem:[#allocation85_spill] sm:$0xff] %v4231_v63  ;;  %v866_v40 = vadd.f32 %v835_v18, %v802_v14  ;;  %v1061_v39 = vmul.f32 %v3593_v8, %v4081_v62  ;;  %v1094_v33 = vmul.f32 %v3652_v21, %v4083_v26  ;;  %v1158_v57 = vmul.f32 %v6424_v60, %v6423_v56  ;;  %v3029_v14 = vld [vmem:[%s6216_s3 + $0x20] sm:$0xff] }
 0x1d6   : > { %6422 = vst [vmem:[#allocation53_spill] sm:$0xff] %v4240_v54  ;;  %v4256_v22 = vadd.f32 %v837_v4, %v804_v44  ;;  %v4258_v42 = vadd.f32 %v838_v58, %v805_v12  ;;  %v4260_v20 = vadd.f32 %v839_v28, %v806_v24  ;;  %v4263_v46 = vadd.f32 %v6428_v30, %v807_v9  ;;  %v6434_v44 = vld [vmem:[#allocation37_spill] sm:$0xff]  ;;  %v6439_v28 = vld [vmem:[#allocation51_spill] sm:$0xff] }
 0x1d7   : > { %2401 = vmatpush.bf16.msra.mxu1 %v3030_v1  ;;  %v4269_v25 = vadd.f32 %v6430_v29, %v808_v35  ;;  %v4272_v43 = vadd.f32 %v6432_v47, %v809_v37  ;;  %v4275_v15 = vadd.f32 %v6434_v44, %v810_v38  ;;  %v4277_v12 = vadd.f32 %v1158_v57, %v1125_v11  ;;  %v6436_v9 = vld [vmem:[#allocation9_spill] sm:$0xff]  ;;  %v6438_v35 = vld [vmem:[#allocation47_spill] sm:$0xff]  ;;  %v6442_v47 = vld [vmem:[#allocation60_spill] sm:$0xff] }
 0x1d8   : > { %6425 = vst [vmem:[#allocation48_spill] sm:$0xff] %v4256_v22  ;;  %3037 = vmatpush.bf16.msra.mxu2 %v3030_v1  ;;  %v895_v24 = vmul.f32 %v6436_v9, %v4073_v61  ;;  %v928_v41 = vmul.f32 %v6437_v53, %v4077_v13  ;;  %v1123_v18 = vadd.f32 %v1091_v17, %v1058_v32  ;;  %v1217_v11 = vrot.slane %v4233_v34, 7  ;;  %v3028_v32 = vld [vmem:[%s6216_s3 + $0x18] sm:$0xff] }
 0x1d9   : > { %6426 = vst [vmem:[#allocation18_spill] sm:$0xff] %v4258_v42  ;;  %v1124_v4 = vadd.f32 %v1092_v5, %v1059_v36  ;;  %v1126_v58 = vadd.f32 %v1094_v33, %v1061_v39  ;;  %v1133_v45 = vadd.f32 %v6439_v28, %v6438_v35  ;;  %v1156_v37 = vmul.f32 %v6424_v60, %v3836_v49  ;;  %v6440_v5 = vld [vmem:[#allocation59_spill] sm:$0xff] }
 0x1da   : > { %6427 = vst [vmem:[#allocation86_spill] sm:$0xff] %v4260_v20  ;;  %v1157_v38 = vmul.f32 %v6424_v60, %v4083_v26  ;;  %v1159_v1 = vmul.f32 %v6424_v60, %v4085_v0  ;;  %v1218_v57 = vrot.slane %v864_v48, 7  ;;  %v1219_v30 = vrot.slane %v865_v3, 7  ;;  %v6449_v20 = vld [vmem:[#allocation41_spill] sm:$0xff] }
 0x1db   : > { %6429 = vst [vmem:[#allocation14_spill] sm:$0xff] %v4263_v46  ;;  %2402 = vmatpush.bf16.msra.mxu1 %v3029_v14  ;;  %v6275_v36 = vrot.slane %v4231_v63, 7  ;;  %v1220_v17 = vrot.slane %v866_v40, 7  ;;  %v1221_v39 = vrot.slane %v6440_v5, 7  ;;  %v6273_v33 = vrot.slane %v4256_v22, 7  ;;  %v6444_v40 = vld [vmem:[#allocation12_spill] sm:$0xff] }
 0x1dc   : > { %6431 = vst [vmem:[#allocation36_spill] sm:$0xff] %v4269_v25  ;;  %3038 = vmatpush.bf16.msra.mxu2 %v3029_v14  ;;  %v897_v29 = vmul.f32 %v6436_v9, %v4077_v13  ;;  %v930_v34 = vmul.f32 %v6437_v53, %v3834_v10  ;;  %v4302_v48 = vadd.f32 %v1156_v37, %v1123_v18  ;;  %v6445_v5 = vld [vmem:[#allocation70_spill] sm:$0xff]  ;;  %v6451_v22 = vld [vmem:[#allocation19_spill] sm:$0xff]  ;;  %v6453_v54 = vrot.slane %v4275_v15, 7 }
 0x1dd   : > { %6433 = vst [vmem:[#allocation15_spill] sm:$0xff] %v4272_v43  ;;  %v1188_v3 = vadd.f32 %v1157_v38, %v1124_v4  ;;  %v4306_v44 = vmul.f32 %v6436_v9, %v6442_v47  ;;  %v4308_v35 = vadd.f32 %v1159_v1, %v1126_v58  ;;  %v4314_v14 = vsel %vm1236_vm5, %v1221_v39, %v6273_v33  ;;  %v3027_v38 = vld [vmem:[%s6216_s3 + $0x10] sm:$0xff] }
 0x1de   : > { %6435 = vst [vmem:[#allocation37_spill] sm:$0xff] %v4275_v15  ;;  %v1249_v28 = vsel %vm1236_vm5, %v1220_v17, %v1221_v39  ;;  %v4320_v18 = vmul.f32 %v6436_v9, %v6445_v5  ;;  %v4324_v4 = vsel %vm1236_vm5, %v1219_v30, %v1220_v17  ;;  %v1251_v58 = vsel %vm1236_vm5, %v1218_v57, %v1219_v30  ;;  %v6446_v33 = vld [vmem:[#allocation58_spill] sm:$0xff]  ;;  %v6462_v15 = vld [vmem:[#allocation76_spill] sm:$0xff] }
 0x1df   : > { %6441 = vst [vmem:[#allocation17_spill] sm:$0xff] %v4302_v48  ;;  %v4330_v37 = vsel %vm1236_vm5, %v1217_v11, %v1218_v57  ;;  %2403 = vmatpush.bf16.msra.mxu1 %v3028_v32  ;;  %v4337_v1 = vmul.f32 %v6436_v9, %v4071_v51  ;;  %v960_v39 = vadd.f32 %v928_v41, %v895_v24  ;;  %v1287_v46 = vrot.slane %v1188_v3, 1  ;;  %v6448_v43 = vld [vmem:[#allocation38_spill] sm:$0xff]  ;;  %v6450_v24 = vld [vmem:[#allocation11_spill] sm:$0xff] }
 0x1e0   : > { %6443 = vst [vmem:[#allocation47_spill] sm:$0xff] %v4306_v44  ;;  %v4340_v17 = vadd.f32 %v6446_v33, %v1133_v45  ;;  %v1253_v30 = vsel %vm1236_vm5, %v6275_v36, %v1217_v11  ;;  %3039 = vmatpush.bf16.msra.mxu2 %v3028_v32  ;;  %v962_v57 = vadd.f32 %v930_v34, %v897_v29  ;;  %v1288_v45 = vrot.slane %v4277_v12, 1 }
 0x1e1   : > { %v972_v42 = vadd.f32 %v6449_v20, %v6448_v43  ;;  %v993_v41 = vmul.f32 %v6450_v24, %v3834_v10  ;;  %v6277_v33 = vrot.slane %v4308_v35, 1  ;;  %v896_v11 = vmul.f32 %v6436_v9, %v4075_v16  ;;  %v3026_v20 = vld [vmem:[%s6216_s3 + $0x8] sm:$0xff] }
 0x1e2   : > { %6447 = vst [vmem:[#allocation51_spill] sm:$0xff] %v4340_v17  ;;  %v898_v32 = vmul.f32 %v6436_v9, %v4079_v52  ;;  %v900_v29 = vmul.f32 %v6436_v9, %v4081_v62  ;;  %v995_v34 = vmul.f32 %v6450_v24, %v3836_v49  ;;  %v901_v43 = vmul.f32 %v6436_v9, %v3836_v49 }
 0x1e3   : > { %2404 = vmatpush.bf16.msra.mxu1 %v3027_v38  ;;  %v1024_v12 = vadd.f32 %v993_v41, %v960_v39  ;;  %v6279_v3 = vrot.slane %v4340_v17, 1  ;;  %v1313_v36 = vsel %vm1301_vm6, %v1288_v45, %v6277_v33  ;;  %v6452_v63 = vrot.slane %v6451_v22, 7  ;;  %v6458_v33 = vld [vmem:[#allocation21_spill] sm:$0xff] }
 0x1e4   : > { %3040 = vmatpush.bf16.msra.mxu2 %v3027_v38  ;;  %v1026_v25 = vadd.f32 %v995_v34, %v962_v57  ;;  %v4380_v31 = vsel %vm1301_vm6, %v1287_v46, %v1288_v45  ;;  %v6455_v39 = vrot.slane %v4302_v48, 1  ;;  %v902_v38 = vmul.f32 %v6436_v9, %v4083_v26  ;;  %v6457_v57 = vld [vmem:[#allocation46_spill] sm:$0xff] }
 0x1e5   : > { %v1241_v44 = vsel %vm1236_vm5, %v6453_v54, %v6452_v63  ;;  %6454 = vst [vmem:[#allocation59_spill] sm:$0xff] %v4380_v31  ;;  %v903_v22 = vmul.f32 %v6436_v9, %v6423_v56  ;;  %v1036_v34 = vadd.f32 %v6457_v57, %v972_v42  ;;  %v6459_v63 = vrot.slane %v6458_v33, 1  ;;  %v3025_v42 = vld [vmem:[%s6216_s3] sm:$0xff] }
 0x1e6   : > { %v4386_v41 = vsel %vm1301_vm6, %v6455_v39, %v1287_v46  ;;  %v904_v45 = vmul.f32 %v6436_v9, %v4085_v0  ;;  %v4401_v46 = vadd.f32 %v1253_v30, %v1024_v12  ;;  %v4403_v39 = vadd.f32 %v1251_v58, %v1026_v25  ;;  %v6464_v58 = vld [vmem:[#allocation32_spill] sm:$0xff] }
 0x1e7   : > { %6456 = vst [vmem:[#allocation60_spill] sm:$0xff] %v4386_v41  ;;  %v1305_v54 = vsel %vm1301_vm6, %v6279_v3, %v6459_v63  ;;  %v1992_v31 = vadd.f32 %v1249_v28, %v6462_v15  ;;  %2405 = vmatpush.bf16.msra.mxu1 %v3026_v20  ;;  %v905_v33 = vmul.f32 %v6436_v9, %v4087_v27  ;;  %v6463_v3 = vld [vmem:[#allocation29_spill] sm:$0xff] }
 0x1e8   : > { %6460 = vst [vmem:[#allocation12_spill] sm:$0xff] %v4401_v46  ;;  %v926_v57 = vmul.f32 %v6437_v53, %v4073_v61  ;;  %v2000_v63 = vadd.f32 %v1241_v44, %v1036_v34  ;;  %v2024_v17 = vmul.f32 %v6463_v3, %v1313_v36  ;;  %3041 = vmatpush.bf16.msra.mxu2 %v3026_v20 }
 0x1e9   : > { %6461 = vst [vmem:[#allocation70_spill] sm:$0xff] %v4403_v39  ;;  %v927_v25 = vmul.f32 %v6437_v53, %v4075_v16  ;;  %v929_v15 = vmul.f32 %v6437_v53, %v4079_v52  ;;  %v931_v28 = vmul.f32 %v6437_v53, %v4081_v62  ;;  %v2032_v30 = vmul.f32 %v6464_v58, %v1305_v54  ;;  %v6467_v39 = vld [vmem:[#allocation61_spill] sm:$0xff] }
 0x1ea   : > { %v933_v12 = vmul.f32 %v6437_v53, %v4083_v26  ;;  %v934_v44 = vmul.f32 %v6437_v53, %v6423_v56  ;;  %v935_v36 = vmul.f32 %v6437_v53, %v4085_v0  ;;  %v4427_v20 = vadd.f32 %v2024_v17, %v1992_v31  ;;  %v6470_v17 = vld [vmem:[#allocation69_spill] sm:$0xff] }
 0x1eb   : > { %v906_v3 = vmul.f32 %v6436_v9, %v4089_v2  ;;  %v936_v34 = vmul.f32 %v6437_v53, %v4087_v27  ;;  %v937_v54 = vmul.f32 %v6437_v53, %v4089_v2  ;;  %v4435_v58 = vadd.f32 %v2032_v30, %v2000_v63  ;;  %2406 = vmatpush.bf16.msra.mxu1 %v3025_v42 }
 0x1ec   : > { %6465 = vst [vmem:[#allocation58_spill] sm:$0xff] %v4427_v20  ;;  %v4439_v46 = vmul.f32 %v6436_v9, %v6467_v39  ;;  %v4443_v31 = vmul.f32 %v6436_v9, %v4065_v19  ;;  %v4447_v20 = vmul.f32 %v6436_v9, %v6470_v17  ;;  %v4451_v41 = vmul.f32 %v6437_v53, %v6445_v5 }
 0x1ed   : > { %6466 = vst [vmem:[#allocation38_spill] sm:$0xff] %v4435_v58  ;;  %3042 = vmatpush.bf16.msra.mxu2 %v3025_v42  ;;  %v4455_v63 = vmul.f32 %v6437_v53, %v4071_v51  ;;  %v4458_v30 = vadd.f32 %v926_v57, %v4320_v18  ;;  %v959_v58 = vadd.f32 %v927_v25, %v4337_v1  ;;  %v6477_v42 = vld [vmem:[#allocation40_spill] sm:$0xff] }
 0x1ee   : > { %6468 = vst [vmem:[#allocation41_spill] sm:$0xff] %v4439_v46  ;;  %v961_v48 = vadd.f32 %v929_v15, %v896_v11  ;;  %v965_v46 = vadd.f32 %v933_v12, %v900_v29  ;;  %v966_v6 = vadd.f32 %v934_v44, %v901_v43  ;;  %v967_v9 = vadd.f32 %v935_v36, %v902_v38  ;;  %v6486_v15 = vld [vmem:[#allocation42_spill] sm:$0xff]  ;;  %v6488_v12 = vld [vmem:[#allocation43_spill] sm:$0xff] }
 0x1ef   : > { %6469 = vst [vmem:[#allocation11_spill] sm:$0xff] %v4443_v31  ;;  %v963_v31 = vadd.f32 %v931_v28, %v898_v32  ;;  %v969_v55 = vadd.f32 %v937_v54, %v904_v45  ;;  %v4462_v50 = vadd.f32 %v6475_v59, %v905_v33  ;;  %v994_v18 = vmul.f32 %v6450_v24, %v4081_v62  ;;  %v6490_v36 = vld [vmem:[#allocation71_spill] sm:$0xff] }
 0x1f0   : > { %6471 = vst [vmem:[#allocation19_spill] sm:$0xff] %v4447_v20  ;;  %v968_v20 = vadd.f32 %v936_v34, %v903_v22  ;;  %v996_v1 = vmul.f32 %v6450_v24, %v4083_v26  ;;  %v998_v11 = vmul.f32 %v6450_v24, %v4085_v0  ;;  %v4477_v32 = vmul.f32 %v6450_v24, %v4075_v16 }
 0x1f1   : > { %6472 = vst [vmem:[#allocation46_spill] sm:$0xff] %v4451_v41  ;;  %v4465_v41 = vadd.f32 %v6477_v42, %v906_v3  ;;  %v4481_v59 = vmul.f32 %v6450_v24, %v4077_v13  ;;  %v999_v29 = vmul.f32 %v6450_v24, %v4087_v27  ;;  %v1000_v43 = vmul.f32 %v6450_v24, %v4089_v2  ;;  %v6491_v3 = vld [vmem:[#allocation30_spill] sm:$0xff] }
 0x1f2   : > { %6473 = vst [vmem:[#allocation21_spill] sm:$0xff] %v4455_v63  ;;  %v992_v63 = vmul.f32 %v6450_v24, %v4079_v52  ;;  %v4489_v22 = vadd.f32 %v994_v18, %v961_v48  ;;  %v4491_v45 = vadd.f32 %v996_v1, %v963_v31  ;;  %v4493_v33 = vadd.f32 %v998_v11, %v965_v46  ;;  %v6493_v46 = vld [vmem:[#allocation68_spill] sm:$0xff] }
 0x1f3   : > { %6474 = vst [vmem:[#allocation76_spill] sm:$0xff] %v4458_v30  ;;  %v4495_v57 = vadd.f32 %v999_v29, %v966_v6  ;;  %v4497_v25 = vadd.f32 %v1000_v43, %v967_v9  ;;  %v4500_v28 = vadd.f32 %v6486_v15, %v968_v20  ;;  %v4503_v44 = vadd.f32 %v6488_v12, %v969_v55 }
 0x1f4   : > { %6476 = vst [vmem:[#allocation29_spill] sm:$0xff] %v4462_v50  ;;  %v4487_v38 = vadd.f32 %v992_v63, %v959_v58  ;;  %v4507_v34 = vadd.f32 %v6491_v3, %v6490_v36  ;;  %v4511_v48 = vmul.f32 %v3593_v8, %v6467_v39  ;;  %v1062_v6 = vmul.f32 %v3593_v8, %v3836_v49 }
 0x1f5   : > { %6478 = vst [vmem:[#allocation32_spill] sm:$0xff] %v4465_v41  ;;  %v1095_v9 = vmul.f32 %v3652_v21, %v6423_v56  ;;  %v4519_v20 = vmul.f32 %v3593_v8, %v6493_v46  ;;  %v1053_v55 = vmul.f32 %v3593_v8, %v6470_v17  ;;  %v1054_v54 = vmul.f32 %v3593_v8, %v6445_v5 }
 0x1f6   : > { %6479 = vst [vmem:[#allocation61_spill] sm:$0xff] %v4481_v59  ;;  %v1055_v58 = vmul.f32 %v3593_v8, %v4071_v51  ;;  %v1056_v31 = vmul.f32 %v3593_v8, %v4073_v61  ;;  %v1057_v49 = vmul.f32 %v3593_v8, %v4075_v16  ;;  %v1063_v63 = vmul.f32 %v3593_v8, %v4083_v26 }
 0x1f7   : > { %6480 = vst [vmem:[#allocation69_spill] sm:$0xff] %v4487_v38  ;;  %v1064_v42 = vmul.f32 %v3593_v8, %v6423_v56  ;;  %v1086_v18 = vmul.f32 %v3652_v21, %v4071_v51  ;;  %v1088_v1 = vmul.f32 %v3652_v21, %v4075_v16  ;;  %v1089_v11 = vmul.f32 %v3652_v21, %v4077_v13 }
 0x1f8   : > { %6481 = vst [vmem:[#allocation39_spill] sm:$0xff] %v4489_v22  ;;  %v1090_v29 = vmul.f32 %v3652_v21, %v4079_v52  ;;  %v1087_v43 = vmul.f32 %v3652_v21, %v4073_v61  ;;  %v1096_v26 = vmul.f32 %v3652_v21, %v4085_v0  ;;  %v1097_v56 = vmul.f32 %v3652_v21, %v4087_v27 }
 0x1f9   : > { %6482 = vst [vmem:[#allocation40_spill] sm:$0xff] %v4491_v45  ;;  %v1127_v15 = vadd.f32 %v1095_v9, %v1062_v6  ;;  %v4551_v12 = vmul.f32 %v3593_v8, %v4065_v19  ;;  %v1065_v36 = vmul.f32 %v3593_v8, %v4085_v0  ;;  %v1066_v3 = vmul.f32 %v3593_v8, %v4087_v27 }
 0x1fa   : > { %6483 = vst [vmem:[#allocation87_spill] sm:$0xff] %v4493_v33  ;;  %v1098_v41 = vmul.f32 %v3652_v21, %v4089_v2  ;;  %v4567_v6 = vmul.f32 %v3652_v21, %v6445_v5  ;;  %v1160_v0 = vmul.f32 %v6424_v60, %v4087_v27  ;;  %v4571_v9 = vadd.f32 %v1086_v18, %v1053_v55 }
 0x1fb   : > { %6484 = vst [vmem:[#allocation88_spill] sm:$0xff] %v4495_v57  ;;  %v1120_v50 = vadd.f32 %v1088_v1, %v1055_v58  ;;  %v1122_v57 = vadd.f32 %v1090_v29, %v1057_v49  ;;  %v4573_v59 = vadd.f32 %v1087_v43, %v1054_v54  ;;  %v4575_v30 = vadd.f32 %v1096_v26, %v1063_v63  ;;  %v6504_v58 = vld [vmem:[#allocation49_spill] sm:$0xff]  ;;  %v6512_v1 = vld [vmem:[#allocation8_spill] sm:$0xff]  ;;  %v6514_v43 = vld [vmem:[#allocation63_spill] sm:$0xff] }
 0x1fc   : > { %6485 = vst [vmem:[#allocation89_spill] sm:$0xff] %v4497_v25  ;;  %v1121_v25 = vadd.f32 %v1089_v11, %v1056_v31  ;;  %v4577_v38 = vadd.f32 %v1097_v56, %v1064_v42  ;;  %v4581_v33 = vadd.f32 %v1098_v41, %v1065_v36  ;;  %v1153_v45 = vmul.f32 %v6424_v60, %v4079_v52  ;;  %v6506_v31 = vld [vmem:[#allocation50_spill] sm:$0xff] }
 0x1fd   : > { %6487 = vst [vmem:[#allocation42_spill] sm:$0xff] %v4500_v28  ;;  %v4563_v28 = vmul.f32 %v3652_v21, %v6470_v17  ;;  %v1154_v27 = vmul.f32 %v6424_v60, %v3834_v10  ;;  %v1155_v55 = vmul.f32 %v6424_v60, %v4081_v62  ;;  %v4590_v54 = vadd.f32 %v6504_v58, %v1066_v3  ;;  %v6519_v58 = vld [vmem:[#allocation67_spill] sm:$0xff] }
 0x1fe   : > { %6489 = vst [vmem:[#allocation43_spill] sm:$0xff] %v4503_v44  ;;  %v1067_v44 = vmul.f32 %v3593_v8, %v4089_v2  ;;  %v4597_v63 = vmul.f32 %v6424_v60, %v4075_v16  ;;  %v4601_v41 = vmul.f32 %v6424_v60, %v4077_v13  ;;  %v4605_v10 = vmul.f32 %v6424_v60, %v4089_v2  ;;  %v6513_v13 = vld [vmem:[#allocation62_spill] sm:$0xff]  ;;  %v6528_v16 = vld [vmem:[#allocation28_spill] sm:$0xff] }
 0x1ff   : > { %6492 = vst [vmem:[#allocation71_spill] sm:$0xff] %v4507_v34  ;;  %v4579_v34 = vadd.f32 %v1160_v0, %v1127_v15  ;;  %v4607_v52 = vadd.f32 %v1153_v45, %v1120_v50  ;;  %v4609_v62 = vadd.f32 %v1154_v27, %v1121_v25  ;;  %v4611_v42 = vadd.f32 %v1155_v55, %v1122_v57  ;;  %v6515_v50 = vld [vmem:[#allocation64_spill] sm:$0xff]  ;;  %v6516_v45 = vld [vmem:[#allocation65_spill] sm:$0xff]  ;;  %v6518_v27 = vld [vmem:[#allocation66_spill] sm:$0xff] }
 0x200   : > { %6494 = vst [vmem:[#allocation30_spill] sm:$0xff] %v4519_v20  ;;  %v4593_v49 = vadd.f32 %v6506_v31, %v1067_v44  ;;  %v720_v11 = vmul.f32 0.0, %v6512_v1  ;;  %v723_v29 = vmul.f32 %v6512_v1, %v6513_v13  ;;  %v724_v2 = vmul.f32 %v6512_v1, %v6514_v43  ;;  %v6517_v25 = vld [vmem:[#allocation13_spill] sm:$0xff]  ;;  %v6526_v44 = vld [vmem:[#allocation27_spill] sm:$0xff] }
 0x201   : > { %6495 = vst [vmem:[#allocation68_spill] sm:$0xff] %v4551_v12  ;;  %v725_v60 = vmul.f32 %v6512_v1, %v6515_v50  ;;  %v726_v57 = vmul.f32 %v6512_v1, %v6516_v45  ;;  %v752_v26 = vmul.f32 %v6517_v25, %v6442_v47  ;;  %v753_v56 = vmul.f32 %v6517_v25, %v6467_v39  ;;  %v6561_v20 = vld [vmem:[#allocation21_spill] sm:$0xff] }
 0x202   : > { %6496 = vst [vmem:[#allocation90_spill] sm:$0xff] %v4563_v28  ;;  %v754_v15 = vmul.f32 %v6517_v25, %v6513_v13  ;;  %v755_v36 = vmul.f32 %v6517_v25, %v6514_v43  ;;  %v756_v3 = vmul.f32 %v6517_v25, %v6515_v50  ;;  %v757_v0 = vmul.f32 %v6517_v25, %v6516_v45 }
 0x203   : > { %6497 = vst [vmem:[#allocation91_spill] sm:$0xff] %v4567_v6  ;;  %v758_v55 = vmul.f32 %v6517_v25, %v6518_v27  ;;  %v759_v31 = vmul.f32 %v6517_v25, %v6519_v58  ;;  %v4660_v18 = vmul.f32 %v6526_v44, %v4324_v4  ;;  %v4664_v22 = vmul.f32 %v6528_v16, %v4314_v14  ;;  %v6535_v4 = vld [vmem:[#allocation78_spill] sm:$0xff] }
 0x204   : > { %6498 = vst [vmem:[#allocation92_spill] sm:$0xff] %v4571_v9  ;;  %v787_v7 = vadd.f32 %v755_v36, %v6531_v23  ;;  %v6537_v14 = vld [vmem:[#allocation10_spill] sm:$0xff] }
 0x205   : > { %6499 = vst [vmem:[#allocation93_spill] sm:$0xff] %v4573_v59  ;;  %v6534_v59 = vld [vmem:[#allocation75_spill] sm:$0xff]  ;;  %v817_v16 = vmul.f32 %v6537_v14, %v6513_v13  ;;  %v819_v23 = vmul.f32 %v6537_v14, %v6515_v50 }
 0x206   : > { %6500 = vst [vmem:[#allocation94_spill] sm:$0xff] %v4575_v30  ;;  %v6524_v30 = vld [vmem:[#allocation26_spill] sm:$0xff]  ;;  %v793_v44 = vadd.f32 %v6535_v4, %v6534_v59  ;;  %v822_v59 = vmul.f32 %v6537_v14, %v6519_v58  ;;  %v6549_v4 = vld [vmem:[#allocation81_spill] sm:$0xff] }
 0x207   : > { %6501 = vst [vmem:[#allocation95_spill] sm:$0xff] %v4577_v38  ;;  %v6522_v38 = vrot.slane %v4308_v35, 1  ;;  %v4656_v25 = vmul.f32 %v6524_v30, %v4330_v37  ;;  %v6532_v37 = vld [vmem:[#allocation74_spill] sm:$0xff]  ;;  %v6533_v30 = vld [vmem:[#allocation77_spill] sm:$0xff] }
 0x208   : > { %6502 = vst [vmem:[#allocation96_spill] sm:$0xff] %v4579_v34 }
 0x209   : > { %6503 = vst [vmem:[#allocation97_spill] sm:$0xff] %v4581_v33  ;;  %v6521_v33 = vrot.slane %v4579_v34, 1  ;;  %v6530_v34 = vld [vmem:[#allocation72_spill] sm:$0xff] }
 0x20a   : > { %6505 = vst [vmem:[#allocation49_spill] sm:$0xff] %v4590_v54  ;;  %v786_v35 = vadd.f32 %v754_v15, %v6530_v34  ;;  %v818_v34 = vmul.f32 %v6537_v14, %v6514_v43 }
 0x20b   : > { %6507 = vst [vmem:[#allocation50_spill] sm:$0xff] %v4593_v49  ;;  %v6520_v49 = vld [vmem:[#allocation16_spill] sm:$0xff] }
 0x20c   : > { %6508 = vst [vmem:[#allocation98_spill] sm:$0xff] %v4597_v63  ;;  %v750_v54 = vmul.f32 %v6512_v1, %v6520_v49  ;;  %v784_v49 = vadd.f32 %v752_v26, %v720_v11  ;;  %v785_v1 = vadd.f32 %v753_v56, %v720_v11  ;;  %v820_v11 = vmul.f32 %v6537_v14, %v6516_v45 }
 0x20d   : > { %6509 = vst [vmem:[#allocation99_spill] sm:$0xff] %v4601_v41  ;;  %v791_v41 = vadd.f32 %v759_v31, %v726_v57  ;;  %v847_v57 = vmul.f32 0.0, %v6537_v14  ;;  %v4698_v15 = vadd.f32 %v819_v23, %v786_v35  ;;  %v6551_v35 = vld [vmem:[#allocation9_spill] sm:$0xff]  ;;  %v917_v23 = vmul.f32 %v6437_v53, %v6515_v50 }
 0x20e   : > { %6510 = vst [vmem:[#allocation100_spill] sm:$0xff] %v4605_v10  ;;  %v4652_v10 = vsel %vm1301_vm6, %v6522_v38, %v6521_v33  ;;  %v788_v38 = vadd.f32 %v756_v3, %v723_v29  ;;  %v789_v33 = vadd.f32 %v757_v0, %v724_v2  ;;  %v821_v29 = vmul.f32 %v6537_v14, %v6518_v27 }
 0x20f   : > { %6511 = vst [vmem:[#allocation101_spill] sm:$0xff] %v4607_v52  ;;  %v825_v2 = vmul.f32 %v6537_v14, %v6470_v17  ;;  %v4694_v26 = vadd.f32 %v817_v16, %v784_v49  ;;  %v4696_v56 = vadd.f32 %v818_v34, %v785_v1  ;;  %v4700_v36 = vadd.f32 %v820_v11, %v787_v7  ;;  %v6548_v49 = vld [vmem:[#allocation79_spill] sm:$0xff] }
 0x210   : > { %6523 = vst [vmem:[#allocation8_spill] sm:$0xff] %v4652_v10  ;;  %v790_v10 = vadd.f32 %v758_v55, %v725_v60  ;;  %v826_v60 = vmul.f32 %v6537_v14, %v6445_v5  ;;  %v4702_v3 = vadd.f32 %v821_v29, %v788_v38  ;;  %v4704_v0 = vadd.f32 %v822_v59, %v789_v33 }
 0x211   : > { %6525 = vst [vmem:[#allocation62_spill] sm:$0xff] %v4656_v25  ;;  %v792_v25 = vadd.f32 %v6533_v30, %v6532_v37  ;;  %v4716_v1 = vadd.f32 %v6549_v4, %v6548_v49  ;;  %v884_v7 = vmul.f32 %v6551_v35, %v6513_v13  ;;  %v885_v38 = vmul.f32 %v6551_v35, %v6514_v43  ;;  %v6552_v4 = vld [vmem:[#allocation80_spill] sm:$0xff] }
 0x212   : > { %6527 = vst [vmem:[#allocation63_spill] sm:$0xff] %v4660_v18  ;;  %v6536_v18 = vld [vmem:[#allocation33_spill] sm:$0xff]  ;;  %v4712_v30 = vadd.f32 %v826_v60, %v793_v44  ;;  %v913_v33 = vmul.f32 %v6437_v53, %v6442_v47  ;;  %v914_v44 = vmul.f32 %v6437_v53, %v6467_v39  ;;  %v915_v16 = vmul.f32 %v6437_v53, %v6513_v13 }
 0x213   : > { %6529 = vst [vmem:[#allocation64_spill] sm:$0xff] %v4664_v22  ;;  %v815_v63 = vadd.f32 %v6536_v18, %v750_v54  ;;  %v823_v54 = vmul.f32 %v6537_v14, %v6493_v46  ;;  %v824_v18 = vmul.f32 %v6537_v14, %v4065_v19  ;;  %v4710_v37 = vadd.f32 %v825_v2, %v792_v25  ;;  %v6553_v22 = vld [vmem:[#allocation82_spill] sm:$0xff] }
 0x214   : > { %6538 = vst [vmem:[#allocation65_spill] sm:$0xff] %v4694_v26  ;;  %v881_v14 = vmul.f32 0.0, %v6551_v35  ;;  %v888_v25 = vmul.f32 %v6551_v35, %v6518_v27  ;;  %v916_v34 = vmul.f32 %v6437_v53, %v6514_v43  ;;  %v918_v11 = vmul.f32 %v6437_v53, %v6516_v45  ;;  %v6555_v26 = vld [vmem:[#allocation52_spill] sm:$0xff] }
 0x215   : > { %6539 = vst [vmem:[#allocation13_spill] sm:$0xff] %v4696_v56  ;;  %v4706_v55 = vadd.f32 %v823_v54, %v790_v10  ;;  %v4708_v31 = vadd.f32 %v824_v18, %v791_v41  ;;  %v886_v41 = vmul.f32 %v6551_v35, %v6515_v50  ;;  %v887_v10 = vmul.f32 %v6551_v35, %v6516_v45 }
 0x216   : > { %6540 = vst [vmem:[#allocation66_spill] sm:$0xff] %v4698_v15  ;;  %v919_v29 = vmul.f32 %v6437_v53, %v6518_v27  ;;  %v920_v59 = vmul.f32 %v6437_v53, %v6519_v58  ;;  %v921_v54 = vmul.f32 %v6437_v53, %v6493_v46  ;;  %v889_v18 = vmul.f32 %v6551_v35, %v6519_v58 }
 0x217   : > { %6541 = vst [vmem:[#allocation67_spill] sm:$0xff] %v4700_v36  ;;  %v890_v2 = vmul.f32 %v6551_v35, %v6493_v46  ;;  %v922_v60 = vmul.f32 %v6437_v53, %v4065_v19  ;;  %v923_v49 = vmul.f32 %v6437_v53, %v6470_v17  ;;  %v4757_v56 = vadd.f32 %v6553_v22, %v6552_v4  ;;  %v6557_v35 = vld [vmem:[#allocation41_spill] sm:$0xff]  ;;  %v6558_v22 = vld [vmem:[#allocation11_spill] sm:$0xff]  ;;  %v6559_v4 = vld [vmem:[#allocation46_spill] sm:$0xff] }
 0x218   : > { %6542 = vst [vmem:[#allocation16_spill] sm:$0xff] %v4702_v3  ;;  %v4762_v3 = vadd.f32 %v847_v57, %v815_v63  ;;  %v945_v36 = vadd.f32 %v913_v33, %v881_v14  ;;  %v946_v15 = vadd.f32 %v914_v44, %v881_v14  ;;  %v951_v9 = vadd.f32 %v919_v29, %v886_v41 }
 0x219   : > { %6543 = vst [vmem:[#allocation26_spill] sm:$0xff] %v4704_v0  ;;  %v4760_v0 = vadd.f32 %v847_v57, %v6555_v26  ;;  %v952_v6 = vadd.f32 %v920_v59, %v887_v10  ;;  %v953_v53 = vadd.f32 %v921_v54, %v888_v25  ;;  %v954_v12 = vadd.f32 %v922_v60, %v889_v18  ;;  %v6560_v26 = vld [vmem:[#allocation19_spill] sm:$0xff]  ;;  %v4786_v10 = vld [vmem:[%s6215_s2 + $0x8] ss:$0 sm:$0xff] }
 0x21a   : > { %6544 = vst [vmem:[#allocation27_spill] sm:$0xff] %v4706_v55  ;;  %v949_v55 = vadd.f32 %v917_v23, %v884_v7  ;;  %v955_v28 = vadd.f32 %v923_v49, %v890_v2  ;;  %v957_v63 = vadd.f32 %v6561_v20, %v6560_v26  ;;  %v978_v57 = vmul.f32 %v6450_v24, %v6513_v13 }
 0x21b   : > { %6545 = vst [vmem:[#allocation28_spill] sm:$0xff] %v4708_v31  ;;  %v948_v31 = vadd.f32 %v916_v34, %v6557_v35  ;;  %v980_v14 = vmul.f32 %v6450_v24, %v6515_v50  ;;  %v6291_v7 = vrot.slane %v4760_v0, 7  ;;  %v982_v41 = vmul.f32 %v6450_v24, %v6518_v27  ;;  %v6562_v34 = vld [vmem:[#allocation20_spill] sm:$0xff] }
 0x21c   : > { %6546 = vst [vmem:[#allocation72_spill] sm:$0xff] %v4710_v37  ;;  %v983_v20 = vmul.f32 %v6450_v24, %v6519_v58  ;;  %v4789_v25 = vmul.f32 0.0, %v4786_v10  ;;  %v984_v33 = vmul.f32 %v6450_v24, %v6493_v46  ;;  %v985_v44 = vmul.f32 %v6450_v24, %v4065_v19 }
 0x21d   : > { %6547 = vst [vmem:[#allocation73_spill] sm:$0xff] %v4712_v30  ;;  %v6556_v30 = vld [vmem:[#allocation47_spill] sm:$0xff]  ;;  %v6563_v23 = vrot.slane %v6562_v34, 7  ;;  %v987_v29 = vmul.f32 %v6450_v24, %v6445_v5  ;;  %v988_v59 = vmul.f32 %v6450_v24, %v4071_v51  ;;  %v989_v54 = vmul.f32 %v6450_v24, %v4073_v61  ;;  %v6568_v34 = vld [vmem:[#allocation53_spill] sm:$0xff] }
 0x21e   : > { %6550 = vst [vmem:[#allocation74_spill] sm:$0xff] %v4716_v1  ;;  %v947_v37 = vadd.f32 %v915_v16, %v6556_v30  ;;  %v950_v1 = vadd.f32 %v918_v11, %v885_v38  ;;  %v979_v30 = vmul.f32 %v6450_v24, %v6514_v43  ;;  %v981_v38 = vmul.f32 %v6450_v24, %v6516_v45 }
 0x21f   : > { %6554 = vst [vmem:[#allocation77_spill] sm:$0xff] %v4757_v56  ;;  %v956_v56 = vadd.f32 %v6559_v4, %v6558_v22  ;;  %v986_v16 = vmul.f32 %v6450_v24, %v6470_v17  ;;  %v4803_v11 = vsel %vm1236_vm5, %v6563_v23, %v6291_v7  ;;  %v4811_v18 = vadd.f32 %v978_v57, %v945_v36 }
 0x220   : > { %v4813_v2 = vadd.f32 %v979_v30, %v946_v15  ;;  %v4815_v60 = vadd.f32 %v980_v14, %v947_v37  ;;  %v4817_v49 = vadd.f32 %v981_v38, %v948_v31  ;;  %v4819_v35 = vadd.f32 %v982_v41, %v949_v55 }
 0x221   : > { %v4821_v22 = vadd.f32 %v983_v20, %v950_v1  ;;  %v4823_v4 = vadd.f32 %v984_v33, %v951_v9  ;;  %v4825_v26 = vadd.f32 %v985_v44, %v952_v6  ;;  %v4829_v23 = vadd.f32 %v4789_v25, %v6568_v34  ;;  %v6571_v44 = vld [vmem:[#allocation22_spill] sm:$0xff]  ;;  %v6573_v34 = vld [vmem:[#allocation17_spill] sm:$0xff] }
 0x222   : > { %6564 = vst [vmem:[#allocation75_spill] sm:$0xff] %v4819_v35  ;;  %v4831_v24 = vadd.f32 %v986_v16, %v953_v53  ;;  %v4833_v15 = vadd.f32 %v987_v29, %v954_v12  ;;  %v1042_v36 = vmul.f32 0.0, %v3593_v8  ;;  %v1043_v55 = vmul.f32 %v3593_v8, %v6442_v47 }
 0x223   : > { %6565 = vst [vmem:[#allocation78_spill] sm:$0xff] %v4821_v22  ;;  %v1045_v31 = vmul.f32 %v3593_v8, %v6513_v13  ;;  %v1046_v6 = vmul.f32 %v3593_v8, %v6514_v43  ;;  %v1047_v9 = vmul.f32 %v3593_v8, %v6515_v50  ;;  %v1048_v37 = vmul.f32 %v3593_v8, %v6516_v45 }
 0x224   : > { %6566 = vst [vmem:[#allocation33_spill] sm:$0xff] %v4823_v4  ;;  %v1049_v12 = vmul.f32 %v3593_v8, %v6518_v27  ;;  %v1050_v1 = vmul.f32 %v3593_v8, %v6519_v58  ;;  %v1074_v53 = vmul.f32 %v3652_v21, %v6442_v47  ;;  %v1075_v57 = vmul.f32 %v3652_v21, %v6467_v39 }
 0x225   : > { %6567 = vst [vmem:[#allocation10_spill] sm:$0xff] %v4825_v26  ;;  %v1076_v30 = vmul.f32 %v3652_v21, %v6513_v13  ;;  %v1077_v14 = vmul.f32 %v3652_v21, %v6514_v43  ;;  %v1078_v38 = vmul.f32 %v3652_v21, %v6515_v50  ;;  %v6292_v41 = vrot.slane %v4829_v23, 1 }
 0x226   : > { %6569 = vst [vmem:[#allocation79_spill] sm:$0xff] %v4831_v24  ;;  %v1079_v8 = vmul.f32 %v3652_v21, %v6516_v45  ;;  %v1080_v47 = vmul.f32 %v3652_v21, %v6518_v27  ;;  %v1081_v39 = vmul.f32 %v3652_v21, %v6519_v58  ;;  %v1082_v20 = vmul.f32 %v3652_v21, %v6493_v46 }
 0x227   : > { %6570 = vst [vmem:[#allocation81_spill] sm:$0xff] %v4833_v15  ;;  %v1083_v33 = vmul.f32 %v3652_v21, %v4065_v19  ;;  %v6572_v16 = vrot.slane %v6571_v44, 1  ;;  %v6574_v7 = vrot.slane %v6573_v34, 1  ;;  %v6575_v15 = vrot.slane %v4611_v42, 1 }
 0x228   : > { %v6577_v21 = vrot.slane %v4609_v62, 1  ;;  %v4895_v44 = vadd.f32 %v988_v59, %v955_v28  ;;  %v4900_v34 = vadd.f32 %v4477_v32, %v957_v63  ;;  %v1107_v22 = vadd.f32 %v1075_v57, %v1042_v36  ;;  %v6583_v63 = vld [vmem:[#allocation30_spill] sm:$0xff] }
 0x229   : > { %v4877_v29 = vsel %vm1301_vm6, %v6572_v16, %v6292_v41  ;;  %v4885_v24 = vsel %vm1301_vm6, %v6575_v15, %v6574_v7  ;;  %v6576_v26 = vmov %v6575_v15  ;;  %v4897_v16 = vadd.f32 %v989_v54, %v956_v56  ;;  %v6595_v57 = vld [vmem:[#allocation74_spill] sm:$0xff] }
 0x22a   : > { %v4893_v4 = vsel %vm1301_vm6, %v6577_v21, %v6576_v26  ;;  %6578 = vst [vmem:[#allocation9_spill] sm:$0xff] %v4895_v44  ;;  %v6581_v41 = vmov %v6577_v21  ;;  %v6582_v7 = vrot.slane %v4607_v52, 1  ;;  %v1106_v15 = vadd.f32 %v1074_v53, %v1042_v36  ;;  %v6586_v52 = vld [vmem:[#allocation91_spill] sm:$0xff] }
 0x22b   : > { %6579 = vst [vmem:[#allocation80_spill] sm:$0xff] %v4897_v16  ;;  %v1108_v35 = vadd.f32 %v1076_v30, %v1043_v55  ;;  %v1109_v26 = vadd.f32 %v1077_v14, %v4511_v48  ;;  %v1110_v28 = vadd.f32 %v1078_v38, %v1045_v31  ;;  %v1111_v59 = vadd.f32 %v1079_v8, %v1046_v6  ;;  %v6585_v16 = vld [vmem:[#allocation68_spill] sm:$0xff]  ;;  %v6596_v14 = vld [vmem:[#allocation77_spill] sm:$0xff] }
 0x22c   : > { %6580 = vst [vmem:[#allocation82_spill] sm:$0xff] %v4900_v34  ;;  %v4908_v42 = vsel %vm1301_vm6, %v6582_v7, %v6581_v41  ;;  %v1112_v56 = vadd.f32 %v1080_v47, %v1047_v9  ;;  %v1113_v54 = vadd.f32 %v1081_v39, %v1048_v37  ;;  %v1114_v21 = vadd.f32 %v1082_v20, %v1049_v12  ;;  %v6584_v34 = vld [vmem:[#allocation90_spill] sm:$0xff]  ;;  %v6597_v47 = vld [vmem:[#allocation27_spill] sm:$0xff]  ;;  %v6598_v20 = vld [vmem:[#allocation28_spill] sm:$0xff] }
 0x22d   : > { %v1115_v32 = vadd.f32 %v1083_v33, %v1050_v1  ;;  %v1116_v62 = vadd.f32 %v6584_v34, %v6583_v63  ;;  %v1117_v44 = vadd.f32 %v6586_v52, %v6585_v16  ;;  %v1139_v41 = vmul.f32 %v4786_v10, %v6513_v13  ;;  %v6599_v16 = vld [vmem:[#allocation72_spill] sm:$0xff]  ;;  %v6600_v7 = vld [vmem:[#allocation73_spill] sm:$0xff] }
 0x22e   : > { %v1140_v36 = vmul.f32 %v4786_v10, %v6514_v43  ;;  %v1141_v48 = vmul.f32 %v4786_v10, %v6515_v50  ;;  %v1142_v55 = vmul.f32 %v4786_v10, %v6516_v45  ;;  %v1143_v31 = vmul.f32 %v4786_v10, %v6518_v27  ;;  %v6605_v63 = vld [vmem:[#allocation93_spill] sm:$0xff] }
 0x22f   : > { %v1144_v6 = vmul.f32 %v4786_v10, %v6519_v58  ;;  %v1145_v52 = vmul.f32 %v4786_v10, %v6493_v46  ;;  %v1146_v13 = vmul.f32 %v4786_v10, %v4065_v19  ;;  %v1147_v43 = vmul.f32 %v4786_v10, %v6470_v17 }
 0x230   : > { %v1148_v50 = vmul.f32 %v4786_v10, %v6445_v5  ;;  %v1149_v45 = vmul.f32 %v4786_v10, %v4071_v51  ;;  %v1150_v27 = vmul.f32 %v4786_v10, %v4073_v61  ;;  %v4939_v9 = vadd.f32 %v1139_v41, %v1106_v15 }
 0x231   : > { %v4941_v58 = vadd.f32 %v1140_v36, %v1107_v22  ;;  %v4943_v46 = vadd.f32 %v1141_v48, %v1108_v35  ;;  %v4945_v37 = vadd.f32 %v1142_v55, %v1109_v26  ;;  %v4947_v19 = vadd.f32 %v1143_v31, %v1110_v28  ;;  %v6592_v35 = vld [vmem:[#allocation92_spill] sm:$0xff]  ;;  %v6593_v22 = vld [vmem:[#allocation98_spill] sm:$0xff]  ;;  %v6602_v28 = vld [vmem:[#allocation67_spill] sm:$0xff] }
 0x232   : > { %6587 = vst [vmem:[#allocation52_spill] sm:$0xff] %v4939_v9  ;;  %v4949_v17 = vadd.f32 %v1144_v6, %v1111_v59  ;;  %v4951_v12 = vadd.f32 %v1145_v52, %v1112_v56  ;;  %v4953_v5 = vadd.f32 %v1146_v13, %v1113_v54  ;;  %v4955_v51 = vadd.f32 %v1147_v43, %v1114_v21  ;;  %v6603_v56 = vld [vmem:[#allocation16_spill] sm:$0xff]  ;;  %v6604_v21 = vld [vmem:[#allocation26_spill] sm:$0xff]  ;;  %v6610_v48 = vld [vmem:[#allocation65_spill] sm:$0xff] }
 0x233   : > { %v4957_v1 = vadd.f32 %v1148_v50, %v1115_v32  ;;  %v4959_v61 = vadd.f32 %v1149_v45, %v1116_v62  ;;  %v4961_v10 = vadd.f32 %v1150_v27, %v1117_v44  ;;  %v4965_v53 = vadd.f32 %v6593_v22, %v6592_v35  ;;  %v6601_v44 = vld [vmem:[#allocation66_spill] sm:$0xff]  ;;  %v6606_v62 = vld [vmem:[#allocation99_spill] sm:$0xff]  ;;  %v6611_v31 = vld [vmem:[#allocation13_spill] sm:$0xff] }
 0x234   : > { %6588 = vst [vmem:[#allocation47_spill] sm:$0xff] %v4955_v51  ;;  %v1212_v30 = vrot.slane %v6595_v57, 7  ;;  %v1213_v38 = vrot.slane %v6596_v14, 7  ;;  %v1233_v8 = vrot.slane %v4762_v3, 7  ;;  %v1208_v39 = vrot.slane %v6597_v47, 7  ;;  %v6608_v3 = vld [vmem:[#allocation35_spill] sm:$0xff] }
 0x235   : > { %6589 = vst [vmem:[#allocation41_spill] sm:$0xff] %v4957_v1  ;;  %v1209_v33 = vrot.slane %v6598_v20, 7  ;;  %v1210_v34 = vrot.slane %v6599_v16, 7  ;;  %v1211_v15 = vrot.slane %v6600_v7, 7  ;;  %v1204_v26 = vrot.slane %v6601_v44, 7  ;;  %v6613_v43 = vld [vmem:[#allocation85_spill] sm:$0xff] }
 0x236   : > { %6590 = vst [vmem:[#allocation11_spill] sm:$0xff] %v4959_v61  ;;  %v1205_v59 = vrot.slane %v6602_v28, 7  ;;  %v1206_v54 = vrot.slane %v6603_v56, 7  ;;  %v1207_v32 = vrot.slane %v6604_v21, 7  ;;  %v4980_v41 = vadd.f32 %v6606_v62, %v6605_v63  ;;  %v6615_v45 = vld [vmem:[#allocation84_spill] sm:$0xff] }
 0x237   : > { %6591 = vst [vmem:[#allocation46_spill] sm:$0xff] %v4961_v10  ;;  %v4984_v36 = vadd.f32 %v4789_v25, %v6608_v3  ;;  %v1202_v55 = vrot.slane %v6610_v48, 7  ;;  %v1203_v6 = vrot.slane %v6611_v31, 7  ;;  %v6612_v52 = vrot.slane %v4760_v0, 7  ;;  %v6617_v25 = vld [vmem:[#allocation83_spill] sm:$0xff] }
 0x238   : > { %6594 = vst [vmem:[#allocation19_spill] sm:$0xff] %v4965_v53  ;;  %v6614_v50 = vrot.slane %v6613_v43, 7  ;;  %v6616_v27 = vrot.slane %v6615_v45, 7  ;;  %v6618_v22 = vrot.slane %v6617_v25, 7  ;;  %v5010_v0 = vsel %vm1236_vm5, %v1212_v30, %v1213_v38 }
 0x239   : > { %6607 = vst [vmem:[#allocation21_spill] sm:$0xff] %v4980_v41  ;;  %v4992_v13 = vsel %vm1236_vm5, %v6612_v52, %v1233_v8  ;;  %v5014_v14 = vsel %vm1236_vm5, %v1211_v15, %v1212_v30  ;;  %v5018_v47 = vsel %vm1236_vm5, %v1210_v34, %v1211_v15  ;;  %v5022_v20 = vsel %vm1236_vm5, %v1209_v33, %v1210_v34 }
 0x23a   : > { %6609 = vst [vmem:[#allocation20_spill] sm:$0xff] %v4984_v36  ;;  %v5000_v35 = vsel %vm1236_vm5, %v6616_v27, %v6614_v50  ;;  %v5006_v57 = vsel %vm1236_vm5, %v1213_v38, %v6618_v22  ;;  %v5026_v16 = vsel %vm1236_vm5, %v1208_v39, %v1209_v33  ;;  %v5030_v38 = vsel %vm1236_vm5, %v1207_v32, %v1208_v39 }
 0x23b   : > { %6619 = vst [vmem:[#allocation53_spill] sm:$0xff] %v5006_v57  ;;  %v5034_v30 = vsel %vm1236_vm5, %v1206_v54, %v1207_v32  ;;  %v5038_v7 = vsel %vm1236_vm5, %v1205_v59, %v1206_v54  ;;  %v5042_v34 = vsel %vm1236_vm5, %v1204_v26, %v1205_v59  ;;  %v1272_v15 = vrot.slane %v4945_v37, 1 }
 0x23c   : > { %6620 = vst [vmem:[#allocation22_spill] sm:$0xff] %v5010_v0  ;;  %v6302_v33 = vrot.slane %v4947_v19, 1  ;;  %v6303_v44 = vrot.slane %v4949_v17, 1  ;;  %v1363_v39 = vadd.s32 240, %v6444_v40  ;;  %v6300_v28 = vrot.slane %v4951_v12, 1 }
 0x23d   : > { %6621 = vst [vmem:[#allocation17_spill] sm:$0xff] %v5014_v14  ;;  %v6297_v56 = vrot.slane %v4961_v10, 1  ;;  %v6295_v21 = vrot.slane %v4965_v53, 1  ;;  %v6294_v54 = vrot.slane %v4984_v36, 1  ;;  %v6301_v32 = vrot.slane %v4953_v5, 1  ;;  %v6637_v14 = vld [vmem:[#allocation34_spill] sm:$0xff] }
 0x23e   : > { %6622 = vst [vmem:[#allocation30_spill] sm:$0xff] %v5018_v47  ;;  %v6298_v59 = vrot.slane %v4955_v51, 1  ;;  %v6299_v37 = vrot.slane %v4957_v1, 1  ;;  %v6296_v63 = vrot.slane %v4959_v61, 1  ;;  %v5058_v62 = vsel %vm1236_vm5, %v1203_v6, %v1204_v26  ;;  %v6632_v47 = vld [vmem:[#allocation40_spill] sm:$0xff]  ;;  %v6633_v51 = vld [vmem:[#allocation63_spill] sm:$0xff] }
 0x23f   : > { %v5062_v3 = vsel %vm1236_vm5, %v1202_v55, %v1203_v6  ;;  %v1270_v48 = vrot.slane %v4941_v58, 1  ;;  %v1271_v31 = vrot.slane %v4943_v46, 1  ;;  %v1268_v52 = vsel %vm1236_vm5, %v1233_v8, %v1202_v55  ;;  %v6636_v1 = vld [vmem:[#allocation71_spill] sm:$0xff] }
 0x240   : > { %v6305_v43 = vrot.slane %v4939_v9, 1  ;;  %v1347_v50 = vadd.s32 112, %v6444_v40  ;;  %v1579_v27 = vand.u32 15, %v1363_v39  ;;  %v6623_v26 = vrot.slane %v4829_v23, 1 }
 0x241   : > { %v5085_v58 = vsel %vm1301_vm6, %v6297_v56, %v6295_v21  ;;  %v1335_v46 = vadd.s32 16, %v6444_v40  ;;  %v5094_v23 = vsel %vm1301_vm6, %v6299_v37, %v6296_v63  ;;  %v5102_v8 = vsel %vm1301_vm6, %v6301_v32, %v6298_v59 }
 0x242   : > { %v5077_v6 = vsel %vm1301_vm6, %v6623_v26, %v6294_v54  ;;  %6624 = vst [vmem:[#allocation90_spill] sm:$0xff] %v5085_v58  ;;  %v5110_v55 = vsel %vm1301_vm6, %v6303_v44, %v6300_v28  ;;  %v5116_v39 = vsel %vm1301_vm6, %v1272_v15, %v6302_v33  ;;  %v5120_v26 = vsel %vm1301_vm6, %v1271_v31, %v1272_v15 }
 0x243   : > { %6625 = vst [vmem:[#allocation68_spill] sm:$0xff] %v5094_v23  ;;  %v5124_v54 = vsel %vm1301_vm6, %v1270_v48, %v1271_v31  ;;  %v1334_v21 = vadd.s32 8, %v6444_v40  ;;  %v1369_v63 = vand.u32 15, %v6444_v40  ;;  %v1348_v56 = vadd.s32 120, %v6444_v40 }
 0x244   : > { %6626 = vst [vmem:[#allocation91_spill] sm:$0xff] %v5102_v8  ;;  %v1350_v22 = vadd.s32 136, %v6444_v40  ;;  %v1467_v59 = vand.u32 15, %v1347_v50  ;;  %vm1779_vm14 = vcmp.ne.s32.totalorder %v1579_v27, 0  ;;  %v5134_v15 = vsel %vm1301_vm6, %v6305_v43, %v1270_v48 }
 0x245   : > { %v1336_v37 = vadd.s32 24, %v6444_v40  ;;  %v1337_v31 = vadd.s32 32, %v6444_v40  ;;  %v1383_v28 = vand.u32 15, %v1335_v46  ;;  %v1338_v32 = vadd.s32 40, %v6444_v40 }
 0x246   : > { %v1339_v33 = vadd.s32 48, %v6444_v40  ;;  %v5141_v44 = vadd.s32 56, %v6444_v40  ;;  %v1362_v50 = vadd.s32 232, %v6444_v40  ;;  %v1341_v27 = vadd.s32 64, %v6444_v40 }
 0x247   : > { %v5146_v36 = vadd.s32 72, %v6444_v40  ;;  %vm1749_vm15 = vcmp.ne.s32.totalorder %v1369_v63, 0  ;;  %v6627_v48 = vmov 0.0   ;;  %v1376_v9 = vand.u32 15, %v1334_v21 }
 0x248   : > { %v2968_v43 = vsel %vm1779_vm14, 1.0, %v6627_v48  ;;  %v1474_v53 = vand.u32 15, %v1348_v56  ;;  %v1488_v46 = vand.u32 15, %v1350_v22  ;;  %vm1763_vm1 = vcmp.ne.s32.totalorder %v1467_v59, 0 }
 0x249   : > { %v5150_v61 = vadd.s32 80, %v6444_v40  ;;  %v5153_v10 = vadd.s32 88, %v6444_v40  ;;  %v5156_v58 = vadd.s32 96, %v6444_v40  ;;  %vm1751_vm2 = vcmp.ne.s32.totalorder %v1383_v28, 0 }
 0x24a   : > { %v1390_v0 = vand.u32 15, %v1336_v37  ;;  %v1572_v41 = vand.u32 15, %v1362_v50  ;;  %v2953_v63 = vsel %vm1749_vm15, 1.0, %v6627_v48  ;;  %v1971_v25 = vmul.f32 %v2968_v43, %v4803_v11  ;;  %v6630_v37 = vld [vmem:[#allocation39_spill] sm:$0xff]  ;;  %v6631_v50 = vld [vmem:[#allocation62_spill] sm:$0xff] }
 0x24b   : > { %v1397_v21 = vand.u32 15, %v1337_v31  ;;  %v1404_v56 = vand.u32 15, %v1338_v32  ;;  %v1411_v22 = vand.u32 15, %v1339_v33  ;;  %v2960_v59 = vsel %vm1763_vm1, 1.0, %v6627_v48  ;;  %v6634_v43 = vld [vmem:[#allocation87_spill] sm:$0xff]  ;;  %v6635_v32 = vld [vmem:[#allocation64_spill] sm:$0xff] }
 0x24c   : > { %v2954_v45 = vsel %vm1751_vm2, 1.0, %v6627_v48  ;;  %vm5162_vm3 = vcmp.ne.s32.totalorder %v1376_v9, 15  ;;  %vm1860_vm4 = vcmp.ne.s32.totalorder %v1474_v53, 15  ;;  %vm1862_vm7 = vcmp.ne.s32.totalorder %v1488_v46, 15 }
 0x24d   : > { %v1941_v28 = vmul.f32 %v2953_v63, %v1268_v52  ;;  %v1989_v23 = vadd.f32 %v6631_v50, %v6630_v37  ;;  %v1991_v11 = vadd.f32 %v6633_v51, %v6632_v47  ;;  %v1993_v33 = vadd.f32 %v6635_v32, %v6634_v43  ;;  %v6639_v63 = vld [vmem:[#allocation60_spill] sm:$0xff]  ;;  %v6650_v32 = vld [vmem:[#allocation23_spill] sm:$0xff] }
 0x24e   : > { %vm1874_vm8 = vcmp.ne.s32.totalorder %v1572_v41, 15  ;;  %v1955_v31 = vmul.f32 %v2960_v59, %v5000_v35  ;;  %v2003_v9 = vadd.f32 %v1971_v25, %v6636_v1  ;;  %v5176_v8 = vadd.f32 %v4992_v13, %v6637_v14  ;;  %v6638_v14 = vld [vmem:[#allocation69_spill] sm:$0xff] }
 0x24f   : > { %v1425_v53 = vand.u32 15, %v1341_v27  ;;  %vm1753_vm9 = vcmp.ne.s32.totalorder %v1397_v21, 0  ;;  %v2976_v52 = vsel %vm1860_vm4, 1.0, %v6627_v48  ;;  %v2977_v46 = vsel %vm1862_vm7, 1.0, %v6627_v48 }
 0x250   : > { %v1418_v51 = vand.u32 15, %v5141_v44  ;;  %v1432_v47 = vand.u32 15, %v5146_v36  ;;  %vm1755_vm10 = vcmp.ne.s32.totalorder %v1411_v22, 0  ;;  %v2969_v41 = vsel %vm5162_vm3, 1.0, %v6627_v48 }
 0x251   : > { %vm1848_vm11 = vcmp.ne.s32.totalorder %v1390_v0, 15  ;;  %v2983_v1 = vsel %vm1874_vm8, 1.0, %v6627_v48  ;;  %v1943_v13 = vmul.f32 %v2954_v45, %v5058_v62  ;;  %v1973_v35 = vadd.f32 %v1941_v28, %v4811_v18 }
 0x252   : > { %v2955_v25 = vsel %vm1753_vm9, 1.0, %v6627_v48  ;;  %v1987_v27 = vadd.f32 %v1955_v31, %v6638_v14  ;;  %v2020_v44 = vmul.f32 %v2976_v52, %v4893_v4  ;;  %v2022_v36 = vmul.f32 %v2977_v46, %v6639_v63  ;;  %v6651_v31 = vld [vmem:[#allocation75_spill] sm:$0xff] }
 0x253   : > { %v1439_v21 = vand.u32 15, %v5150_v61  ;;  %vm5193_vm12 = vcmp.ne.s32.totalorder %v1425_v53, 0  ;;  %v1974_v0 = vadd.f32 %v5062_v3, %v4813_v2  ;;  %v2006_v45 = vmul.f32 %v2969_v41, %v5124_v54  ;;  %v6644_v3 = vld [vmem:[#allocation12_spill] sm:$0xff] }
 0x254   : > { %v2956_v18 = vsel %vm1755_vm10, 1.0, %v6627_v48  ;;  %vm5201_vm13 = vcmp.ne.s32.totalorder %v1404_v56, 15  ;;  %v2970_v4 = vsel %vm1848_vm11, 1.0, %v6627_v48  ;;  %v2034_v22 = vmul.f32 %v2983_v1, %v4877_v29  ;;  %v6645_v29 = vld [vmem:[#allocation70_spill] sm:$0xff] }
 0x255   : > { %v1945_v61 = vmul.f32 %v2955_v25, %v5038_v7  ;;  %v1975_v59 = vadd.f32 %v1943_v13, %v4815_v60  ;;  %v1976_v28 = vadd.f32 %v5042_v34, %v4817_v49  ;;  %v5212_v2 = vadd.f32 %v1973_v35, %v5134_v15  ;;  %v6646_v49 = vld [vmem:[#allocation59_spill] sm:$0xff]  ;;  %v6647_v15 = vld [vmem:[#allocation8_spill] sm:$0xff] }
 0x256   : > { %v5215_v54 = vadd.f32 %v1987_v27, %v4908_v42  ;;  %v5218_v56 = vadd.f32 %v2020_v44, %v6644_v3  ;;  %v5221_v37 = vadd.f32 %v1989_v23, %v4885_v24  ;;  %v5224_v50 = vadd.f32 %v2022_v36, %v6645_v29  ;;  %v6659_v27 = vld [vmem:[#allocation33_spill] sm:$0xff]  ;;  %v6669_v3 = vld [vmem:[#allocation79_spill] sm:$0xff] }
 0x257   : > { %v2008_v60 = vmul.f32 %v2970_v4, %v5116_v39  ;;  %v5227_v7 = vadd.f32 %v2006_v45, %v1974_v0  ;;  %v5230_v34 = vadd.f32 %v1991_v11, %v6646_v49  ;;  %v5233_v43 = vadd.f32 %v1993_v33, %v6647_v15  ;;  %v6664_v0 = vld [vmem:[#allocation10_spill] sm:$0xff]  ;;  %v6670_v15 = vld [vmem:[#allocation41_spill] sm:$0xff] }
 0x258   : > { %vm5235_vm14 = vcmp.ne.s32.totalorder %v1418_v51, 15  ;;  %v2971_v24 = vsel %vm5201_vm13, 1.0, %v6627_v48  ;;  %v1947_v23 = vmul.f32 %v2956_v18, %v5030_v38  ;;  %v5244_v39 = vadd.f32 %v2034_v22, %v6650_v32  ;;  %v6690_v22 = vld [vmem:[#allocation22_spill] sm:$0xff] }
 0x259   : > { %v1977_v53 = vadd.f32 %v1945_v61, %v6651_v31  ;;  %v5248_v11 = vadd.f32 %v1975_v59, %v5120_v26  ;;  %v5251_v33 = vadd.f32 %v2003_v9, %v5077_v6  ;;  %v2069_v52 = vadd.f32 %v5227_v7, %v5212_v2  ;;  %v6656_v26 = vld [vmem:[#allocation78_spill] sm:$0xff] }
 0x25a   : > { %v6652_v46 = vrot.slane %v4949_v17, 1  ;;  %v6653_v51 = vrot.slane %v4947_v19, 1  ;;  %v1453_v41 = vand.u32 15, %v5156_v58  ;;  %vm5262_vm15 = vcmp.ne.s32.totalorder %v1439_v21, 0 }
 0x25b   : > { %v2957_v6 = vsel %vm5193_vm12, 1.0, %v6627_v48  ;;  %v1978_v9 = vadd.f32 %v5034_v30, %v6656_v26  ;;  %v2010_v17 = vmul.f32 %v2971_v24, %v5110_v55  ;;  %v5272_v13 = vadd.f32 %v2008_v60, %v1976_v28  ;;  %v6668_v28 = vld [vmem:[#allocation17_spill] sm:$0xff]  ;;  %v6672_v24 = vld [vmem:[#allocation47_spill] sm:$0xff] }
 0x25c   : > { %v1328_v38 = vsel %vm1301_vm6, %v6653_v51, %v6652_v46  ;;  %v2070_v19 = vadd.f32 %v2069_v52, %v5248_v11  ;;  %v1346_v35 = vadd.s32 104, %v6444_v40  ;;  %v1446_v58 = vand.u32 15, %v5153_v10  ;;  %v6674_v46 = vld [vmem:[#allocation81_spill] sm:$0xff]  ;;  %v6675_v51 = vld [vmem:[#allocation30_spill] sm:$0xff] }
 0x25d   : > { %vm5277_vm1 = vcmp.ne.s32.totalorder %v1432_v47, 15  ;;  %v2972_v14 = vsel %vm5235_vm14, 1.0, %v6627_v48  ;;  %v1949_v30 = vmul.f32 %v2957_v6, %v5022_v20  ;;  %v1979_v55 = vadd.f32 %v1947_v23, %v6659_v27 }
 0x25e   : > { %v5286_v44 = vadd.f32 %v1977_v53, %v1328_v38  ;;  %v2071_v63 = vadd.f32 %v2070_v19, %v5272_v13  ;;  %v6660_v36 = vrot.slane %v4953_v5, 1  ;;  %v6661_v10 = vrot.slane %v4951_v12, 1  ;;  %v6665_v5 = vld [vmem:[#allocation91_spill] sm:$0xff] }
 0x25f   : > { %vm5295_vm2 = vcmp.ne.s32.totalorder %v1453_v41, 0  ;;  %v2958_v20 = vsel %vm5262_vm15, 1.0, %v6627_v48  ;;  %v2106_v57 = vmul.f32 %v5212_v2, %v5212_v2  ;;  %v1980_v45 = vadd.f32 %v5026_v16, %v6664_v0  ;;  %v6676_v41 = vld [vmem:[#allocation68_spill] sm:$0xff]  ;;  %v6687_v0 = vld [vmem:[#allocation21_spill] sm:$0xff] }
 0x260   : > { %v1326_v47 = vsel %vm1301_vm6, %v6661_v10, %v6660_v36  ;;  %v2012_v18 = vmul.f32 %v2972_v14, %v6665_v5  ;;  %v5307_v12 = vadd.f32 %v2010_v17, %v1978_v9  ;;  %v2072_v62 = vadd.f32 %v2071_v63, %v5286_v44  ;;  %v6680_v14 = vld [vmem:[#allocation9_spill] sm:$0xff]  ;;  %v6681_v63 = vld [vmem:[#allocation84_spill] sm:$0xff]  ;;  %v6683_v10 = vld [vmem:[#allocation83_spill] sm:$0xff] }
 0x261   : > { %v1460_v4 = vand.u32 15, %v1346_v35  ;;  %vm5310_vm3 = vcmp.ne.s32.totalorder %v1446_v58, 15  ;;  %v2973_v61 = vsel %vm5277_vm1, 1.0, %v6627_v48  ;;  %v2107_v59 = vmul.f32 %v5227_v7, %v5227_v7  ;;  %v6679_v58 = vld [vmem:[#allocation53_spill] sm:$0xff]  ;;  %v6702_v9 = vld [vmem:[#allocation54_spill] sm:$0xff] }
 0x262   : > { %v1951_v16 = vmul.f32 %v2958_v20, %v6668_v28  ;;  %v1981_v29 = vadd.f32 %v1949_v30, %v6669_v3  ;;  %v5321_v60 = vadd.f32 %v1979_v55, %v1326_v47  ;;  %v2073_v49 = vadd.f32 %v2072_v62, %v5307_v12  ;;  %v6685_v20 = vld [vmem:[#allocation101_spill] sm:$0xff] }
 0x263   : > { %v6671_v42 = vrot.slane %v6670_v15, 1  ;;  %v6673_v23 = vrot.slane %v6672_v24, 1  ;;  %v2959_v31 = vsel %vm5295_vm2, 1.0, %v6627_v48  ;;  %v2108_v53 = vmul.f32 %v5248_v11, %v5248_v11  ;;  %v6694_v15 = vld [vmem:[#allocation11_spill] sm:$0xff] }
 0x264   : > { %v2138_v52 = vadd.f32 %v2107_v59, %v2106_v57  ;;  %v1982_v38 = vadd.f32 %v6675_v51, %v6674_v46  ;;  %v2014_v1 = vmul.f32 %v2973_v61, %v6676_v41  ;;  %v5338_v6 = vadd.f32 %v2012_v18, %v1980_v45  ;;  %v6691_v59 = vld [vmem:[#allocation90_spill] sm:$0xff] }
 0x265   : > { %v1324_v32 = vsel %vm1301_vm6, %v6673_v23, %v6671_v42  ;;  %v2074_v26 = vadd.f32 %v2073_v49, %v5321_v60  ;;  %vm5341_vm4 = vcmp.ne.s32.totalorder %v1460_v4, 15  ;;  %v2974_v17 = vsel %vm5310_vm3, 1.0, %v6627_v48  ;;  %v6689_v4 = vld [vmem:[#allocation80_spill] sm:$0xff]  ;;  %v6698_v51 = vld [vmem:[#allocation82_spill] sm:$0xff] }
 0x266   : > { %v2109_v19 = vmul.f32 %v5272_v13, %v5272_v13  ;;  %v2139_v35 = vadd.f32 %v2138_v52, %v2108_v53  ;;  %v1953_v25 = vmul.f32 %v2959_v31, %v6679_v58  ;;  %v1983_v30 = vadd.f32 %v1951_v16, %v6680_v14  ;;  %v6696_v53 = vld [vmem:[#allocation76_spill] sm:$0xff]  ;;  %v6697_v52 = vld [vmem:[#allocation61_spill] sm:$0xff] }
 0x267   : > { %v5352_v27 = vadd.f32 %v1981_v29, %v1324_v32  ;;  %v2075_v55 = vadd.f32 %v2074_v26, %v5338_v6  ;;  %v6682_v36 = vrot.slane %v6681_v63, 7  ;;  %v6684_v47 = vrot.slane %v6683_v10, 7  ;;  %v6692_v29 = vld [vmem:[#allocation46_spill] sm:$0xff] }
 0x268   : > { %v6686_v57 = vrot.slane %v6685_v20, 1  ;;  %v6688_v45 = vrot.slane %v6687_v0, 1  ;;  %v2110_v18 = vmul.f32 %v5286_v44, %v5286_v44  ;;  %v2140_v62 = vadd.f32 %v2139_v35, %v2109_v19  ;;  %v6699_v26 = vld [vmem:[#allocation94_spill] sm:$0xff]  ;;  %v6701_v35 = vld [vmem:[#allocation95_spill] sm:$0xff] }
 0x269   : > { %v1255_v21 = vsel %vm1236_vm5, %v6684_v47, %v6682_v36  ;;  %v1984_v61 = vadd.f32 %v6690_v22, %v6689_v4  ;;  %v2016_v28 = vmul.f32 %v2974_v17, %v6691_v59  ;;  %v5372_v16 = vadd.f32 %v2014_v1, %v1982_v38  ;;  %v6700_v17 = vld [vmem:[#allocation100_spill] sm:$0xff]  ;;  %v6704_v47 = vld [vmem:[#allocation55_spill] sm:$0xff]  ;;  %v6710_v0 = vld [vmem:[#allocation18_spill] sm:$0xff] }
 0x26a   : > { %v1319_v5 = vsel %vm1301_vm6, %v6688_v45, %v6686_v57  ;;  %v2076_v3 = vadd.f32 %v2075_v55, %v5352_v27  ;;  %v6693_v49 = vrot.slane %v6692_v29, 1  ;;  %v6695_v42 = vrot.slane %v6694_v15, 1  ;;  %v6709_v22 = vld [vmem:[#allocation56_spill] sm:$0xff] }
 0x26b   : > { %v2975_v23 = vsel %vm5341_vm4, 1.0, %v6627_v48  ;;  %v2111_v32 = vmul.f32 %v5307_v12, %v5307_v12  ;;  %v2141_v31 = vadd.f32 %v2140_v62, %v2110_v18  ;;  %v1022_v46 = vadd.f32 %v6697_v52, %v6696_v53 }
 0x26c   : > { %v1322_v24 = vsel %vm1301_vm6, %v6695_v42, %v6693_v49  ;;  %v1985_v38 = vadd.f32 %v1953_v25, %v6698_v51  ;;  %v2077_v1 = vadd.f32 %v2076_v3, %v5372_v16  ;;  %v5394_v19 = vadd.f32 %v6700_v17, %v6699_v26  ;;  %v6711_v49 = vld [vmem:[#allocation86_spill] sm:$0xff]  ;;  %v6714_v51 = vld [vmem:[#allocation57_spill] sm:$0xff] }
 0x26d   : > { %v5389_v41 = vadd.f32 %v1983_v30, %v1322_v24  ;;  %v5398_v58 = vadd.f32 %v6702_v9, %v6701_v35  ;;  %v2112_v14 = vmul.f32 %v5321_v60, %v5321_v60  ;;  %v2142_v55 = vadd.f32 %v2141_v31, %v2111_v32  ;;  %v6703_v30 = vld [vmem:[#allocation97_spill] sm:$0xff]  ;;  %v6716_v9 = vld [vmem:[#allocation36_spill] sm:$0xff] }
 0x26e   : > { %v1986_v63 = vadd.f32 %v1255_v21, %v1022_v46  ;;  %v2018_v36 = vmul.f32 %v2975_v23, %v1319_v5  ;;  %v5402_v10 = vadd.f32 %v2016_v28, %v1984_v61  ;;  %v5407_v20 = vadd.f32 %v6704_v47, %v6703_v30  ;;  %v6708_v5 = vld [vmem:[#allocation49_spill] sm:$0xff]  ;;  %v6712_v23 = vld [vmem:[#allocation15_spill] sm:$0xff]  ;;  %v6713_v46 = vld [vmem:[#allocation50_spill] sm:$0xff] }
 0x26f   : > { %v2078_v25 = vadd.f32 %v2077_v1, %v5389_v41  ;;  %v6705_v57 = vmov %v6688_v45  ;;  %v6706_v45 = vld [vmem:[#allocation19_spill] sm:$0xff]  ;;  %v2113_v4 = vmul.f32 %v5338_v6, %v5338_v6  ;;  %v2143_v21 = vadd.f32 %v2142_v55, %v2112_v14  ;;  %v6715_v1 = vld [vmem:[#allocation14_spill] sm:$0xff]  ;;  %v6717_v30 = vld [vmem:[#allocation48_spill] sm:$0xff] }
 0x270   : > { %v6707_v18 = vrot.slane %v6706_v45, 1  ;;  %v5419_v61 = vadd.f32 %v6709_v22, %v6708_v5  ;;  %v1354_v59 = vadd.s32 168, %v6444_v40  ;;  %v1223_v29 = vrot.slane %v6710_v0, 7 }
 0x271   : > { %v2079_v3 = vadd.f32 %v2078_v25, %v5402_v10  ;;  %v1224_v15 = vrot.slane %v6711_v49, 7  ;;  %v2114_v42 = vmul.f32 %v5352_v27, %v5352_v27  ;;  %v2144_v24 = vadd.f32 %v2143_v21, %v2113_v4 }
 0x272   : > { %v1320_v62 = vsel %vm1301_vm6, %v6707_v18, %v6705_v57  ;;  %v1227_v32 = vrot.slane %v6712_v23, 7  ;;  %v1357_v31 = vadd.s32 192, %v6444_v40  ;;  %v5431_v53 = vadd.f32 %v2018_v36, %v1986_v63 }
 0x273   : > { %v5422_v28 = vadd.f32 %v1985_v38, %v1320_v62  ;;  %v5436_v38 = vadd.f32 %v6714_v51, %v6713_v46  ;;  %v1225_v26 = vrot.slane %v6715_v1, 7  ;;  %v2115_v17 = vmul.f32 %v5372_v16, %v5372_v16  ;;  %v6719_v62 = vld [vmem:[#allocation37_spill] sm:$0xff]  ;;  %v6721_v46 = vld [vmem:[#allocation96_spill] sm:$0xff] }
 0x274   : > { %v2145_v35 = vadd.f32 %v2144_v24, %v2114_v42  ;;  %v1226_v14 = vrot.slane %v6716_v9, 7  ;;  %v1356_v55 = vadd.s32 184, %v6444_v40  ;;  %v1516_v25 = vand.u32 15, %v1354_v59 }
 0x275   : > { %v2080_v52 = vadd.f32 %v2079_v3, %v5422_v28  ;;  %v1246_v36 = vsel %vm1236_vm5, %v1223_v29, %v1224_v15  ;;  %v6718_v47 = vrot.slane %v6717_v30, 7  ;;  %v2116_v45 = vmul.f32 %v5389_v41, %v5389_v41 }
 0x276   : > { %v2146_v18 = vadd.f32 %v2145_v35, %v2115_v17  ;;  %v6720_v4 = vrot.slane %v6719_v62, 7  ;;  %v1291_v5 = vrot.slane %v5394_v19, 1  ;;  %v1537_v22 = vand.u32 15, %v1357_v31  ;;  %v6723_v17 = vld [vmem:[#allocation25_spill] sm:$0xff] }
 0x277   : > { %v2081_v63 = vadd.f32 %v2080_v52, %v5431_v53  ;;  %v1247_v57 = vsel %vm1236_vm5, %v6718_v47, %v1223_v29  ;;  %v1292_v3 = vrot.slane %v5398_v58, 1  ;;  %v1293_v0 = vrot.slane %v5407_v20, 1  ;;  %v6725_v47 = vld [vmem:[#allocation88_spill] sm:$0xff] }
 0x278   : > { %v1242_v21 = vsel %vm1236_vm5, %v1227_v32, %v6720_v4  ;;  %v2117_v29 = vmul.f32 %v5402_v10, %v5402_v10  ;;  %v2147_v49 = vadd.f32 %v2146_v18, %v2116_v45  ;;  %v1358_v42 = vadd.s32 200, %v6444_v40 }
 0x279   : > { %v2082_v59 = vadd.f32 %v2081_v63, %v5215_v54  ;;  %v1530_v24 = vand.u32 15, %v1356_v55  ;;  %vm1866_vm7 = vcmp.ne.s32.totalorder %v1516_v25, 15  ;;  %v1294_v52 = vrot.slane %v5419_v61, 1  ;;  %v6724_v55 = vld [vmem:[#allocation31_spill] sm:$0xff] }
 0x27a   : > { %v1295_v19 = vrot.slane %v5436_v38, 1  ;;  %v2118_v31 = vmul.f32 %v5422_v28, %v5422_v28  ;;  %v2148_v58 = vadd.f32 %v2147_v49, %v2117_v29  ;;  %v6722_v51 = vrot.slane %v6721_v46, 1  ;;  %v6727_v46 = vld [vmem:[#allocation29_spill] sm:$0xff] }
 0x27b   : > { %v2083_v23 = vadd.f32 %v2082_v59, %v5218_v56  ;;  %v1963_v35 = vmul.f32 %v6723_v17, %v1246_v36  ;;  %vm1773_vm8 = vcmp.ne.s32.totalorder %v1537_v22, 0  ;;  %v1967_v25 = vmul.f32 %v6724_v55, %v1242_v21  ;;  %v6726_v59 = vld [vmem:[#allocation89_spill] sm:$0xff] }
 0x27c   : > { %v1311_v1 = vsel %vm1301_vm6, %v6722_v51, %v1291_v5  ;;  %v2979_v61 = vsel %vm1866_vm7, 1.0, %v6627_v48  ;;  %v2119_v63 = vmul.f32 %v5431_v53, %v5431_v53  ;;  %v2149_v30 = vadd.f32 %v2148_v58, %v2118_v31  ;;  %v6728_v51 = vld [vmem:[#allocation44_spill] sm:$0xff] }
 0x27d   : > { %v2084_v9 = vadd.f32 %v2083_v23, %v5221_v37  ;;  %v1994_v45 = vadd.f32 %v1247_v57, %v6725_v47  ;;  %v1544_v18 = vand.u32 15, %v1358_v42  ;;  %vm1868_vm9 = vcmp.ne.s32.totalorder %v1530_v24, 15 }
 0x27e   : > { %v1244_v36 = vsel %vm1236_vm5, %v1225_v26, %v1226_v14  ;;  %v2965_v4 = vsel %vm1773_vm8, 1.0, %v6627_v48  ;;  %v2120_v21 = vmul.f32 %v5215_v54, %v5215_v54  ;;  %v2150_v22 = vadd.f32 %v2149_v30, %v2119_v63  ;;  %v6730_v63 = vld [vmem:[#allocation42_spill] sm:$0xff] }
 0x27f   : > { %v2085_v62 = vadd.f32 %v2084_v9, %v5224_v50  ;;  %v1995_v29 = vadd.f32 %v1963_v35, %v6726_v59  ;;  %v1245_v49 = vsel %vm1236_vm5, %v1224_v15, %v1225_v26  ;;  %v2026_v23 = vmul.f32 %v2979_v61, %v1311_v1  ;;  %v6729_v15 = vld [vmem:[#allocation58_spill] sm:$0xff] }
 0x280   : > { %v1309_v42 = vsel %vm1301_vm6, %v1292_v3, %v1293_v0  ;;  %v2980_v24 = vsel %vm1868_vm9, 1.0, %v6627_v48  ;;  %v2121_v31 = vmul.f32 %v5218_v56, %v5218_v56  ;;  %v2151_v58 = vadd.f32 %v2150_v22, %v2120_v21  ;;  %v6731_v22 = vld [vmem:[#allocation43_spill] sm:$0xff] }
 0x281   : > { %v2086_v57 = vadd.f32 %v2085_v62, %v5230_v34  ;;  %v1034_v17 = vadd.f32 %v6728_v51, %v6727_v46  ;;  %vm1870_vm10 = vcmp.ne.s32.totalorder %v1544_v18, 15  ;;  %v1965_v35 = vmul.f32 %v2965_v4, %v1244_v36 }
 0x282   : > { %v1243_v1 = vsel %vm1236_vm5, %v1226_v14, %v1227_v32  ;;  %v1307_v9 = vsel %vm1301_vm6, %v1294_v52, %v1295_v19  ;;  %v2122_v55 = vmul.f32 %v5221_v37, %v5221_v37  ;;  %v2152_v61 = vadd.f32 %v2151_v58, %v2121_v31 }
 0x283   : > { %v2087_v26 = vadd.f32 %v2086_v57, %v6729_v15  ;;  %v1996_v30 = vadd.f32 %v1245_v49, %v6730_v63  ;;  %v2028_v47 = vmul.f32 %v2980_v24, %v1309_v42  ;;  %v5508_v62 = vadd.f32 %v2026_v23, %v1994_v45  ;;  %v6732_v49 = vld [vmem:[#allocation32_spill] sm:$0xff]  ;;  %v6733_v23 = vld [vmem:[#allocation45_spill] sm:$0xff] }
 0x284   : > { %v1310_v36 = vsel %vm1301_vm6, %v1291_v5, %v1292_v3  ;;  %v2981_v32 = vsel %vm1870_vm10, 1.0, %v6627_v48  ;;  %v2123_v14 = vmul.f32 %v5224_v50, %v5224_v50  ;;  %v2153_v4 = vadd.f32 %v2152_v61, %v2122_v55 }
 0x285   : > { %v2088_v18 = vadd.f32 %v2087_v26, %v5233_v43  ;;  %v1364_v21 = vadd.s32 248, %v6444_v40  ;;  %v1997_v59 = vadd.f32 %v1965_v35, %v6731_v22  ;;  %v5518_v57 = vadd.f32 %v1995_v29, %v1310_v36  ;;  %v6738_v22 = vld [vmem:[#allocation20_spill] sm:$0xff] }
 0x286   : > { %v1035_v42 = vadd.f32 %v6733_v23, %v6732_v49  ;;  %v2124_v5 = vmul.f32 %v5230_v34, %v5230_v34  ;;  %v2154_v3 = vadd.f32 %v2153_v4, %v2123_v14  ;;  %v1998_v24 = vadd.f32 %v1243_v1, %v1034_v17 }
 0x287   : > { %v2089_v45 = vadd.f32 %v2088_v18, %v5508_v62  ;;  %v2030_v31 = vmul.f32 %v2981_v32, %v1307_v9  ;;  %v5525_v58 = vadd.f32 %v2028_v47, %v1996_v30  ;;  %v1308_v29 = vsel %vm1301_vm6, %v1293_v0, %v1294_v52  ;;  %v6734_v30 = vld [vmem:[#allocation51_spill] sm:$0xff] }
 0x288   : > { %v2125_v51 = vmul.f32 %v6729_v15, %v6729_v15  ;;  %v2155_v35 = vadd.f32 %v2154_v3, %v2124_v5  ;;  %v1999_v26 = vadd.f32 %v1967_v25, %v1035_v42  ;;  %v1586_v55 = vand.u32 15, %v1364_v21  ;;  %v6736_v21 = vld [vmem:[#allocation52_spill] sm:$0xff]  ;;  %v6740_v42 = vld [vmem:[#allocation38_spill] sm:$0xff] }
 0x289   : > { %v2090_v46 = vadd.f32 %v2089_v45, %v5518_v57  ;;  %v5534_v61 = vadd.f32 %v1997_v59, %v1308_v29  ;;  %v2126_v1 = vmul.f32 %v5233_v43, %v5233_v43  ;;  %v5539_v63 = vadd.f32 %v2030_v31, %v1998_v24 }
 0x28a   : > { %v2156_v9 = vadd.f32 %v2155_v35, %v2125_v51  ;;  %v6735_v0 = vrot.slane %v6734_v30, 1  ;;  %v2127_v25 = vmul.f32 %v5508_v62, %v5508_v62  ;;  %vm1876_vm5 = vcmp.ne.s32.totalorder %v1586_v55, 15 }
 0x28b   : > { %v2091_v17 = vadd.f32 %v2090_v46, %v5525_v58  ;;  %v2128_v32 = vmul.f32 %v5518_v57, %v5518_v57  ;;  %v6737_v38 = vrot.slane %v6736_v21, 1  ;;  %v6739_v59 = vrot.slane %v6738_v22, 1  ;;  %v6741_v46 = vld [vmem:[#allocation24_spill] sm:$0xff] }
 0x28c   : > { %v1306_v52 = vsel %vm1301_vm6, %v1295_v19, %v6735_v0  ;;  %v2157_v47 = vadd.f32 %v2156_v9, %v2126_v1  ;;  %v2984_v45 = vsel %vm1876_vm5, 1.0, %v6627_v48  ;;  %v2129_v49 = vmul.f32 %v5525_v58, %v5525_v58 }
 0x28d   : > { %v2092_v20 = vadd.f32 %v2091_v17, %v5534_v61  ;;  %v5550_v18 = vadd.f32 %v1999_v26, %v1306_v52  ;;  %v1333_v19 = vsel %vm1301_vm6, %v6739_v59, %v6737_v38  ;;  %v2130_v3 = vmul.f32 %v5534_v61, %v5534_v61 }
 0x28e   : > { %v2158_v14 = vadd.f32 %v2157_v47, %v2127_v25  ;;  %v2036_v31 = vmul.f32 %v2984_v45, %v1333_v19  ;;  %v2131_v51 = vmul.f32 %v5539_v63, %v5539_v63  ;;  %v2133_v1 = vmul.f32 %v6740_v42, %v6740_v42 }
 0x28f   : > { %v2093_v36 = vadd.f32 %v2092_v20, %v5539_v63  ;;  %v2132_v48 = vmul.f32 %v5550_v18, %v5550_v18  ;;  %v2134_v30 = vmul.f32 %v6741_v46, %v6741_v46  ;;  %v2135_v25 = vmul.f32 %v5244_v39, %v5244_v39 }
 0x290   : > { %v2159_v23 = vadd.f32 %v2158_v14, %v2128_v32  ;;  %v5575_v55 = vadd.f32 %v2036_v31, %v5176_v8  ;;  %v2136_v8 = vmul.f32 %v5251_v33, %v5251_v33  ;;  %vm2678_vm1 = vcmask 122880  }
 0x291   : > { %v2094_v4 = vadd.f32 %v2093_v36, %v5550_v18 }
 0x292   : > { %v2160_v24 = vadd.f32 %v2159_v23, %v2129_v49 }
 0x293   : > { %v2095_v5 = vadd.f32 %v2094_v4, %v6740_v42  ;;  %v2137_v4 = vmul.f32 %v5575_v55, %v5575_v55 }
 0x294   : > { %v2161_v40 = vadd.f32 %v2160_v24, %v2130_v3 }
 0x295   : > { %v2096_v29 = vadd.f32 %v2095_v5, %v6741_v46 }
 0x296   : > { %v2162_v26 = vadd.f32 %v2161_v40, %v2131_v51 }
 0x297   : > { %v2097_v35 = vadd.f32 %v2096_v29, %v5244_v39 }
 0x298   : > { %v2163_v9 = vadd.f32 %v2162_v26, %v2132_v48 }
 0x299   : > { %v2098_v17 = vadd.f32 %v2097_v35, %v5251_v33 }
 0x29a   : > { %v2164_v0 = vadd.f32 %v2163_v9, %v2133_v1 }
 0x29b   : > { %v2099_v20 = vadd.f32 %v2098_v17, %v5575_v55 }
 0x29c   : > { %v2165_v47 = vadd.f32 %v2164_v0, %v2134_v30 }
 0x29d   : > { %v2100_v52 = vrot.slane %v2099_v20, 4 }
 0x29e   : > { %v2166_v32 = vadd.f32 %v2165_v47, %v2135_v25 }
 0x29f   : > { %v2101_v36 = vadd.f32 %v2100_v52, %v2099_v20 }
 0x2a0   : > { %v2167_v21 = vadd.f32 %v2166_v32, %v2136_v8 }
 0x2a1   : > { %v2102_v14 = vrot.slane %v2101_v36, 2 }
 0x2a2   : > { %v2168_v22 = vadd.f32 %v2167_v21, %v2137_v4 }
 0x2a3   : > { %v2103_v38 = vadd.f32 %v2102_v14, %v2101_v36 }
 0x2a4   : > { %v2169_v19 = vrot.slane %v2168_v22, 4 }
 0x2a5   : > { %v2104_v59 = vrot.slane %v2103_v38, 1 }
 0x2a6   : > { %v2170_v49 = vadd.f32 %v2169_v19, %v2168_v22 }
 0x2a7   : > { %v2105_v45 = vadd.f32 %v2104_v59, %v2103_v38 }
 0x2a8   : > { %v2171_v23 = vrot.slane %v2170_v49, 2 }
 0x2a9   : > { %v5589_v3 = vmul.f32 0.00390625, %v2105_v45 }
 0x2aa   : > { %v2172_v5 = vadd.f32 %v2171_v23, %v2170_v49 }
 0x2ab   : > { %v2177_v29 = vmul.f32 %v5589_v3, %v5589_v3  ;;  %v2180_v30 = vsub.f32 %v5212_v2, %v5589_v3  ;;  %v2181_v52 = vsub.f32 %v5227_v7, %v5589_v3  ;;  %v2196_v25 = vsub.f32 %v5221_v37, %v5589_v3 }
 0x2ac   : > { %v2173_v24 = vrot.slane %v2172_v5, 1  ;;  %v2197_v47 = vsub.f32 %v5224_v50, %v5589_v3  ;;  %v2182_v36 = vsub.f32 %v5248_v11, %v5589_v3  ;;  %v2183_v2 = vsub.f32 %v5272_v13, %v5589_v3 }
 0x2ad   : > { %v2198_v32 = vsub.f32 %v5230_v34, %v5589_v3  ;;  %v2199_v7 = vsub.f32 %v6729_v15, %v5589_v3 }
 0x2ae   : > { %v2174_v31 = vadd.f32 %v2173_v24, %v2172_v5 }
 0x2b0   : > { %v2176_v51 = vmul.f32 0.00390625, %v2174_v31  ;;  %v2184_v31 = vsub.f32 %v5286_v44, %v5589_v3  ;;  %v2204_v44 = vsub.f32 %v5534_v61, %v5589_v3  ;;  %v2192_v61 = vsub.f32 %v5422_v28, %v5589_v3 }
 0x2b1   : > { %v2210_v28 = vsub.f32 %v5251_v33, %v5589_v3 }
 0x2b2   : > { %v2178_v40 = vsub.f32 %v2176_v51, %v2177_v29  ;;  %v2185_v29 = vsub.f32 %v5307_v12, %v5589_v3  ;;  %v2205_v12 = vsub.f32 %v5539_v63, %v5589_v3  ;;  %v2193_v63 = vsub.f32 %v5431_v53, %v5589_v3 }
 0x2b3   : > { %v2211_v53 = vsub.f32 %v5575_v55, %v5589_v3 }
 0x2b4   : > { %v2179_v35 = vmax.f32 %v2178_v40, 0.0 }
 0x2b6   : > { %v2212_v48 = vadd.f32 1e-05, %v2179_v35 }
 0x2b8   : > { %3097 = vrsqrt.f32 %v2212_v48  ;;  %vm2219_vm11 = vweird.f32 %v2212_v48 }
 0x2be   : > { %v3098_v26 = vpop.eup %3097 }
 0x2bf   : > { %v2214_v17 = vmul.f32 %v3098_v26, %v2212_v48  ;;  %vm2220_vm6 = vweird.f32 %v3098_v26 }
 0x2c0   : > { %vm2221_vm12 = vmor %vm2219_vm11, %vm2220_vm6 }
 0x2c1   : > { %v2215_v1 = vmul.f32 %v3098_v26, %v2214_v17  ;;  %v2201_v17 = vsub.f32 %v5508_v62, %v5589_v3 }
 0x2c3   : > { %v2216_v9 = vmul.f32 0.5, %v2215_v1  ;;  %v2188_v1 = vsub.f32 %v5352_v27, %v5589_v3  ;;  %v2206_v27 = vsub.f32 %v5550_v18, %v5589_v3  ;;  %v2194_v18 = vsub.f32 %v5215_v54, %v5589_v3 }
 0x2c5   : > { %v2217_v20 = vsub.f32 1.5, %v2216_v9  ;;  %v2189_v9 = vsub.f32 %v5372_v16, %v5589_v3 }
 0x2c7   : > { %v2218_v0 = vmul.f32 %v3098_v26, %v2217_v20 }
 0x2c9   : > { %v5603_v8 = vsel %vm2221_vm12, %v3098_v26, %v2218_v0  ;;  %v2200_v26 = vsub.f32 %v5233_v43, %v5589_v3  ;;  %v2190_v43 = vsub.f32 %v5389_v41, %v5589_v3  ;;  %v2191_v0 = vsub.f32 %v5402_v10, %v5589_v3 }
 0x2ca   : > { %v2223_v14 = vmul.f32 %v5603_v8, %v2180_v30  ;;  %v2224_v37 = vmul.f32 %v5603_v8, %v2181_v52  ;;  %v2239_v50 = vmul.f32 %v5603_v8, %v2196_v25  ;;  %v2240_v4 = vmul.f32 %v5603_v8, %v2197_v47 }
 0x2cb   : > { %v2225_v11 = vmul.f32 %v5603_v8, %v2182_v36  ;;  %v2226_v21 = vmul.f32 %v5603_v8, %v2183_v2  ;;  %v2241_v13 = vmul.f32 %v5603_v8, %v2198_v32  ;;  %v2242_v38 = vmul.f32 %v5603_v8, %v2199_v7 }
 0x2cc   : > { %v2255_v34 = vmax.f32 %v2223_v14, 0.0  ;;  %v2256_v22 = vmax.f32 %v2224_v37, 0.0  ;;  %v2271_v59 = vmax.f32 %v2239_v50, 0.0  ;;  %v2272_v15 = vmax.f32 %v2240_v4, 0.0 }
 0x2cd   : > { %v2257_v5 = vmax.f32 %v2225_v11, 0.0  ;;  %v2258_v24 = vmax.f32 %v2226_v21, 0.0  ;;  %v2273_v35 = vmax.f32 %v2241_v13, 0.0  ;;  %v2274_v48 = vmax.f32 %v2242_v38, 0.0 }
 0x2ce   : > { %v2287_v19 = vmin.f32 %v2255_v34, 6.0  ;;  %v2288_v45 = vmin.f32 %v2256_v22, 6.0  ;;  %v2303_v49 = vmin.f32 %v2271_v59, 6.0  ;;  %v2304_v23 = vmin.f32 %v2272_v15, 6.0 }
 0x2cf   : > { %v2289_v20 = vmin.f32 %v2257_v5, 6.0  ;;  %v2290_v30 = vmin.f32 %v2258_v24, 6.0  ;;  %v2305_v16 = vmin.f32 %v2273_v35, 6.0  ;;  %v2306_v52 = vmin.f32 %v2274_v48, 6.0 }
 0x2d0   : > { %v2319_v51 = vpack.c.bf16 %v2288_v45, %v2287_v19  ;;  %v2327_v40 = vpack.c.bf16 %v2304_v23, %v2303_v49  ;;  %v2207_v25 = vsub.f32 %v6740_v42, %v5589_v3  ;;  %v2208_v41 = vsub.f32 %v6741_v46, %v5589_v3 }
 0x2d1   : > { %v2209_v10 = vsub.f32 %v5244_v39, %v5589_v3  ;;  %v2231_v47 = vmul.f32 %v5603_v8, %v2188_v1  ;;  %v2195_v42 = vsub.f32 %v5218_v56, %v5589_v3  ;;  %v2320_v36 = vpack.c.bf16 %v2290_v30, %v2289_v20 }
 0x2d2   : > { %2407 = vmatmul.bf16.vlgmr.msra.gmra.mxu1 %v2319_v51  ;;  %2447 = vmatmul.bf16.vlgmr.msra.gmra.mxu2 %v2327_v40  ;;  %v5661_v46 = vmul.f32 %v5603_v8, %v2184_v31  ;;  %v5664_v39 = vmul.f32 %v5603_v8, %v2185_v29  ;;  %v2232_v54 = vmul.f32 %v5603_v8, %v2189_v9 }
 0x2d3   : > { %v2328_v2 = vpack.c.bf16 %v2306_v52, %v2305_v16  ;;  %v2263_v32 = vmax.f32 %v2231_v47, 0.0  ;;  %v2247_v7 = vmul.f32 %v5603_v8, %v2204_v44  ;;  %v2248_v56 = vmul.f32 %v5603_v8, %v2205_v12 }
 0x2d4   : > { %v2243_v33 = vmul.f32 %v5603_v8, %v2200_v26  ;;  %v2264_v14 = vmax.f32 %v2232_v54, 0.0  ;;  %v2233_v55 = vmul.f32 %v5603_v8, %v2190_v43  ;;  %v2234_v37 = vmul.f32 %v5603_v8, %v2191_v0 }
 0x2d5   : > { %v5672_v50 = vmin.f32 %v2263_v32, 6.0  ;;  %v2279_v4 = vmax.f32 %v2247_v7, 0.0  ;;  %v2280_v11 = vmax.f32 %v2248_v56, 0.0  ;;  %v2249_v21 = vmul.f32 %v5603_v8, %v2206_v27 }
 0x2d6   : > { %v5675_v13 = vmin.f32 %v2264_v14, 6.0  ;;  %v2265_v38 = vmax.f32 %v2233_v55, 0.0  ;;  %v2266_v34 = vmax.f32 %v2234_v37, 0.0  ;;  %v2250_v22 = vmul.f32 %v5603_v8, %v2207_v25 }
 0x2d7   : > { %v5678_v59 = vmin.f32 %v2279_v4, 6.0  ;;  %v5680_v15 = vmin.f32 %v2280_v11, 6.0  ;;  %v2281_v19 = vmax.f32 %v2249_v21, 0.0  ;;  %v2235_v45 = vmul.f32 %v5603_v8, %v2192_v61 }
 0x2d8   : > { %v2323_v49 = vpack.c.bf16 %v5675_v13, %v5672_v50  ;;  %v5685_v23 = vmin.f32 %v2265_v38, 6.0  ;;  %v5687_v5 = vmin.f32 %v2266_v34, 6.0  ;;  %v2282_v24 = vmax.f32 %v2250_v22, 0.0 }
 0x2d9   : > { %v2331_v31 = vpack.c.bf16 %v5680_v15, %v5678_v59  ;;  %v5691_v29 = vmin.f32 %v2281_v19, 6.0  ;;  %v2236_v51 = vmul.f32 %v5603_v8, %v2193_v63  ;;  %v2267_v40 = vmax.f32 %v2235_v45, 0.0 }
 0x2da   : > { %v2324_v35 = vpack.c.bf16 %v5687_v5, %v5685_v23  ;;  %v5696_v48 = vmin.f32 %v2282_v24, 6.0  ;;  %v2251_v26 = vmul.f32 %v5603_v8, %v2208_v41  ;;  %v2252_v1 = vmul.f32 %v5603_v8, %v2209_v10 }
 0x2db   : > { %v2268_v9 = vmax.f32 %v2236_v51, 0.0  ;;  %v2299_v44 = vmin.f32 %v2267_v40, 6.0  ;;  %v2237_v12 = vmul.f32 %v5603_v8, %v2194_v18  ;;  %v2238_v43 = vmul.f32 %v5603_v8, %v2195_v42 }
 0x2dc   : > { %v2332_v20 = vpack.c.bf16 %v5696_v48, %v5691_v29  ;;  %v2283_v30 = vmax.f32 %v2251_v26, 0.0  ;;  %v2284_v0 = vmax.f32 %v2252_v1, 0.0  ;;  %v2253_v27 = vmul.f32 %v5603_v8, %v2210_v28 }
 0x2dd   : > { %v2300_v16 = vmin.f32 %v2268_v9, 6.0  ;;  %v2269_v52 = vmax.f32 %v2237_v12, 0.0  ;;  %v2270_v25 = vmax.f32 %v2238_v43, 0.0  ;;  %v2254_v61 = vmul.f32 %v5603_v8, %v2211_v53 }
 0x2de   : > { %v2244_v63 = vmul.f32 %v5603_v8, %v2201_v17  ;;  %v2315_v41 = vmin.f32 %v2283_v30, 6.0  ;;  %v2316_v10 = vmin.f32 %v2284_v0, 6.0  ;;  %v2285_v18 = vmax.f32 %v2253_v27, 0.0 }
 0x2df   : > { %v2325_v47 = vpack.c.bf16 %v2300_v16, %v2299_v44  ;;  %v2301_v42 = vmin.f32 %v2269_v52, 6.0  ;;  %v2302_v54 = vmin.f32 %v2270_v25, 6.0  ;;  %v2286_v32 = vmax.f32 %v2254_v61, 0.0 }
 0x2e0   : > { %v2333_v28 = vpack.c.bf16 %v2316_v10, %v2315_v41  ;;  %v2259_v56 = vmax.f32 %v5661_v46, 0.0  ;;  %v2260_v53 = vmax.f32 %v5664_v39, 0.0  ;;  %v2275_v14 = vmax.f32 %v2243_v33, 0.0 }
 0x2e1   : > { %v2318_v7 = vmin.f32 %v2286_v32, 6.0  ;;  %v2276_v55 = vmax.f32 %v2244_v63, 0.0  ;;  %v2186_v34 = vsub.f32 %v5321_v60, %v5589_v3  ;;  %v2187_v22 = vsub.f32 %v5338_v6, %v5589_v3 }
 0x2e2   : > { %2412 = vmatmul.bf16.gmra.mxu1 %v2320_v36  ;;  %2452 = vmatmul.bf16.gmra.mxu2 %v2328_v2  ;;  %v2317_v36 = vmin.f32 %v2285_v18, 6.0  ;;  %v2326_v2 = vpack.c.bf16 %v2302_v54, %v2301_v42  ;;  %v2291_v37 = vmin.f32 %v2259_v56, 6.0  ;;  %v2292_v17 = vmin.f32 %v2260_v53, 6.0 }
 0x2e3   : > { %v2307_v4 = vmin.f32 %v2275_v14, 6.0  ;;  %v2308_v11 = vmin.f32 %v2276_v55, 6.0  ;;  %v2202_v46 = vsub.f32 %v5518_v57, %v5589_v3  ;;  %v2203_v39 = vsub.f32 %v5525_v58, %v5589_v3 }
 0x2e4   : > { %v2334_v62 = vpack.c.bf16 %v2318_v7, %v2317_v36  ;;  %v2321_v21 = vpack.c.bf16 %v2292_v17, %v2291_v37  ;;  %v2229_v33 = vmul.f32 %v5603_v8, %v2186_v34  ;;  %v2230_v19 = vmul.f32 %v5603_v8, %v2187_v22 }
 0x2e5   : > { %v2329_v38 = vpack.c.bf16 %v2308_v11, %v2307_v4  ;;  %v2245_v45 = vmul.f32 %v5603_v8, %v2202_v46  ;;  %v2246_v24 = vmul.f32 %v5603_v8, %v2203_v39 }
 0x2e6   : > { %v2261_v60 = vmax.f32 %v2229_v33, 0.0  ;;  %v2262_v29 = vmax.f32 %v2230_v19, 0.0 }
 0x2e7   : > { %v2277_v51 = vmax.f32 %v2245_v45, 0.0  ;;  %v2278_v40 = vmax.f32 %v2246_v24, 0.0 }
 0x2e8   : > { %v2293_v48 = vmin.f32 %v2261_v60, 6.0  ;;  %v2294_v6 = vmin.f32 %v2262_v29, 6.0 }
 0x2e9   : > { %v2309_v26 = vmin.f32 %v2277_v51, 6.0  ;;  %v2310_v1 = vmin.f32 %v2278_v40, 6.0 }
 0x2ea   : > { %v2322_v57 = vpack.c.bf16 %v2294_v6, %v2293_v48 }
 0x2eb   : > { %v2330_v9 = vpack.c.bf16 %v2310_v1, %v2309_v26 }
 0x2f2   : > { %2417 = vmatmul.bf16.gmra.mxu1 %v2321_v21  ;;  %2457 = vmatmul.bf16.gmra.mxu2 %v2329_v38 }
 0x302   : > { %2422 = vmatmul.bf16.gmra.mxu1 %v2322_v57  ;;  %2462 = vmatmul.bf16.gmra.mxu2 %v2330_v9 }
 0x312   : > { %2427 = vmatmul.bf16.gmra.mxu1 %v2323_v49  ;;  %2467 = vmatmul.bf16.gmra.mxu2 %v2331_v31 }
 0x322   : > { %2432 = vmatmul.bf16.gmra.mxu1 %v2324_v35  ;;  %2472 = vmatmul.bf16.gmra.mxu2 %v2332_v20 }
 0x332   : > { %2437 = vmatmul.bf16.gmra.mxu1 %v2325_v47  ;;  %2477 = vmatmul.bf16.gmra.mxu2 %v2333_v28 }
 0x342   : > { %2442 = vmatmul.bf16.gmra.mxu1 %v2326_v2  ;;  %2482 = vmatmul.bf16.gmra.mxu2 %v2334_v62 }
 0x34f   : > { %v5733_v58 = vpop.f32.mrf.mxu1 }
 0x350   : > { %v2557_v63 = vmul.f32 %v5733_v58, %v5733_v58  ;;  %v2488_v18 = vsel %vm329_vm0, %v5733_v58, 0.0 }
 0x352   : > { %v2589_v28 = vsel %vm329_vm0, %v2557_v63, 0.0 }
 0x355   : > { %v5735_v3 = vpop.f32.mrf.mxu2 }
 0x357   : > { %v5737_v8 = vpop.f32.mrf.mxu1 }
 0x358   : > { %v2558_v61 = vmul.f32 %v5737_v8, %v5737_v8  ;;  %v2489_v41 = vsel %vm329_vm0, %v5737_v8, 0.0 }
 0x359   : > { %v2490_v32 = vadd.f32 %v2489_v41, %v2488_v18 }
 0x35a   : > { %v2590_v47 = vsel %vm329_vm0, %v2558_v61, 0.0 }
 0x35b   : > { %v2591_v56 = vadd.f32 %v2590_v47, %v2589_v28 }
 0x35d   : > { %v5739_v50 = vpop.f32.mrf.mxu2 }
 0x35f   : > { %v5741_v13 = vpop.f32.mrf.mxu1 }
 0x360   : > { %v2559_v10 = vmul.f32 %v5741_v13, %v5741_v13  ;;  %v2491_v42 = vsel %vm329_vm0, %v5741_v13, 0.0 }
 0x361   : > { %v2492_v53 = vadd.f32 %v2491_v42, %v2490_v32 }
 0x362   : > { %v2592_v36 = vsel %vm329_vm0, %v2559_v10, 0.0 }
 0x363   : > { %v2593_v17 = vadd.f32 %v2592_v36, %v2591_v56 }
 0x365   : > { %v5743_v59 = vpop.f32.mrf.mxu2 }
 0x367   : > { %v5745_v15 = vpop.f32.mrf.mxu1 }
 0x368   : > { %v2560_v54 = vmul.f32 %v5745_v15, %v5745_v15  ;;  %v2493_v2 = vsel %vm329_vm0, %v5745_v15, 0.0 }
 0x369   : > { %v2494_v4 = vadd.f32 %v2493_v2, %v2492_v53 }
 0x36a   : > { %v2594_v55 = vsel %vm329_vm0, %v2560_v54, 0.0 }
 0x36b   : > { %v2595_v22 = vadd.f32 %v2594_v55, %v2593_v17 }
 0x36d   : > { %v5747_v49 = vpop.f32.mrf.mxu2 }
 0x36f   : > { %v5749_v23 = vpop.f32.mrf.mxu1 }
 0x370   : > { %v2561_v7 = vmul.f32 %v5749_v23, %v5749_v23  ;;  %v2495_v62 = vsel %vm329_vm0, %v5749_v23, 0.0 }
 0x371   : > { %v2496_v46 = vadd.f32 %v2495_v62, %v2494_v4 }
 0x372   : > { %v2596_v21 = vsel %vm329_vm0, %v2561_v7, 0.0 }
 0x373   : > { %v2597_v45 = vadd.f32 %v2596_v21, %v2595_v22 }
 0x375   : > { %v5751_v5 = vpop.f32.mrf.mxu2 }
 0x377   : > { %v5753_v31 = vpop.f32.mrf.mxu1 }
 0x378   : > { %v2562_v37 = vmul.f32 %v5753_v31, %v5753_v31  ;;  %v2497_v38 = vsel %vm329_vm0, %v5753_v31, 0.0 }
 0x379   : > { %v2498_v24 = vadd.f32 %v2497_v38, %v2496_v46 }
 0x37a   : > { %v2598_v39 = vsel %vm329_vm0, %v2562_v37, 0.0 }
 0x37b   : > { %v2599_v40 = vadd.f32 %v2598_v39, %v2597_v45 }
 0x37d   : > { %v5755_v35 = vpop.f32.mrf.mxu2 }
 0x37f   : > { %v5757_v44 = vpop.f32.mrf.mxu1 }
 0x380   : > { %v2563_v34 = vmul.f32 %v5757_v44, %v5757_v44  ;;  %v2499_v33 = vsel %vm329_vm0, %v5757_v44, 0.0 }
 0x381   : > { %v2500_v48 = vadd.f32 %v2499_v33, %v2498_v24 }
 0x382   : > { %v2600_v60 = vsel %vm329_vm0, %v2563_v34, 0.0 }
 0x383   : > { %v2601_v9 = vadd.f32 %v2600_v60, %v2599_v40 }
 0x385   : > { %v5761_v43 = vpop.f32.mrf.mxu2 }
 0x387   : > { %v5759_v12 = vpop.f32.mrf.mxu1 }
 0x388   : > { %v2564_v19 = vmul.f32 %v5759_v12, %v5759_v12  ;;  %v2501_v29 = vsel %vm329_vm0, %v5759_v12, 0.0 }
 0x389   : > { %v2502_v61 = vadd.f32 %v2501_v29, %v2500_v48 }
 0x38a   : > { %v2602_v26 = vsel %vm329_vm0, %v2564_v19, 0.0 }
 0x38b   : > { %v2603_v18 = vadd.f32 %v2602_v26, %v2601_v9 }
 0x38d   : > { %v5765_v30 = vpop.f32.mrf.mxu2 }
 0x38f   : > { %v5763_v20 = vpop.f32.mrf.mxu1 }
 0x390   : > { %v2565_v51 = vmul.f32 %v5763_v20, %v5763_v20  ;;  %v2503_v1 = vsel %vm329_vm0, %v5763_v20, 0.0 }
 0x391   : > { %v2504_v47 = vadd.f32 %v2503_v1, %v2502_v61 }
 0x392   : > { %v2604_v63 = vsel %vm329_vm0, %v2565_v51, 0.0 }
 0x393   : > { %v2605_v36 = vadd.f32 %v2604_v63, %v2603_v18  ;;  %v2574_v18 = vmul.f32 %v5739_v50, %v5739_v50 }
 0x395   : > { %v5769_v27 = vpop.f32.mrf.mxu2 }
 0x397   : > { %v5767_v0 = vpop.f32.mrf.mxu1 }
 0x398   : > { %v2566_v57 = vmul.f32 %v5767_v0, %v5767_v0  ;;  %v2505_v41 = vsel %vm329_vm0, %v5767_v0, 0.0 }
 0x399   : > { %v2506_v2 = vadd.f32 %v2505_v41, %v2504_v47 }
 0x39a   : > { %v2606_v54 = vsel %vm329_vm0, %v2566_v57, 0.0  ;;  %v2573_v57 = vmul.f32 %v5735_v3, %v5735_v3 }
 0x39b   : > { %v2607_v55 = vadd.f32 %v2606_v54, %v2605_v36  ;;  %v2521_v36 = vsel %vm329_vm0, %v5739_v50, 0.0 }
 0x39d   : > { %v5773_v52 = vpop.f32.mrf.mxu2 }
 0x39f   : > { %v5771_v16 = vpop.f32.mrf.mxu1 }
 0x3a0   : > { %v2567_v10 = vmul.f32 %v5771_v16, %v5771_v16  ;;  %v2507_v32 = vsel %vm329_vm0, %v5771_v16, 0.0 }
 0x3a1   : > { %v2508_v62 = vadd.f32 %v2507_v32, %v2506_v2  ;;  %v2575_v2 = vmul.f32 %v5743_v59, %v5743_v59 }
 0x3a2   : > { %v2608_v7 = vsel %vm329_vm0, %v2567_v10, 0.0  ;;  %v2519_v10 = vsel %vm329_vm0, %v5735_v3, 0.0 }
 0x3a3   : > { %v2609_v38 = vadd.f32 %v2608_v7, %v2607_v55  ;;  %v2523_v55 = vsel %vm329_vm0, %v5743_v59, 0.0 }
 0x3a5   : > { %v5805_v11 = vpop.f32.mrf.mxu2 }
 0x3a7   : > { %v5775_v25 = vpop.f32.mrf.mxu1 }
 0x3a8   : > { %v2568_v28 = vmul.f32 %v5775_v25, %v5775_v25  ;;  %v2509_v56 = vsel %vm329_vm0, %v5775_v25, 0.0 }
 0x3a9   : > { %v2510_v34 = vadd.f32 %v2509_v56, %v2508_v62  ;;  %v2576_v62 = vmul.f32 %v5747_v49, %v5747_v49 }
 0x3aa   : > { %v2610_v17 = vsel %vm329_vm0, %v2568_v28, 0.0  ;;  %v2620_v28 = vsel %vm329_vm0, %v2573_v57, 0.0 }
 0x3ab   : > { %v2611_v33 = vadd.f32 %v2610_v17, %v2609_v38  ;;  %v2624_v38 = vsel %vm329_vm0, %v2575_v2, 0.0 }
 0x3ad   : > { %v5834_v42 = vpop.f32.mrf.mxu2 }
 0x3af   : > { %v5798_v14 = vpop.f32.mrf.mxu1 }
 0x3b0   : > { %v2569_v53 = vmul.f32 %v5798_v14, %v5798_v14  ;;  %v2511_v4 = vsel %vm329_vm0, %v5798_v14, 0.0 }
 0x3b1   : > { %v2512_v19 = vadd.f32 %v2511_v4, %v2510_v34  ;;  %v2525_v34 = vsel %vm329_vm0, %v5747_v49, 0.0 }
 0x3b2   : > { %v2612_v22 = vsel %vm329_vm0, %v2569_v53, 0.0  ;;  %v2622_v53 = vsel %vm329_vm0, %v2574_v18, 0.0 }
 0x3b3   : > { %v2613_v60 = vadd.f32 %v2612_v22, %v2611_v33  ;;  %v2577_v22 = vmul.f32 %v5751_v5, %v5751_v5  ;;  %v2626_v33 = vsel %vm329_vm0, %v2576_v62, 0.0 }
 0x3b5   : > { %v5861_v29 = vpop.f32.mrf.mxu2 }
 0x3b7   : > { %v5822_v6 = vpop.f32.mrf.mxu1 }
 0x3b8   : > { %v2570_v21 = vmul.f32 %v5822_v6, %v5822_v6  ;;  %v2513_v46 = vsel %vm329_vm0, %v5822_v6, 0.0 }
 0x3b9   : > { %v2514_v51 = vadd.f32 %v2513_v46, %v2512_v19  ;;  %v2527_v19 = vsel %vm329_vm0, %v5751_v5, 0.0 }
 0x3ba   : > { %v2614_v45 = vsel %vm329_vm0, %v2570_v21, 0.0 }
 0x3bb   : > { %v2615_v48 = vadd.f32 %v2614_v45, %v2613_v60  ;;  %v2578_v45 = vmul.f32 %v5755_v35, %v5755_v35 }
 0x3bd   : > { %v5887_v17 = vpop.f32.mrf.mxu2 }
 0x3bf   : > { %v5846_v37 = vpop.f32.mrf.mxu1 }
 0x3c0   : > { %v2571_v39 = vmul.f32 %v5846_v37, %v5846_v37  ;;  %v2515_v24 = vsel %vm329_vm0, %v5846_v37, 0.0 }
 0x3c1   : > { %v2516_v26 = vadd.f32 %v2515_v24, %v2514_v51  ;;  %v2628_v51 = vsel %vm329_vm0, %v2577_v22, 0.0 }
 0x3c2   : > { %v2616_v40 = vsel %vm329_vm0, %v2571_v39, 0.0 }
 0x3c3   : > { %v2617_v63 = vadd.f32 %v2616_v40, %v2615_v48  ;;  %v2529_v40 = vsel %vm329_vm0, %v5755_v35, 0.0  ;;  %v2579_v48 = vmul.f32 %v5761_v43, %v5761_v43 }
 0x3c5   : > { %v2632_v18 = vsel %vm329_vm0, %v2579_v48, 0.0 }
 0x3c7   : > { %v5864_v1 = vpop.f32.mrf.mxu1 }
 0x3c8   : > { %v2517_v9 = vsel %vm329_vm0, %v5864_v1, 0.0  ;;  %v2572_v61 = vmul.f32 %v5864_v1, %v5864_v1 }
 0x3c9   : > { %v2518_v41 = vadd.f32 %v2517_v9, %v2516_v26  ;;  %v2630_v9 = vsel %vm329_vm0, %v2578_v45, 0.0 }
 0x3ca   : > { %v2618_v47 = vsel %vm329_vm0, %v2572_v61, 0.0  ;;  %v2531_v61 = vsel %vm329_vm0, %v5761_v43, 0.0 }
 0x3cb   : > { %v2520_v54 = vadd.f32 %v2519_v10, %v2518_v41  ;;  %v2619_v32 = vadd.f32 %v2618_v47, %v2617_v63  ;;  %v2580_v63 = vmul.f32 %v5765_v30, %v5765_v30  ;;  %v2533_v47 = vsel %vm329_vm0, %v5765_v30, 0.0 }
 0x3cd   : > { %v2522_v7 = vadd.f32 %v2521_v36, %v2520_v54  ;;  %v2621_v56 = vadd.f32 %v2620_v28, %v2619_v32  ;;  %v2581_v54 = vmul.f32 %v5769_v27, %v5769_v27  ;;  %v5914_v32 = vpop.f32.mrf.mxu2  ;;  %v2634_v2 = vsel %vm329_vm0, %v2580_v63, 0.0 }
 0x3cf   : > { %v2524_v4 = vadd.f32 %v2523_v55, %v2522_v7  ;;  %v2623_v21 = vadd.f32 %v2622_v53, %v2621_v56  ;;  %v2535_v7 = vsel %vm329_vm0, %v5769_v27, 0.0  ;;  %v2582_v56 = vmul.f32 %v5773_v52, %v5773_v52 }
 0x3d0   : > { %v2636_v62 = vsel %vm329_vm0, %v2581_v54, 0.0 }
 0x3d1   : > { %v2526_v46 = vadd.f32 %v2525_v34, %v2524_v4  ;;  %v2625_v39 = vadd.f32 %v2624_v38, %v2623_v21  ;;  %v2537_v4 = vsel %vm329_vm0, %v5773_v52, 0.0  ;;  %v2583_v21 = vmul.f32 %v5805_v11, %v5805_v11 }
 0x3d2   : > { %v2638_v22 = vsel %vm329_vm0, %v2582_v56, 0.0 }
 0x3d3   : > { %v2528_v24 = vadd.f32 %v2527_v19, %v2526_v46  ;;  %v2627_v60 = vadd.f32 %v2626_v33, %v2625_v39  ;;  %v2539_v46 = vsel %vm329_vm0, %v5805_v11, 0.0  ;;  %v2584_v39 = vmul.f32 %v5834_v42, %v5834_v42 }
 0x3d4   : > { %v2640_v45 = vsel %vm329_vm0, %v2583_v21, 0.0 }
 0x3d5   : > { %v2530_v26 = vadd.f32 %v2529_v40, %v2528_v24  ;;  %v2629_v57 = vadd.f32 %v2628_v51, %v2627_v60  ;;  %v2541_v24 = vsel %vm329_vm0, %v5834_v42, 0.0  ;;  %v2585_v60 = vmul.f32 %v5861_v29, %v5861_v29 }
 0x3d6   : > { %v2642_v48 = vsel %vm329_vm0, %v2584_v39, 0.0 }
 0x3d7   : > { %v2532_v41 = vadd.f32 %v2531_v61, %v2530_v26  ;;  %v2631_v10 = vadd.f32 %v2630_v9, %v2629_v57  ;;  %v2543_v26 = vsel %vm329_vm0, %v5861_v29, 0.0  ;;  %v2586_v57 = vmul.f32 %v5887_v17, %v5887_v17  ;;  %v5941_v9 = vpop.f32.mrf.mxu2 }
 0x3d9   : > { %v2633_v28 = vadd.f32 %v2632_v18, %v2631_v10  ;;  %v2534_v36 = vadd.f32 %v2533_v47, %v2532_v41  ;;  %v2644_v41 = vsel %vm329_vm0, %v2585_v60, 0.0  ;;  %v2545_v10 = vsel %vm329_vm0, %v5887_v17, 0.0 }
 0x3da   : > { %v2587_v18 = vmul.f32 %v5914_v32, %v5914_v32 }
 0x3db   : > { %v2536_v53 = vadd.f32 %v2535_v7, %v2534_v36  ;;  %v2635_v55 = vadd.f32 %v2634_v2, %v2633_v28  ;;  %v2646_v28 = vsel %vm329_vm0, %v2586_v57, 0.0  ;;  %v2547_v36 = vsel %vm329_vm0, %v5914_v32, 0.0 }
 0x3dc   : > { %v2588_v2 = vmul.f32 %v5941_v9, %v5941_v9 }
 0x3dd   : > { %v2538_v38 = vadd.f32 %v2537_v4, %v2536_v53  ;;  %v2637_v34 = vadd.f32 %v2636_v62, %v2635_v55  ;;  %v2648_v53 = vsel %vm329_vm0, %v2587_v18, 0.0  ;;  %v2549_v55 = vsel %vm329_vm0, %v5941_v9, 0.0 }
 0x3de   : > { %v2650_v21 = vsel %vm329_vm0, %v2588_v2, 0.0 }
 0x3df   : > { %v2540_v33 = vadd.f32 %v2539_v46, %v2538_v38  ;;  %v2639_v19 = vadd.f32 %v2638_v22, %v2637_v34 }
 0x3e1   : > { %v2542_v51 = vadd.f32 %v2541_v24, %v2540_v33  ;;  %v2641_v40 = vadd.f32 %v2640_v45, %v2639_v19 }
 0x3e3   : > { %v2544_v61 = vadd.f32 %v2543_v26, %v2542_v51  ;;  %v2643_v63 = vadd.f32 %v2642_v48, %v2641_v40 }
 0x3e5   : > { %v2546_v47 = vadd.f32 %v2545_v10, %v2544_v61  ;;  %v2645_v54 = vadd.f32 %v2644_v41, %v2643_v63 }
 0x3e7   : > { %v2548_v7 = vadd.f32 %v2547_v36, %v2546_v47  ;;  %v2647_v56 = vadd.f32 %v2646_v28, %v2645_v54 }
 0x3e9   : > { %v2550_v62 = vadd.f32 %v2549_v55, %v2548_v7  ;;  %v2649_v4 = vadd.f32 %v2648_v53, %v2647_v56 }
 0x3eb   : > { %v2551_v38 = vrot.slane %v2550_v62, 4  ;;  %v2651_v34 = vadd.f32 %v2650_v21, %v2649_v4  ;;  %v2676_v21 = vld [vmem:[%s6217_s4] sm:$0x1] }
 0x3ed   : > { %v2552_v22 = vadd.f32 %v2551_v38, %v2550_v62  ;;  %v2652_v46 = vrot.slane %v2651_v34, 4 }
 0x3ef   : > { %v2553_v39 = vrot.slane %v2552_v22, 2  ;;  %v2653_v33 = vadd.f32 %v2652_v46, %v2651_v34 }
 0x3f1   : > { %v2554_v19 = vadd.f32 %v2553_v39, %v2552_v22  ;;  %v2654_v45 = vrot.slane %v2653_v33, 2  ;;  %v2683_v39 = vld [vmem:[%s6218_s5] sm:$0x1] }
 0x3f3   : > { %v2555_v24 = vrot.slane %v2554_v19, 1  ;;  %v2655_v60 = vadd.f32 %v2654_v45, %v2653_v33 }
 0x3f5   : > { %v2556_v51 = vadd.f32 %v2555_v24, %v2554_v19  ;;  %v2656_v40 = vrot.slane %v2655_v60, 1 }
 0x3f7   : > { %v2657_v48 = vadd.f32 %v2656_v40, %v2655_v60  ;;  %v5957_v26 = vmul.f32 0.00390625, %v2556_v51 }
 0x3f9   : > { %v2659_v57 = vmul.f32 0.00390625, %v2657_v48  ;;  %v2660_v61 = vmul.f32 %v5957_v26, %v5957_v26  ;;  %v2736_v63 = vsub.f32 %v5941_v9, %v5957_v26  ;;  %v2719_v10 = vsub.f32 %v5846_v37, %v5957_v26  ;;  %v3136_v9 = vld [vmem:[%s3368_s12 + $0xf0] sm:$0xff] }
 0x3fa   : > { %v2720_v18 = vsub.f32 %v5864_v1, %v5957_v26  ;;  %v2735_v47 = vsub.f32 %v5914_v32, %v5957_v26  ;;  %v2674_v62 = vsub.f32 %v5957_v26, %v5957_v26  ;;  %v2723_v37 = vsub.f32 %v5743_v59, %v5957_v26  ;;  %v3133_v32 = vld [vmem:[%s3368_s12 + $0xd8] sm:$0xff] }
 0x3fb   : > { %v2661_v41 = vsub.f32 %v2659_v57, %v2660_v61  ;;  %v2725_v59 = vsub.f32 %v5751_v5, %v5957_v26  ;;  %v2727_v5 = vsub.f32 %v5761_v43, %v5957_v26  ;;  %v2729_v43 = vsub.f32 %v5769_v27, %v5957_v26 }
 0x3fc   : > { %v2731_v27 = vsub.f32 %v5805_v11, %v5957_v26  ;;  %v2733_v11 = vsub.f32 %v5861_v29, %v5957_v26 }
 0x3fd   : > { %v2662_v54 = vmax.f32 %v2661_v41, 0.0 }
 0x3ff   : > { %v2663_v28 = vadd.f32 1e-05, %v2662_v54 }
 0x401   : > { %3099 = vrsqrt.f32 %v2663_v28  ;;  %vm2670_vm14 = vweird.f32 %v2663_v28 }
 0x407   : > { %v3100_v36 = vpop.eup %3099 }
 0x408   : > { %v2665_v2 = vmul.f32 %v3100_v36, %v2663_v28  ;;  %vm2671_vm13 = vweird.f32 %v3100_v36 }
 0x409   : > { %vm2672_vm15 = vmor %vm2670_vm14, %vm2671_vm13 }
 0x40a   : > { %v2666_v7 = vmul.f32 %v3100_v36, %v2665_v2 }
 0x40c   : > { %v2667_v56 = vmul.f32 0.5, %v2666_v7 }
 0x40e   : > { %v2668_v53 = vsub.f32 1.5, %v2667_v56 }
 0x410   : > { %v2669_v55 = vmul.f32 %v3100_v36, %v2668_v53  ;;  %v2705_v53 = vsub.f32 %v5733_v58, %v5957_v26 }
 0x412   : > { %v2673_v4 = vsel %vm2672_vm15, %v3100_v36, %v2669_v55  ;;  %v2706_v55 = vsub.f32 %v5737_v8, %v5957_v26  ;;  %v2710_v8 = vsub.f32 %v5753_v31, %v5957_v26 }
 0x413   : > { %v2675_v38 = vmul.f32 %v2674_v62, %v2673_v4  ;;  %v2707_v62 = vsub.f32 %v5741_v13, %v5957_v26 }
 0x415   : > { %v2677_v34 = vmul.f32 %v2676_v21, %v2675_v38  ;;  %v2708_v21 = vsub.f32 %v5745_v15, %v5957_v26  ;;  %v2709_v38 = vsub.f32 %v5749_v23, %v5957_v26  ;;  %v2712_v23 = vsub.f32 %v5759_v12, %v5957_v26 }
 0x417   : > { %v2679_v22 = vsel %vm2678_vm1, %v2677_v34, 0.0 }
 0x418   : > { %2680 = vadd.xlane.f32.xlu0 %v2679_v22  ;;  %v2711_v22 = vsub.f32 %v5757_v44, %v5957_v26  ;;  %v3108_v44 = vld [vmem:[%s3368_s12 + $0x10] sm:$0xff] }
 0x48b   : > { %v2681_v46 = vpop.xlane.xlu0 %2680 }
 0x48c   : > { %v2682_v33 = vmax.f32 %v2681_v46, 0.0  ;;  %v2713_v46 = vsub.f32 %v5763_v20, %v5957_v26 }
 0x48e   : > { %v2684_v19 = vmul.f32 %v2683_v39, %v2682_v33  ;;  %v3106_v33 = vld [vmem:[%s3368_s12] sm:$0xff] }
 0x490   : > { %v3017_v45 = vmul.f32 -1.442695, %v2684_v19 }
 0x492   : > { %3101 = vpow2.f32 %v3017_v45  ;;  %v3107_v45 = vld [vmem:[%s3368_s12 + $0x8] sm:$0xff] }
 0x498   : > { %v3102_v24 = vpop.eup %3101 }
 0x499   : > { %v2689_v60 = vadd.f32 1.0, %v3102_v24 }
 0x49b   : > { %3103 = vrcp.f32 %v2689_v60  ;;  %v2701_v57 = vand.u32 2147483648, %v2689_v60  ;;  %v2699_v41 = vand.u32 2147483647, %v2689_v60  ;;  %vm2695_vm3 = vweird.f32 %v2689_v60 }
 0x49d   : > { %v2702_v28 = vor.u32 1.1754944e-38, %v2701_v57  ;;  %vm2700_vm7 = vcmp.eq.f32.partialorder %v2699_v41, 8.507059e+37 }
 0x4a1   : > { %v3104_v51 = vpop.eup %3103 }
 0x4a2   : > { %v2691_v40 = vmul.f32 %v3104_v51, %v2689_v60  ;;  %vm2696_vm2 = vweird.f32 %v3104_v51 }
 0x4a3   : > { %vm2697_vm4 = vmor %vm2695_vm3, %vm2696_vm2 }
 0x4a4   : > { %v2692_v48 = vsub.f32 1.0, %v2691_v40  ;;  %v3109_v40 = vld [vmem:[%s3368_s12 + $0x18] sm:$0xff] }
 0x4a6   : > { %v2693_v61 = vmul.f32 %v3104_v51, %v2692_v48  ;;  %v2715_v48 = vsub.f32 %v5771_v16, %v5957_v26 }
 0x4a8   : > { %v2694_v54 = vadd.f32 %v3104_v51, %v2693_v61  ;;  %v3110_v61 = vld [vmem:[%s3368_s12 + $0x20] sm:$0xff] }
 0x4aa   : > { %v2698_v36 = vsel %vm2697_vm4, %v3104_v51, %v2694_v54  ;;  %v2714_v51 = vsub.f32 %v5767_v0, %v5957_v26  ;;  %v2716_v0 = vsub.f32 %v5775_v25, %v5957_v26  ;;  %v3111_v54 = vld [vmem:[%s3368_s12 + $0x28] sm:$0xff]  ;;  %v2718_v25 = vsub.f32 %v5822_v6, %v5957_v26 }
 0x4ab   : > { %v2703_v2 = vsel %vm2700_vm7, %v2702_v28, %v2698_v36  ;;  %v2717_v36 = vsub.f32 %v5798_v14, %v5957_v26 }
 0x4ac   : > { %v2737_v7 = vmul.f32 %v2703_v2, %v2673_v4 }
 0x4ae   : > { %v5977_v56 = vperm.slane %v2737_v7, 0  ;;  %v3112_v7 = vld [vmem:[%s3368_s12 + $0x30] sm:$0xff] }
 0x4b0   : > { %v2739_v4 = vmul.f32 %v5977_v56, %v2705_v53  ;;  %v2740_v34 = vmul.f32 %v5977_v56, %v2706_v55  ;;  %v2741_v58 = vmul.f32 %v5977_v56, %v2707_v62  ;;  %v2742_v13 = vmul.f32 %v5977_v56, %v2708_v21  ;;  %v3113_v62 = vld [vmem:[%s3368_s12 + $0x38] sm:$0xff] }
 0x4b1   : > { %v2743_v15 = vmul.f32 %v5977_v56, %v2709_v38  ;;  %v2744_v39 = vmul.f32 %v5977_v56, %v2710_v8  ;;  %v2745_v31 = vmul.f32 %v5977_v56, %v2711_v22  ;;  %v2746_v12 = vmul.f32 %v5977_v56, %v2712_v23  ;;  %v3114_v38 = vld [vmem:[%s3368_s12 + $0x40] sm:$0xff]  ;;  %v3116_v22 = vld [vmem:[%s3368_s12 + $0x50] sm:$0xff] }
 0x4b2   : > { %v2771_v19 = vadd.f32 %v3106_v33, %v2739_v4  ;;  %v2772_v24 = vadd.f32 %v3107_v45, %v2740_v34  ;;  %v2773_v60 = vadd.f32 %v3108_v44, %v2741_v58  ;;  %v2774_v20 = vadd.f32 %v3109_v40, %v2742_v13  ;;  %v3115_v58 = vld [vmem:[%s3368_s12 + $0x48] sm:$0xff] }
 0x4b3   : > { %v2747_v57 = vmul.f32 %v5977_v56, %v2713_v46  ;;  %v2775_v41 = vadd.f32 %v3110_v61, %v2743_v15  ;;  %v2748_v16 = vmul.f32 %v5977_v56, %v2714_v51  ;;  %v2776_v28 = vadd.f32 %v3111_v54, %v2744_v39  ;;  %v3121_v51 = vld [vmem:[%s3368_s12 + $0x78] sm:$0xff]  ;;  %v3123_v61 = vld [vmem:[%s3368_s12 + $0x88] sm:$0xff] }
 0x4b4   : > { %2803 = vst.msk [vmem:[%s6017_s26] sm:$0xff] %vm329_vm0, %v2771_v19  ;;  %v2749_v2 = vmul.f32 %v5977_v56, %v2715_v48  ;;  %v2777_v53 = vadd.f32 %v3112_v7, %v2745_v31  ;;  %v2750_v55 = vmul.f32 %v5977_v56, %v2716_v0  ;;  %v2778_v21 = vadd.f32 %v3113_v62, %v2746_v12  ;;  %v3118_v31 = vld [vmem:[%s3368_s12 + $0x60] sm:$0xff]  ;;  %v3127_v62 = vld [vmem:[%s3368_s12 + $0xa8] sm:$0xff] }
 0x4b5   : > { %2804 = vst.msk [vmem:[%s6017_s26 + $0x8] sm:$0xff] %vm329_vm0, %v2772_v24  ;;  %v2751_v14 = vmul.f32 %v5977_v56, %v2717_v36  ;;  %v2779_v4 = vadd.f32 %v3114_v38, %v2747_v57  ;;  %v2752_v34 = vmul.f32 %v5977_v56, %v2718_v25  ;;  %v2780_v6 = vadd.f32 %v3115_v58, %v2748_v16  ;;  %v3120_v24 = vld [vmem:[%s3368_s12 + $0x70] sm:$0xff]  ;;  %v3125_v36 = vld [vmem:[%s3368_s12 + $0x98] sm:$0xff] }
 0x4b6   : > { %2805 = vst.msk [vmem:[%s6017_s26 + $0x10] sm:$0xff] %vm329_vm0, %v2773_v60  ;;  %v2721_v8 = vsub.f32 %v5735_v3, %v5957_v26  ;;  %v2753_v13 = vmul.f32 %v5977_v56, %v2719_v10  ;;  %v2781_v15 = vadd.f32 %v3116_v22, %v2749_v2  ;;  %v2722_v23 = vsub.f32 %v5739_v50, %v5957_v26  ;;  %v3117_v3 = vld [vmem:[%s3368_s12 + $0x58] sm:$0xff]  ;;  %v3124_v16 = vld [vmem:[%s3368_s12 + $0x90] sm:$0xff]  ;;  %v3131_v22 = vld [vmem:[%s3368_s12 + $0xc8] sm:$0xff] }
 0x4b7   : > { %2806 = vst.msk [vmem:[%s6017_s26 + $0x18] sm:$0xff] %vm329_vm0, %v2774_v20  ;;  %v2754_v46 = vmul.f32 %v5977_v56, %v2720_v18  ;;  %v2782_v39 = vadd.f32 %v3117_v3, %v2750_v55  ;;  %v2783_v33 = vadd.f32 %v3118_v31, %v2751_v14  ;;  %v2724_v50 = vsub.f32 %v5747_v49, %v5957_v26  ;;  %v3119_v18 = vld [vmem:[%s3368_s12 + $0x68] sm:$0xff]  ;;  %v3122_v20 = vld [vmem:[%s3368_s12 + $0x80] sm:$0xff]  ;;  %v3128_v38 = vld [vmem:[%s3368_s12 + $0xb0] sm:$0xff] }
 0x4b8   : > { %2807 = vst.msk [vmem:[%s6017_s26 + $0x20] sm:$0xff] %vm329_vm0, %v2775_v41  ;;  %v2755_v10 = vmul.f32 %v5977_v56, %v2721_v8  ;;  %v2756_v1 = vmul.f32 %v5977_v56, %v2722_v23  ;;  %v2784_v19 = vadd.f32 %v3119_v18, %v2752_v34  ;;  %v2757_v45 = vmul.f32 %v5977_v56, %v2723_v37  ;;  %v3129_v58 = vld [vmem:[%s3368_s12 + $0xb8] sm:$0xff]  ;;  %v3130_v8 = vld [vmem:[%s3368_s12 + $0xc0] sm:$0xff]  ;;  %v3135_v31 = vld [vmem:[%s3368_s12 + $0xe8] sm:$0xff] }
 0x4b9   : > { %2808 = vst.msk [vmem:[%s6017_s26 + $0x28] sm:$0xff] %vm329_vm0, %v2776_v28  ;;  %v2785_v44 = vadd.f32 %v3120_v24, %v2753_v13  ;;  %v2726_v49 = vsub.f32 %v5755_v35, %v5957_v26  ;;  %v2758_v60 = vmul.f32 %v5977_v56, %v2724_v50  ;;  %v2786_v12 = vadd.f32 %v3121_v51, %v2754_v46  ;;  %v3132_v46 = vld [vmem:[%s3368_s12 + $0xd0] sm:$0xff] }
 0x4ba   : > { %2809 = vst.msk [vmem:[%s6017_s26 + $0x30] sm:$0xff] %vm329_vm0, %v2777_v53  ;;  %v2759_v40 = vmul.f32 %v5977_v56, %v2725_v59  ;;  %v2787_v48 = vadd.f32 %v3122_v20, %v2755_v10  ;;  %v2728_v35 = vsub.f32 %v5765_v30, %v5957_v26  ;;  %v2788_v41 = vadd.f32 %v3123_v61, %v2756_v1  ;;  %v3126_v53 = vld [vmem:[%s3368_s12 + $0xa0] sm:$0xff] }
 0x4bb   : > { %2810 = vst.msk [vmem:[%s6017_s26 + $0x38] sm:$0xff] %vm329_vm0, %v2778_v21  ;;  %v2760_v57 = vmul.f32 %v5977_v56, %v2726_v49  ;;  %v2761_v0 = vmul.f32 %v5977_v56, %v2727_v5  ;;  %v2789_v54 = vadd.f32 %v3124_v16, %v2757_v45  ;;  %v2730_v30 = vsub.f32 %v5773_v52, %v5957_v26 }
 0x4bc   : > { %2811 = vst.msk [vmem:[%s6017_s26 + $0x40] sm:$0xff] %vm329_vm0, %v2779_v4  ;;  %v2762_v28 = vmul.f32 %v5977_v56, %v2728_v35  ;;  %v2790_v2 = vadd.f32 %v3125_v36, %v2758_v60  ;;  %v2763_v7 = vmul.f32 %v5977_v56, %v2729_v43  ;;  %v2791_v25 = vadd.f32 %v3126_v53, %v2759_v40 }
 0x4bd   : > { %2812 = vst.msk [vmem:[%s6017_s26 + $0x48] sm:$0xff] %vm329_vm0, %v2780_v6  ;;  %v2732_v52 = vsub.f32 %v5834_v42, %v5957_v26  ;;  %v2764_v55 = vmul.f32 %v5977_v56, %v2730_v30  ;;  %v2792_v21 = vadd.f32 %v3127_v62, %v2760_v57  ;;  %v2765_v14 = vmul.f32 %v5977_v56, %v2731_v27 }
 0x4be   : > { %2813 = vst.msk [vmem:[%s6017_s26 + $0x50] sm:$0xff] %vm329_vm0, %v2781_v15  ;;  %v2793_v4 = vadd.f32 %v3128_v38, %v2761_v0  ;;  %v2734_v42 = vsub.f32 %v5887_v17, %v5957_v26  ;;  %v2794_v6 = vadd.f32 %v3129_v58, %v2762_v28  ;;  %v2767_v29 = vmul.f32 %v5977_v56, %v2733_v11 }
 0x4bf   : > { %2814 = vst.msk [vmem:[%s6017_s26 + $0x58] sm:$0xff] %vm329_vm0, %v2782_v39  ;;  %v2766_v34 = vmul.f32 %v5977_v56, %v2732_v52  ;;  %v2795_v13 = vadd.f32 %v3130_v8, %v2763_v7  ;;  %v2796_v15 = vadd.f32 %v3131_v22, %v2764_v55  ;;  %v2769_v23 = vmul.f32 %v5977_v56, %v2735_v47  ;;  %v3134_v47 = vld [vmem:[%s3368_s12 + $0xe0] sm:$0xff] }
 0x4c0   : > { %2815 = vst.msk [vmem:[%s6017_s26 + $0x60] sm:$0xff] %vm329_vm0, %v2783_v33  ;;  %v2768_v17 = vmul.f32 %v5977_v56, %v2734_v42  ;;  %v2797_v3 = vadd.f32 %v3132_v46, %v2765_v14  ;;  %v2770_v39 = vmul.f32 %v5977_v56, %v2736_v63  ;;  %v2799_v10 = vadd.f32 %v3134_v47, %v2767_v29  ;;  %v3137_v63 = vld [vmem:[%s3368_s12 + $0xf8] sm:$0xff] }
 0x4c1   : > { %2816 = vst.msk [vmem:[%s6017_s26 + $0x68] sm:$0xff] %vm329_vm0, %v2784_v19  ;;  %v2798_v37 = vadd.f32 %v3133_v32, %v2766_v34  ;;  %v2801_v26 = vadd.f32 %v3136_v9, %v2769_v23 }
 0x4c2   : > { %2817 = vst.msk [vmem:[%s6017_s26 + $0x70] sm:$0xff] %vm329_vm0, %v2785_v44  ;;  %v2800_v33 = vadd.f32 %v3135_v31, %v2768_v17  ;;  %v2802_v56 = vadd.f32 %v3137_v63, %v2770_v39 }
 0x4c3   : > { %2818 = vst.msk [vmem:[%s6017_s26 + $0x78] sm:$0xff] %vm329_vm0, %v2786_v12 }
 0x4c4   : > { %2819 = vst.msk [vmem:[%s6017_s26 + $0x80] sm:$0xff] %vm329_vm0, %v2787_v48 }
 0x4c5   : > { %2820 = vst.msk [vmem:[%s6017_s26 + $0x88] sm:$0xff] %vm329_vm0, %v2788_v41 }
 0x4c6   : > { %2821 = vst.msk [vmem:[%s6017_s26 + $0x90] sm:$0xff] %vm329_vm0, %v2789_v54 }
 0x4c7   : > { %2822 = vst.msk [vmem:[%s6017_s26 + $0x98] sm:$0xff] %vm329_vm0, %v2790_v2 }
 0x4c8   : > { %2823 = vst.msk [vmem:[%s6017_s26 + $0xa0] sm:$0xff] %vm329_vm0, %v2791_v25 }
 0x4c9   : > { %2824 = vst.msk [vmem:[%s6017_s26 + $0xa8] sm:$0xff] %vm329_vm0, %v2792_v21 }
 0x4ca   : > { %2825 = vst.msk [vmem:[%s6017_s26 + $0xb0] sm:$0xff] %vm329_vm0, %v2793_v4 }
 0x4cb   : > { %2826 = vst.msk [vmem:[%s6017_s26 + $0xb8] sm:$0xff] %vm329_vm0, %v2794_v6 }
 0x4cc   : > { %2827 = vst.msk [vmem:[%s6017_s26 + $0xc0] sm:$0xff] %vm329_vm0, %v2795_v13 }
 0x4cd   : > { %2828 = vst.msk [vmem:[%s6017_s26 + $0xc8] sm:$0xff] %vm329_vm0, %v2796_v15 }
 0x4ce   : > { %2829 = vst.msk [vmem:[%s6017_s26 + $0xd0] sm:$0xff] %vm329_vm0, %v2797_v3 }
 0x4cf   : > { %2830 = vst.msk [vmem:[%s6017_s26 + $0xd8] sm:$0xff] %vm329_vm0, %v2798_v37 }
 0x4d0   : > { %2831 = vst.msk [vmem:[%s6017_s26 + $0xe0] sm:$0xff] %vm329_vm0, %v2799_v10 }
 0x4d1   : > { %2832 = vst.msk [vmem:[%s6017_s26 + $0xe8] sm:$0xff] %vm329_vm0, %v2800_v33 }
 0x4d2   : > { %2833 = vst.msk [vmem:[%s6017_s26 + $0xf0] sm:$0xff] %vm329_vm0, %v2801_v26 }
 0x4d3   : > { %2834 = vst.msk [vmem:[%s6017_s26 + $0xf8] sm:$0xff] %vm329_vm0, %v2802_v56 }
 0x4d4   : > { %3195 = shalt.err (!%p3192_p4)
}
 0x4d5   : > { %s3239_s18 = smov 128   ;;  %s3240_s26 = smov 8  }
 0x4d6   : > { %3045 = dma.vmem_to_hbm [thread:$0]  (%p3326_p11), %s2849_s14, 4096, %s2851_s15, %s2836_s11, %s3239_s18, %s3239_s18, %s3240_s26  }
 0x4d7 PF: > { %s2865_s28 = sand.u32 1, %s3222_s21   ;;  %p6742_p7 = scmp.ge.s32.totalorder %s3234_s24, 2 }
 0x4d8   : > { %s2866_s25 = scalar_lea.sflag [#allocation4], %s2865_s28 }
 0x4d9   : > { %p3052_p5 = pnand %p6742_p7, %p3330_p12 }
 0x4db   : > { %p3053_p8 = pneg %p3052_p5 }
 0x4dd   : > { %3217 = dma.done.wait (%p3053_p8), %s2866_s25, 4096  }
 0x4de   : > { %3219 = vsyncadd (%p3053_p8), %s2866_s25, 4294963200  ;;  %p19_p10 = scmp.ge.s32.totalorder %s3301_s27, 4   ;;  %s6743_s21 = smov %s3226_s22 }
 0x4df   : > { %s6744_s22 = smov %s3230_s23  ;;  %s6745_s23 = smov %s3313_s30 }
 0x4e0   : > { %s6746_s24 = smov %s3301_s27  ;;  %21 = sbr.rel (!%p19_p10) target bundleno = 5 (0x5), region = 89 }
 0x4e5   :  { %2872 = vsyncpa [#allocation3], 1 }
 0x4e6   :  { %2874 = vsyncpa [#allocation3 + $0x1], 1 }
 0x4e7   :  { %2875 = vsyncpa [#allocation4], 1 }
 0x4e8   :  { %2877 = vsyncpa [#allocation4 + $0x1], 1 }

</bundles_post_ra>
